<compile_context>
chip_gen: v5e
topology: v5e:2x2
jax: 0.10.0
libtpu: 0.0.40
codegen_flags: <defaults>
</compile_context>

<pallas_src>
import functools
import math

import jax
import jax.numpy as jnp
from jax.experimental import pallas as pl
from jax.experimental.pallas import tpu as pltpu

PADDING_IDX = 1
NEG_INF = -1e18          # plain Python float (jnp scalars captured in kernels break tracing)
LN_EPS = 1e-6            # the reference module uses eps=1e-6 for every LayerNorm
_GELU_C = math.sqrt(2.0 / math.pi)


# ----------------------------- small helpers --------------------------------

def _parallel():
    return pltpu.CompilerParams(dimension_semantics=("parallel",))


def _row_blocks(m, max_tile=256):
    """Row tile (multiple of 8) and padded row count; aims for >=2 grid steps when m > 8
    so both v7x TensorCores get work, and caps the tile at 256 rows for v5e's scoped VMEM."""
    half = -(-m // 2)
    tm = min(max_tile, max(8, ((half + 7) // 8) * 8))
    mp = ((m + tm - 1) // tm) * tm
    return tm, mp


def _pad_rows(x, mp):
    m = x.shape[0]
    if mp == m:
        return x
    return jnp.pad(x, ((0, mp - m), (0, 0)))


def _const_spec(shape):
    """BlockSpec for a block whose index never changes (weights/biases): single-buffered."""
    idx = lambda i: (0,) * len(shape)
    if hasattr(pl, "Buffered"):
        try:
            return pl.BlockSpec(shape, idx, pipeline_mode=pl.Buffered(1))
        except TypeError:  # older BlockSpec without pipeline_mode
            pass
    return pl.BlockSpec(shape, idx)


# ----------------------------- in-kernel helpers ----------------------------

def _layernorm(x, g, b):
    mu = jnp.mean(x, axis=-1, keepdims=True)
    var = jnp.mean(jnp.square(x - mu), axis=-1, keepdims=True)
    return (x - mu) * jax.lax.rsqrt(var + LN_EPS) * g + b


def _gelu(h):
    # PreSumm-style gelu (tanh approximation)
    return 0.5 * h * (1.0 + jnp.tanh(_GELU_C * (h + 0.044715 * h * h * h)))


def _softmax_rows(s):
    s = s - jnp.max(s, axis=-1, keepdims=True)
    p = jnp.exp(s)
    return p * pl.reciprocal(jnp.sum(p, axis=-1, keepdims=True), approx=True)


# ----------------------------- row-tiled linears -----------------------------

def _linear_kernel(x_ref, w_ref, b_ref, o_ref):
    y = jnp.dot(x_ref[...].astype(jnp.bfloat16), w_ref[...],
                preferred_element_type=jnp.float32) + b_ref[...]
    o_ref[...] = y.astype(o_ref.dtype)


def linear(x2d, w, b, out_dtype=jnp.bfloat16):
    """y = x @ w + b.  w is bf16; output bf16 by default (feeds another matmul)."""
    M, K = x2d.shape
    N = w.shape[1]
    tm, Mp = _row_blocks(M)
    y = pl.pallas_call(
        _linear_kernel,
        out_shape=jax.ShapeDtypeStruct((Mp, N), out_dtype),
        grid=(Mp // tm,),
        in_specs=[pl.BlockSpec((tm, K), lambda i: (i, 0)),
                  _const_spec((K, N)),
                  _const_spec((1, N))],
        out_specs=pl.BlockSpec((tm, N), lambda i: (i, 0)),
        compiler_params=_parallel(),
    )(_pad_rows(x2d, Mp), w, b.reshape(1, N))
    return y if Mp == M else y[:M]


def _linear_residual_kernel(x_ref, r_ref, w_ref, b_ref, o_ref):
    o_ref[...] = (jnp.dot(x_ref[...].astype(jnp.bfloat16), w_ref[...],
                          preferred_element_type=jnp.float32)
                  + b_ref[...] + r_ref[...])


def linear_residual(x2d, res2d, w, b):
    """y = x @ w + b + res (fused self-attn output projection + residual add); f32 out."""
    M, K = x2d.shape
    N = w.shape[1]
    tm, Mp = _row_blocks(M)
    y = pl.pallas_call(
        _linear_residual_kernel,
        out_shape=jax.ShapeDtypeStruct((Mp, N), jnp.float32),
        grid=(Mp // tm,),
        in_specs=[pl.BlockSpec((tm, K), lambda i: (i, 0)),
                  pl.BlockSpec((tm, N), lambda i: (i, 0)),
                  _const_spec((K, N)),
                  _const_spec((1, N))],
        out_specs=pl.BlockSpec((tm, N), lambda i: (i, 0)),
        compiler_params=_parallel(),
    )(_pad_rows(x2d, Mp), _pad_rows(res2d, Mp), w, b.reshape(1, N))
    return y if Mp == M else y[:M]


def _ln_linear_kernel(x_ref, g_ref, b_ref, w_ref, wb_ref, o_ref):
    xn = _layernorm(x_ref[...], g_ref[...], b_ref[...])
    y = jnp.dot(xn.astype(jnp.bfloat16), w_ref[...],
                preferred_element_type=jnp.float32) + wb_ref[...]
    o_ref[...] = y.astype(o_ref.dtype)


def ln_linear(x2d, g, b, w, wb, out_dtype=jnp.bfloat16):
    """y = LayerNorm(x) @ w + wb (LayerNorm fused into its consumer projection); bf16 out."""
    M, K = x2d.shape
    N = w.shape[1]
    tm, Mp = _row_blocks(M)
    y = pl.pallas_call(
        _ln_linear_kernel,
        out_shape=jax.ShapeDtypeStruct((Mp, N), out_dtype),
        grid=(Mp // tm,),
        in_specs=[pl.BlockSpec((tm, K), lambda i: (i, 0)),
                  _const_spec((1, K)),
                  _const_spec((1, K)),
                  _const_spec((K, N)),
                  _const_spec((1, N))],
        out_specs=pl.BlockSpec((tm, N), lambda i: (i, 0)),
        compiler_params=_parallel(),
    )(_pad_rows(x2d, Mp), g.reshape(1, K), b.reshape(1, K), w, wb.reshape(1, N))
    return y if Mp == M else y[:M]


def _layernorm_kernel(x_ref, g_ref, b_ref, o_ref):
    o_ref[...] = _layernorm(x_ref[...], g_ref[...], b_ref[...])


def layernorm(x2d, g, b):
    M, D = x2d.shape
    tm, Mp = _row_blocks(M)
    y = pl.pallas_call(
        _layernorm_kernel,
        out_shape=jax.ShapeDtypeStruct((Mp, D), jnp.float32),
        grid=(Mp // tm,),
        in_specs=[pl.BlockSpec((tm, D), lambda i: (i, 0)),
                  _const_spec((1, D)),
                  _const_spec((1, D))],
        out_specs=pl.BlockSpec((tm, D), lambda i: (i, 0)),
        compiler_params=_parallel(),
    )(_pad_rows(x2d, Mp), g.reshape(1, D), b.reshape(1, D))
    return y if Mp == M else y[:M]


# ----------------------------- attention kernels -----------------------------

def _self_attn_kernel(qkv_ref, pad_ref, o_ref, *, heads, d_model):
    """Masked self-attention; all heads of one batch element; merged-head lane-dense output.
    qkv_ref: (1, T, 3d) bf16 (scale pre-folded into the Q weights); pad_ref: (1, 1, T) f32."""
    T = qkv_ref.shape[1]
    dh = d_model // heads
    row = jax.lax.broadcasted_iota(jnp.int32, (T, T), 0)
    col = jax.lax.broadcasted_iota(jnp.int32, (T, T), 1)
    masked = jnp.logical_or(col > row, pad_ref[0] > 0.5)            # (T, T) built in-kernel
    for h in range(heads):
        q = qkv_ref[0, :, h * dh:(h + 1) * dh]                      # (T, dh) bf16
        k = qkv_ref[0, :, d_model + h * dh:d_model + (h + 1) * dh]
        v = qkv_ref[0, :, 2 * d_model + h * dh:2 * d_model + (h + 1) * dh]
        s = jax.lax.dot_general(q, k, (((1,), (1,)), ((), ())),
                                preferred_element_type=jnp.float32)  # (T, T)
        p = _softmax_rows(jnp.where(masked, NEG_INF, s))
        o = jnp.dot(p.astype(jnp.bfloat16), v, preferred_element_type=jnp.float32)
        o_ref[0, :, h * dh:(h + 1) * dh] = o.astype(o_ref.dtype)


def self_attention(qkv, tgt_pad_f, *, heads, d_model):
    B, T, _ = qkv.shape
    kern = functools.partial(_self_attn_kernel, heads=heads, d_model=d_model)
    return pl.pallas_call(
        kern,
        out_shape=jax.ShapeDtypeStruct((B, T, d_model), jnp.bfloat16),
        grid=(B,),
        in_specs=[pl.BlockSpec((1, T, 3 * d_model), lambda i: (i, 0, 0)),
                  pl.BlockSpec((1, 1, T), lambda i: (i, 0, 0))],
        out_specs=pl.BlockSpec((1, T, d_model), lambda i: (i, 0, 0)),
        compiler_params=_parallel(),
    )(qkv, tgt_pad_f)


def _ctx_attn_kernel(q2_ref, kv_ref, sel_ref, selexp_ref, o_ref, *, heads, d_model):
    """Context attention over the full memory bank with the HierentAttention selection mask
    built in-kernel: keep[t,j] = sel[t, sent(j)] * tok_valid[j] via a tiny 0/1 matmul.
    q2_ref: (1,T,2d) bf16 (ctx query is the second half, scale pre-folded);
    kv_ref: (1,S,2d) bf16; sel_ref: (1,T,n_sent) f32; selexp_ref: (1,n_sent,S) bf16."""
    dh = d_model // heads
    sel = sel_ref[0].astype(jnp.bfloat16)
    keep = jnp.dot(sel, selexp_ref[0], preferred_element_type=jnp.float32)   # (T, S)
    masked = keep < 0.5
    for h in range(heads):
        q = q2_ref[0, :, d_model + h * dh:d_model + (h + 1) * dh]            # (T, dh)
        k = kv_ref[0, :, h * dh:(h + 1) * dh]                                # (S, dh)
        v = kv_ref[0, :, d_model + h * dh:d_model + (h + 1) * dh]            # (S, dh)
        s = jax.lax.dot_general(q, k, (((1,), (1,)), ((), ())),
                                preferred_element_type=jnp.float32)          # (T, S)
        p = _softmax_rows(jnp.where(masked, NEG_INF, s))
        o = jnp.dot(p.astype(jnp.bfloat16), v, preferred_element_type=jnp.float32)
        o_ref[0, :, h * dh:(h + 1) * dh] = o.astype(o_ref.dtype)


def context_attention(q2, kv, sent_sel_f, sel_expand_bf, *, heads, d_model):
    B, T, _ = q2.shape
    S = kv.shape[1]
    n_sent = sent_sel_f.shape[2]
    kern = functools.partial(_ctx_attn_kernel, heads=heads, d_model=d_model)
    # TODO(synk): tile over S (flash-style online softmax, 'arbitrary' kv axis) once
    # n_sent*n_tok grows to thousands of tokens so the per-head (T,S) score tile stays in VMEM
    # on v7x (64 MiB), and let K/V DMA overlap compute.
    return pl.pallas_call(
        kern,
        out_shape=jax.ShapeDtypeStruct((B, T, d_model), jnp.bfloat16),
        grid=(B,),
        in_specs=[pl.BlockSpec((1, T, 2 * d_model), lambda i: (i, 0, 0)),
                  pl.BlockSpec((1, S, 2 * d_model), lambda i: (i, 0, 0)),
                  pl.BlockSpec((1, T, n_sent), lambda i: (i, 0, 0)),
                  pl.BlockSpec((1, n_sent, S), lambda i: (i, 0, 0))],
        out_specs=pl.BlockSpec((1, T, d_model), lambda i: (i, 0, 0)),
        compiler_params=_parallel(),
    )(q2, kv, sent_sel_f, sel_expand_bf)


def _ent_scores_kernel(q2_ref, k_ref, m_ref, edge_ref, o_ref, *, d_model):
    q = q2_ref[0, :, :d_model]                   # (T, d) bf16 — HierentAttention query (no scale)
    k = k_ref[0]                                 # (E, d) bf16
    mask = m_ref[0]                              # (1, E) f32; 1.0 == masked (reference semantics)
    s = jax.lax.dot_general(q, k, (((1,), (1,)), ((), ())),
                            preferred_element_type=jnp.float32)              # (T, E)
    p = _softmax_rows(jnp.where(mask > 0.5, NEG_INF, s))
    o_ref[0] = jax.lax.dot_general(p.astype(jnp.bfloat16), edge_ref[0],
                                   (((1,), (1,)), ((), ())),
                                   preferred_element_type=jnp.float32)       # (T, n_sent)


def ent_para_scores(q2, ent_k, ent_mask_f, edge_bf, *, d_model):
    """attn_para = softmax(mask(q @ k^T)) @ edge^T, per batch element."""
    B, T, _ = q2.shape
    E = ent_k.shape[1]
    S = edge_bf.shape[1]
    kern = functools.partial(_ent_scores_kernel, d_model=d_model)
    return pl.pallas_call(
        kern,
        out_shape=jax.ShapeDtypeStruct((B, T, S), jnp.float32),
        grid=(B,),
        in_specs=[pl.BlockSpec((1, T, 2 * d_model), lambda i: (i, 0, 0)),
                  pl.BlockSpec((1, E, d_model), lambda i: (i, 0, 0)),
                  pl.BlockSpec((1, 1, E), lambda i: (i, 0, 0)),
                  pl.BlockSpec((1, S, E), lambda i: (i, 0, 0))],
        out_specs=pl.BlockSpec((1, T, S), lambda i: (i, 0, 0)),
        compiler_params=_parallel(),
    )(q2, ent_k, ent_mask_f, edge_bf)


# ----------------------------- fused ctx-out + FFN ---------------------------

def _ctx_out_ffn_kernel(x_ref, wo_ref, bo_ref, g_ref, b_ref,
                        w1_ref, b1_ref, w2_ref, b2_ref, o_ref):
    # mid = context-attn output projection; the reference re-binds query_norm = mid before the
    # FFN call, so the FFN input is drop(mid) + query_norm == 2 * mid in eval mode.
    mid = (jnp.dot(x_ref[...].astype(jnp.bfloat16), wo_ref[...],
                   preferred_element_type=jnp.float32) + bo_ref[...])
    x = mid + mid
    xn = _layernorm(x, g_ref[...], b_ref[...])
    h = (jnp.dot(xn.astype(jnp.bfloat16), w1_ref[...],
                 preferred_element_type=jnp.float32) + b1_ref[...])
    h = _gelu(h)
    y = (jnp.dot(h.astype(jnp.bfloat16), w2_ref[...],
                 preferred_element_type=jnp.float32) + b2_ref[...])
    o_ref[...] = y + x


def ctx_out_ffn(ctx2d, wo, bo, ffn_p):
    M, D = ctx2d.shape
    F = ffn_p['w1'].shape[1]
    tm, Mp = _row_blocks(M)
    # TODO(synk): at production sizes tile the FFN hidden dim F (second 'arbitrary' grid axis,
    # f32 accumulator scratch, tF a multiple of 256), set vmem_limit_bytes per generation
    # (v5e 16 MiB scoped default), and consider fp8 weights on v7x.
    y = pl.pallas_call(
        _ctx_out_ffn_kernel,
        out_shape=jax.ShapeDtypeStruct((Mp, D), jnp.float32),
        grid=(Mp // tm,),
        in_specs=[pl.BlockSpec((tm, D), lambda i: (i, 0)),
                  _const_spec((D, D)),
                  _const_spec((1, D)),
                  _const_spec((1, D)),
                  _const_spec((1, D)),
                  _const_spec((D, F)),
                  _const_spec((1, F)),
                  _const_spec((F, D)),
                  _const_spec((1, D))],
        out_specs=pl.BlockSpec((tm, D), lambda i: (i, 0)),
        compiler_params=_parallel(),
    )(_pad_rows(ctx2d, Mp), wo, bo.reshape(1, D),
      ffn_p['ln_g'].reshape(1, D), ffn_p['ln_b'].reshape(1, D),
      ffn_p['w1'], ffn_p['b1'].reshape(1, F), ffn_p['w2'], ffn_p['b2'].reshape(1, D))
    return y if Mp == M else y[:M]


# ----------------------------- model glue (JAX) ------------------------------

def decoder_layer(p, inputs, memory_flat_bf, sel_expand_bf, ent_feature_bf,
                  ent_mask_f, edge_bf, tgt_pad_f, *, heads, max_para=5):
    B, T, d = inputs.shape
    M = B * T
    x2d = inputs.reshape(M, d)

    # ---- self attention: fused LN1 + QKV (bf16, attention scale folded into Wq/bq) ----
    qkv = ln_linear(x2d, p['ln1_g'], p['ln1_b'], p['self_wqkv'], p['self_bqkv'])     # (M, 3d) bf16
    ctx = self_attention(qkv.reshape(B, T, 3 * d), tgt_pad_f, heads=heads, d_model=d)
    query = linear_residual(ctx.reshape(M, d), x2d, p['self_wo'], p['self_bo'])      # drop(attn)+inputs

    # ---- HierentAttention: fused LN2 + {ent-query | ctx-query} projection (bf16) ----
    qq = ln_linear(query, p['ln2_g'], p['ln2_b'], p['entq_ctxq_w'], p['entq_ctxq_b'])  # (M, 2d)
    qq = qq.reshape(B, T, 2 * d)
    E = ent_feature_bf.shape[1]
    ent_k = linear(ent_feature_bf.reshape(B * E, d), p['ent_wk'], p['ent_bk']).reshape(B, E, d)
    attn_para = ent_para_scores(qq, ent_k, ent_mask_f, edge_bf, d_model=d)           # (B,T,n_sent)

    n_sent = edge_bf.shape[1]
    k_sel = min(max_para, n_sent)
    # TODO(synk): the top-k sentence selection (argsort/index_select in the reference) stays in
    # plain JAX; only the resulting per-query selection matrix reaches the context-attn kernel.
    _, top_idx = jax.lax.top_k(attn_para, k_sel)                                     # (B,T,k_sel)
    sent_sel_f = jnp.any(top_idx[:, :, :, None] == jnp.arange(n_sent)[None, None, None, :],
                         axis=2).astype(jnp.float32)                                 # (B,T,n_sent)

    # ---- context attention over the full memory bank (selection mask built in-kernel) ----
    # (identical softmax support as gathering the selected sentences; no sel_feat duplication)
    S = memory_flat_bf.shape[1]
    kv = linear(memory_flat_bf.reshape(B * S, d), p['ctx_wkv'], p['ctx_bkv']).reshape(B, S, 2 * d)
    ctx2 = context_attention(qq, kv, sent_sel_f, sel_expand_bf, heads=heads, d_model=d)

    # ---- fused: context output projection + (drop(mid)+mid) + FFN (+ residual) ----
    out = ctx_out_ffn(ctx2.reshape(M, d), p['ctx_wo'], p['ctx_bo'], p['ffn'])        # (M, d) f32
    return out.reshape(B, T, d)


def positional_encoding(length, dim):
    position = jnp.arange(length, dtype=jnp.float32)[:, None]
    div_term = jnp.exp(jnp.arange(0, dim, 2, dtype=jnp.float32) * -(math.log(10000.0) / dim))
    pe = jnp.zeros((length, dim), jnp.float32)
    pe = pe.at[:, 0::2].set(jnp.sin(position * div_term))
    pe = pe.at[:, 1::2].set(jnp.cos(position * div_term))
    return pe


def transformer_decoder(params, tgt, memory_bank, src, edge, ent, ent_feature,
                        *, heads, num_layers, max_para=5):
    B, n_sent, n_ents = edge.shape
    d_model = memory_bank.shape[3]
    emb_dim = params['embedding'].shape[1]

    src_words = src.T.reshape(B, n_sent, -1)                  # (B, n_sent, n_tok)
    tgt_words = tgt.T                                         # (B, tgt_len)
    tgt_len = tgt_words.shape[1]

    # embeddings + input projection + positional encoding (dropout == identity)
    emb = params['embedding'][tgt]                            # (tgt_len, B, emb_dim)
    emb = linear(emb.reshape(tgt_len * B, emb_dim), params['w_input'], params['b_input'],
                 out_dtype=jnp.float32)
    output = emb.reshape(tgt_len, B, d_model).transpose(1, 0, 2)
    output = output * math.sqrt(d_model) + positional_encoding(tgt_len, d_model)[None, :, :]

    # small masks only; the big per-query context mask is built inside the attention kernel
    tgt_pad_f = (tgt_words == PADDING_IDX).astype(jnp.float32)[:, None, :]           # (B,1,L)
    # NOTE: faithfully replicating the reference — ent_mask is True for entities with at least
    # one non-pad token and that exact set is what HierentAttention masked_fill's with -1e18.
    ent_mask_f = (jnp.sum(ent != PADDING_IDX, axis=-1) > 0).astype(jnp.float32)[:, None, :]

    n_tok = src_words.shape[2]
    S = n_sent * n_tok
    tok_valid = (src_words != PADDING_IDX).reshape(B, S).astype(jnp.float32)         # (B, S)
    expand = jnp.repeat(jnp.eye(n_sent, dtype=jnp.float32), n_tok, axis=1)           # (n_sent,S)
    sel_expand_bf = (expand[None, :, :] * tok_valid[:, None, :]).astype(jnp.bfloat16)

    memory_flat_bf = memory_bank.reshape(B, n_sent * memory_bank.shape[2],
                                         d_model).astype(jnp.bfloat16)
    ent_feature_bf = ent_feature.astype(jnp.bfloat16)
    edge_bf = edge.astype(jnp.bfloat16)

    for i in range(num_layers):
        output = decoder_layer(params['layers'][i], output, memory_flat_bf, sel_expand_bf,
                               ent_feature_bf, ent_mask_f, edge_bf, tgt_pad_f,
                               heads=heads, max_para=max_para)

    output = layernorm(output.reshape(B * tgt_len, d_model), params['lnf_g'], params['lnf_b'])
    return output.reshape(B, tgt_len, d_model).transpose(1, 0, 2)   # (tgt_len, B, d_model)


# ----------------------------- parameters -----------------------------------

def init_params(key, vocab, emb_dim, d_model, d_ff, num_layers):
    it = iter(jax.random.split(key, 512))

    def w(shape, scale=0.05):
        return scale * jax.random.normal(next(it), shape, dtype=jnp.float32)

    def mha_p():
        return {'wq': w((d_model, d_model)), 'bq': w((d_model,), 0.01),
                'wk': w((d_model, d_model)), 'bk': w((d_model,), 0.01),
                'wv': w((d_model, d_model)), 'bv': w((d_model,), 0.01),
                'wo': w((d_model, d_model)), 'bo': w((d_model,), 0.01)}

    ones = jnp.ones((d_model,), jnp.float32)
    zeros = jnp.zeros((d_model,), jnp.float32)
    layers = []
    for _ in range(num_layers):
        layers.append({
            'self_attn': mha_p(),
            'context_attn': mha_p(),
            'ent_attn': {'w_in': w((d_model, d_model)), 'b_in': w((d_model,), 0.01),
                         'w_ent': w((d_model, d_model)), 'b_ent': w((d_model,), 0.01)},
            'ffn': {'ln_g': ones, 'ln_b': zeros,
                    'w1': w((d_model, d_ff)), 'b1': w((d_ff,), 0.01),
                    'w2': w((d_ff, d_model)), 'b2': w((d_model,), 0.01)},
            'ln1_g': ones, 'ln1_b': zeros,
            'ln2_g': ones, 'ln2_b': zeros,
        })
    embedding = w((vocab, emb_dim), 0.1)
    embedding = embedding.at[PADDING_IDX].set(0.0)   # nn.Embedding(padding_idx=1) zeroes the pad row
    return {'embedding': embedding,
            'w_input': w((emb_dim, d_model)), 'b_input': w((d_model,), 0.01),
            'layers': layers,
            'lnf_g': ones, 'lnf_b': zeros}


def prepare_params(params, heads):
    """Fuse per-layer projection weights (QKV, ent+ctx query, ctx KV), fold the 1/sqrt(d_head)
    attention scale into the Q projections, and cast matmul weights to bf16 for the MXU;
    biases and LayerNorm parameters stay f32."""
    def bf(x):
        return x.astype(jnp.bfloat16)

    layers = []
    for lp in params['layers']:
        sa, ca, ea, ff = lp['self_attn'], lp['context_attn'], lp['ent_attn'], lp['ffn']
        d_model = sa['wq'].shape[0]
        scale = 1.0 / math.sqrt(d_model // heads)
        layers.append({
            'ln1_g': lp['ln1_g'], 'ln1_b': lp['ln1_b'],
            'ln2_g': lp['ln2_g'], 'ln2_b': lp['ln2_b'],
            'self_wqkv': bf(jnp.concatenate([sa['wq'] * scale, sa['wk'], sa['wv']], axis=1)),
            'self_bqkv': jnp.concatenate([sa['bq'] * scale, sa['bk'], sa['bv']]),
            'self_wo': bf(sa['wo']), 'self_bo': sa['bo'],
            'entq_ctxq_w': bf(jnp.concatenate([ea['w_in'], ca['wq'] * scale], axis=1)),
            'entq_ctxq_b': jnp.concatenate([ea['b_in'], ca['bq'] * scale]),
            'ent_wk': bf(ea['w_ent']), 'ent_bk': ea['b_ent'],
            'ctx_wkv': bf(jnp.concatenate([ca['wk'], ca['wv']], axis=1)),
            'ctx_bkv': jnp.concatenate([ca['bk'], ca['bv']]),
            'ctx_wo': bf(ca['wo']), 'ctx_bo': ca['bo'],
            'ffn': {'ln_g': ff['ln_g'], 'ln_b': ff['ln_b'],
                    'w1': bf(ff['w1']), 'b1': ff['b1'],
                    'w2': bf(ff['w2']), 'b2': ff['b2']},
        })
    return {'embedding': params['embedding'],
            'w_input': bf(params['w_input']), 'b_input': params['b_input'],
            'layers': layers,
            'lnf_g': params['lnf_g'], 'lnf_b': params['lnf_b']}


# ----------------------------- demo / main -----------------------------------

if __name__ == "__main__":
    NUM_LAYERS, D_MODEL, HEADS, D_FF = 2, 32, 4, 64
    VOCAB, EMB_DIM = 64, 32
    B, TGT_LEN = 2, 8
    N_SENT, N_ENTS, N_TOK = 6, 4, 8       # memory_bank tokens/sentence == src tokens/sentence

    root = jax.random.PRNGKey(0)
    kp, k1, k2, k3, k4, k5, k6 = jax.random.split(root, 7)
    params = prepare_params(init_params(kp, VOCAB, EMB_DIM, D_MODEL, D_FF, NUM_LAYERS),
                            heads=HEADS)

    tgt = jax.random.randint(k1, (TGT_LEN, B), 0, VOCAB, dtype=jnp.int32)
    src = jax.random.randint(k2, (N_SENT * N_TOK, B), 0, VOCAB, dtype=jnp.int32)
    memory_bank = jax.random.normal(k3, (B, N_SENT, N_TOK, D_MODEL), dtype=jnp.float32)
    edge = jax.random.uniform(k4, (B, N_SENT, N_ENTS), dtype=jnp.float32)
    ent = jax.random.randint(k5, (B, N_ENTS, N_TOK), 0, VOCAB, dtype=jnp.int32)
    ent_feature = jax.random.normal(k6, (B, N_ENTS, D_MODEL), dtype=jnp.float32)

    fwd = jax.jit(functools.partial(transformer_decoder, heads=HEADS, num_layers=NUM_LAYERS))
    out = fwd(params, tgt, memory_bank, src, edge, ent, ent_feature)
    jax.block_until_ready(out)
    assert out.shape == (TGT_LEN, B, D_MODEL)
    assert bool(jnp.all(jnp.isfinite(out)))
    print("KERNEL_OK")
</pallas_src>

<mosaic_0001>
module attributes {stable_mosaic.version = 11 : i64} {
  func.func @_linear_kernel(%arg0: i32, %arg1: memref<8x32xf32, #tpu.memory_space<vmem>>, %arg2: memref<32x32xbf16, #tpu.memory_space<vmem>>, %arg3: memref<1x32xf32, #tpu.memory_space<vmem>>, %arg4: memref<8x32xf32, #tpu.memory_space<vmem>>) attributes {dimension_semantics = [#tpu.dimension_semantics<parallel>], iteration_bounds = array<i64: 2>, scalar_prefetch = 0 : i64, scratch_operands = 0 : i64, tpu.core_type = #tpu.core_type<tc>, window_params = [{transform_indices = @transform_0, window_bounds = array<i64: 8, 32>}, {pipeline_mode = #tpu.pipeline_mode<synchronous>, transform_indices = @transform_1, window_bounds = array<i64: 32, 32>}, {pipeline_mode = #tpu.pipeline_mode<synchronous>, transform_indices = @transform_2, window_bounds = array<i64: 1, 32>}, {transform_indices = @transform_3, window_bounds = array<i64: 8, 32>}]} {
    %c0 = arith.constant 0 : index
    %c0_0 = arith.constant 0 : index
    %0 = vector.load %arg1[%c0, %c0_0] : memref<8x32xf32, #tpu.memory_space<vmem>>, vector<8x32xf32>
    %1 = arith.truncf %0 : vector<8x32xf32> to vector<8x32xbf16>
    %c0_1 = arith.constant 0 : index
    %c0_2 = arith.constant 0 : index
    %2 = vector.load %arg2[%c0_1, %c0_2] : memref<32x32xbf16, #tpu.memory_space<vmem>>, vector<32x32xbf16>
    %cst = arith.constant dense<0.000000e+00> : vector<8x32xf32>
    %3 = tpu.matmul %1, %2, %cst {dimension_numbers = #tpu.dot_dimension_numbers<[1], [0], [0], [1], [0, 0, 1, 1], [], []>} : vector<8x32xbf16>, vector<32x32xbf16>, vector<8x32xf32> -> vector<8x32xf32>
    %c0_3 = arith.constant 0 : index
    %c0_4 = arith.constant 0 : index
    %4 = vector.load %arg3[%c0_3, %c0_4] : memref<1x32xf32, #tpu.memory_space<vmem>>, vector<1x32xf32>
    %5 = vector.broadcast %4 : vector<1x32xf32> to vector<8x32xf32>
    %6 = arith.addf %3, %5 : vector<8x32xf32>
    %c0_5 = arith.constant 0 : index
    %c0_6 = arith.constant 0 : index
    %7 = vector.load %arg4[%c0_5, %c0_6] : memref<8x32xf32, #tpu.memory_space<vmem>>, vector<8x32xf32>
    tpu.vector_store %arg4[%c0_5, %c0_6], %6 {strides = array<i32>} : memref<8x32xf32, #tpu.memory_space<vmem>>, vector<8x32xf32>,
    return
  }
  func.func @transform_0(%arg0: i32) -> (i32, i32) {
    %c0_i32 = arith.constant 0 : i32
    %c0_i32_0 = arith.constant 0 : i32
    return %arg0, %c0_i32 : i32, i32
  }
  func.func @transform_1(%arg0: i32) -> (i32, i32) {
    %c0_i32 = arith.constant 0 : i32
    %c0_i32_0 = arith.constant 0 : i32
    %c0_i32_1 = arith.constant 0 : i32
    return %c0_i32, %c0_i32_0 : i32, i32
  }
  func.func @transform_2(%arg0: i32) -> (i32, i32) {
    %c0_i32 = arith.constant 0 : i32
    %c0_i32_0 = arith.constant 0 : i32
    %c0_i32_1 = arith.constant 0 : i32
    return %c0_i32, %c0_i32_0 : i32, i32
  }
  func.func @transform_3(%arg0: i32) -> (i32, i32) {
    %c0_i32 = arith.constant 0 : i32
    %c0_i32_0 = arith.constant 0 : i32
    return %arg0, %c0_i32 : i32, i32
  }
}

module attributes {stable_mosaic.version = 11 : i64} {
  func.func @_ln_linear_kernel(%arg0: i32, %arg1: memref<8x32xf32, #tpu.memory_space<vmem>>, %arg2: memref<1x32xf32, #tpu.memory_space<vmem>>, %arg3: memref<1x32xf32, #tpu.memory_space<vmem>>, %arg4: memref<32x96xbf16, #tpu.memory_space<vmem>>, %arg5: memref<1x96xf32, #tpu.memory_space<vmem>>, %arg6: memref<8x96xbf16, #tpu.memory_space<vmem>>) attributes {dimension_semantics = [#tpu.dimension_semantics<parallel>], iteration_bounds = array<i64: 2>, scalar_prefetch = 0 : i64, scratch_operands = 0 : i64, tpu.core_type = #tpu.core_type<tc>, window_params = [{transform_indices = @transform_0, window_bounds = array<i64: 8, 32>}, {pipeline_mode = #tpu.pipeline_mode<synchronous>, transform_indices = @transform_1, window_bounds = array<i64: 1, 32>}, {pipeline_mode = #tpu.pipeline_mode<synchronous>, transform_indices = @transform_2, window_bounds = array<i64: 1, 32>}, {pipeline_mode = #tpu.pipeline_mode<synchronous>, transform_indices = @transform_3, window_bounds = array<i64: 32, 96>}, {pipeline_mode = #tpu.pipeline_mode<synchronous>, transform_indices = @transform_4, window_bounds = array<i64: 1, 96>}, {transform_indices = @transform_5, window_bounds = array<i64: 8, 96>}]} {
    %c0 = arith.constant 0 : index
    %c0_0 = arith.constant 0 : index
    %0 = vector.load %arg1[%c0, %c0_0] : memref<8x32xf32, #tpu.memory_space<vmem>>, vector<8x32xf32>
    %c0_1 = arith.constant 0 : index
    %c0_2 = arith.constant 0 : index
    %1 = vector.load %arg2[%c0_1, %c0_2] : memref<1x32xf32, #tpu.memory_space<vmem>>, vector<1x32xf32>
    %c0_3 = arith.constant 0 : index
    %c0_4 = arith.constant 0 : index
    %2 = vector.load %arg3[%c0_3, %c0_4] : memref<1x32xf32, #tpu.memory_space<vmem>>, vector<1x32xf32>
    %cst = arith.constant dense<0.000000e+00> : vector<8xf32>
    %3 = vector.multi_reduction <add>, %0, %cst [1] : vector<8x32xf32> to vector<8xf32>
    %4 = vector.shape_cast %3 : vector<8xf32> to vector<8x1xf32>
    %cst_5 = arith.constant 3.200000e+01 : f32
    %5 = vector.broadcast %cst_5 : f32 to vector<8x1xf32>
    %6 = arith.divf %4, %5 : vector<8x1xf32>
    %7 = vector.broadcast %6 : vector<8x1xf32> to vector<8x32xf32>
    %8 = arith.subf %0, %7 : vector<8x32xf32>
    %9 = arith.mulf %8, %8 : vector<8x32xf32>
    %cst_6 = arith.constant dense<0.000000e+00> : vector<8xf32>
    %10 = vector.multi_reduction <add>, %9, %cst_6 [1] : vector<8x32xf32> to vector<8xf32>
    %11 = vector.shape_cast %10 : vector<8xf32> to vector<8x1xf32>
    %cst_7 = arith.constant 3.200000e+01 : f32
    %12 = vector.broadcast %cst_7 : f32 to vector<8x1xf32>
    %13 = arith.divf %11, %12 : vector<8x1xf32>
    %14 = vector.broadcast %6 : vector<8x1xf32> to vector<8x32xf32>
    %15 = arith.subf %0, %14 : vector<8x32xf32>
    %cst_8 = arith.constant 9.99999997E-7 : f32
    %16 = vector.broadcast %cst_8 : f32 to vector<8x1xf32>
    %17 = arith.addf %13, %16 : vector<8x1xf32>
    %18 = math.rsqrt %17 : vector<8x1xf32>
    %19 = vector.broadcast %18 : vector<8x1xf32> to vector<8x32xf32>
    %20 = arith.mulf %15, %19 : vector<8x32xf32>
    %21 = vector.broadcast %1 : vector<1x32xf32> to vector<8x32xf32>
    %22 = arith.mulf %20, %21 : vector<8x32xf32>
    %23 = vector.broadcast %2 : vector<1x32xf32> to vector<8x32xf32>
    %24 = arith.addf %22, %23 : vector<8x32xf32>
    %25 = arith.truncf %24 : vector<8x32xf32> to vector<8x32xbf16>
    %c0_9 = arith.constant 0 : index
    %c0_10 = arith.constant 0 : index
    %26 = vector.load %arg4[%c0_9, %c0_10] : memref<32x96xbf16, #tpu.memory_space<vmem>>, vector<32x96xbf16>
    %cst_11 = arith.constant dense<0.000000e+00> : vector<8x96xf32>
    %27 = tpu.matmul %25, %26, %cst_11 {dimension_numbers = #tpu.dot_dimension_numbers<[1], [0], [0], [1], [0, 0, 1, 1], [], []>} : vector<8x32xbf16>, vector<32x96xbf16>, vector<8x96xf32> -> vector<8x96xf32>
    %c0_12 = arith.constant 0 : index
    %c0_13 = arith.constant 0 : index
    %28 = vector.load %arg5[%c0_12, %c0_13] : memref<1x96xf32, #tpu.memory_space<vmem>>, vector<1x96xf32>
    %29 = vector.broadcast %28 : vector<1x96xf32> to vector<8x96xf32>
    %30 = arith.addf %27, %29 : vector<8x96xf32>
    %31 = arith.truncf %30 : vector<8x96xf32> to vector<8x96xbf16>
    %c0_14 = arith.constant 0 : index
    %c0_15 = arith.constant 0 : index
    %32 = vector.load %arg6[%c0_14, %c0_15] : memref<8x96xbf16, #tpu.memory_space<vmem>>, vector<8x96xbf16>
    tpu.vector_store %arg6[%c0_14, %c0_15], %31 {strides = array<i32>} : memref<8x96xbf16, #tpu.memory_space<vmem>>, vector<8x96xbf16>,
    return
  }
  func.func @transform_0(%arg0: i32) -> (i32, i32) {
    %c0_i32 = arith.constant 0 : i32
    %c0_i32_0 = arith.constant 0 : i32
    return %arg0, %c0_i32 : i32, i32
  }
  func.func @transform_1(%arg0: i32) -> (i32, i32) {
    %c0_i32 = arith.constant 0 : i32
    %c0_i32_0 = arith.constant 0 : i32
    %c0_i32_1 = arith.constant 0 : i32
    return %c0_i32, %c0_i32_0 : i32, i32
  }
  func.func @transform_2(%arg0: i32) -> (i32, i32) {
    %c0_i32 = arith.constant 0 : i32
    %c0_i32_0 = arith.constant 0 : i32
    %c0_i32_1 = arith.constant 0 : i32
    return %c0_i32, %c0_i32_0 : i32, i32
  }
  func.func @transform_3(%arg0: i32) -> (i32, i32) {
    %c0_i32 = arith.constant 0 : i32
    %c0_i32_0 = arith.constant 0 : i32
    %c0_i32_1 = arith.constant 0 : i32
    return %c0_i32, %c0_i32_0 : i32, i32
  }
  func.func @transform_4(%arg0: i32) -> (i32, i32) {
    %c0_i32 = arith.constant 0 : i32
    %c0_i32_0 = arith.constant 0 : i32
    %c0_i32_1 = arith.constant 0 : i32
    return %c0_i32, %c0_i32_0 : i32, i32
  }
  func.func @transform_5(%arg0: i32) -> (i32, i32) {
    %c0_i32 = arith.constant 0 : i32
    %c0_i32_0 = arith.constant 0 : i32
    return %arg0, %c0_i32 : i32, i32
  }
}

module attributes {stable_mosaic.version = 11 : i64} {
  func.func @_self_attn_kernel(%arg0: i32, %arg1: memref<1x8x96xbf16, #tpu.memory_space<vmem>>, %arg2: memref<1x1x8xf32, #tpu.memory_space<vmem>>, %arg3: memref<1x8x32xbf16, #tpu.memory_space<vmem>>) attributes {dimension_semantics = [#tpu.dimension_semantics<parallel>], iteration_bounds = array<i64: 2>, scalar_prefetch = 0 : i64, scratch_operands = 0 : i64, tpu.core_type = #tpu.core_type<tc>, window_params = [{transform_indices = @transform_0, window_bounds = array<i64: 1, 8, 96>}, {transform_indices = @transform_1, window_bounds = array<i64: 1, 1, 8>}, {transform_indices = @transform_2, window_bounds = array<i64: 1, 8, 32>}]} {
    %0 = tpu.iota {dimensions = array<i32: 0>} : vector<8x8xi32>
    %1 = tpu.iota {dimensions = array<i32: 1>} : vector<8x8xi32>
    %2 = arith.cmpi sgt, %1, %0 : vector<8x8xi32>
    %c0 = arith.constant 0 : index
    %c0_0 = arith.constant 0 : index
    %c0_1 = arith.constant 0 : index
    %3 = vector.load %arg2[%c0, %c0_0, %c0_1] : memref<1x1x8xf32, #tpu.memory_space<vmem>>, vector<1x1x8xf32>
    %4 = vector.shape_cast %3 : vector<1x1x8xf32> to vector<1x8xf32>
    %cst = arith.constant 5.000000e-01 : f32
    %5 = vector.broadcast %cst : f32 to vector<1x8xf32>
    %6 = arith.cmpf ogt, %4, %5 : vector<1x8xf32>
    %7 = vector.broadcast %6 : vector<1x8xi1> to vector<8x8xi1>
    %8 = arith.ori %2, %7 : vector<8x8xi1>
    %c0_2 = arith.constant 0 : index
    %c0_3 = arith.constant 0 : index
    %c0_4 = arith.constant 0 : index
    %9 = vector.load %arg1[%c0_2, %c0_3, %c0_4] : memref<1x8x96xbf16, #tpu.memory_space<vmem>>, vector<1x8x8xbf16>
    %10 = vector.shape_cast %9 : vector<1x8x8xbf16> to vector<8x8xbf16>
    %c0_5 = arith.constant 0 : index
    %c0_6 = arith.constant 0 : index
    %c32 = arith.constant 32 : index
    %11 = vector.load %arg1[%c0_5, %c0_6, %c32] : memref<1x8x96xbf16, #tpu.memory_space<vmem>>, vector<1x8x8xbf16>
    %12 = vector.shape_cast %11 : vector<1x8x8xbf16> to vector<8x8xbf16>
    %c0_7 = arith.constant 0 : index
    %c0_8 = arith.constant 0 : index
    %c64 = arith.constant 64 : index
    %13 = vector.load %arg1[%c0_7, %c0_8, %c64] : memref<1x8x96xbf16, #tpu.memory_space<vmem>>, vector<1x8x8xbf16>
    %14 = vector.shape_cast %13 : vector<1x8x8xbf16> to vector<8x8xbf16>
    %cst_9 = arith.constant dense<0.000000e+00> : vector<8x8xf32>
    %15 = tpu.matmul %10, %12, %cst_9 {dimension_numbers = #tpu.dot_dimension_numbers<[1], [1], [0], [0], [0, 0, 1, 0], [], []>} : vector<8x8xbf16>, vector<8x8xbf16>, vector<8x8xf32> -> vector<8x8xf32>
    %cst_10 = arith.constant -9.99999984E+17 : f32
    %16 = vector.broadcast %cst_10 : f32 to vector<8x8xf32>
    %17 = arith.select %8, %16, %15 : vector<8x8xi1>, vector<8x8xf32>
    %cst_11 = arith.constant dense<0xFF800000> : vector<8xf32>
    %18 = vector.multi_reduction <maximumf>, %17, %cst_11 [1] : vector<8x8xf32> to vector<8xf32>
    %19 = vector.shape_cast %18 : vector<8xf32> to vector<8x1xf32>
    %20 = vector.broadcast %19 : vector<8x1xf32> to vector<8x8xf32>
    %21 = arith.subf %17, %20 : vector<8x8xf32>
    %22 = math.exp %21 : vector<8x8xf32>
    %cst_12 = arith.constant dense<0.000000e+00> : vector<8xf32>
    %23 = vector.multi_reduction <add>, %22, %cst_12 [1] : vector<8x8xf32> to vector<8xf32>
    %24 = vector.shape_cast %23 : vector<8xf32> to vector<8x1xf32>
    %25 = tpu.reciprocal %24 {approx = true} : vector<8x1xf32> -> vector<8x1xf32>
    %26 = vector.broadcast %25 : vector<8x1xf32> to vector<8x8xf32>
    %27 = arith.mulf %22, %26 : vector<8x8xf32>
    %28 = arith.truncf %27 : vector<8x8xf32> to vector<8x8xbf16>
    %cst_13 = arith.constant dense<0.000000e+00> : vector<8x8xf32>
    %29 = tpu.matmul %28, %14, %cst_13 {dimension_numbers = #tpu.dot_dimension_numbers<[1], [0], [0], [1], [0, 0, 1, 1], [], []>} : vector<8x8xbf16>, vector<8x8xbf16>, vector<8x8xf32> -> vector<8x8xf32>
    %30 = arith.truncf %29 : vector<8x8xf32> to vector<8x8xbf16>
    %c0_14 = arith.constant 0 : index
    %c0_15 = arith.constant 0 : index
    %c0_16 = arith.constant 0 : index
    %31 = vector.load %arg3[%c0_14, %c0_15, %c0_16] : memref<1x8x32xbf16, #tpu.memory_space<vmem>>, vector<1x8x8xbf16>
    %32 = vector.shape_cast %31 : vector<1x8x8xbf16> to vector<8x8xbf16>
    %33 = vector.shape_cast %30 : vector<8x8xbf16> to vector<1x8x8xbf16>
    tpu.vector_store %arg3[%c0_14, %c0_15, %c0_16], %33 {strides = array<i32>} : memref<1x8x32xbf16, #tpu.memory_space<vmem>>, vector<1x8x8xbf16>,
    %c0_17 = arith.constant 0 : index
    %c0_18 = arith.constant 0 : index
    %c8 = arith.constant 8 : index
    %34 = vector.load %arg1[%c0_17, %c0_18, %c8] : memref<1x8x96xbf16, #tpu.memory_space<vmem>>, vector<1x8x8xbf16>
    %35 = vector.shape_cast %34 : vector<1x8x8xbf16> to vector<8x8xbf16>
    %c0_19 = arith.constant 0 : index
    %c0_20 = arith.constant 0 : index
    %c40 = arith.constant 40 : index
    %36 = vector.load %arg1[%c0_19, %c0_20, %c40] : memref<1x8x96xbf16, #tpu.memory_space<vmem>>, vector<1x8x8xbf16>
    %37 = vector.shape_cast %36 : vector<1x8x8xbf16> to vector<8x8xbf16>
    %c0_21 = arith.constant 0 : index
    %c0_22 = arith.constant 0 : index
    %c72 = arith.constant 72 : index
    %38 = vector.load %arg1[%c0_21, %c0_22, %c72] : memref<1x8x96xbf16, #tpu.memory_space<vmem>>, vector<1x8x8xbf16>
    %39 = vector.shape_cast %38 : vector<1x8x8xbf16> to vector<8x8xbf16>
    %cst_23 = arith.constant dense<0.000000e+00> : vector<8x8xf32>
    %40 = tpu.matmul %35, %37, %cst_23 {dimension_numbers = #tpu.dot_dimension_numbers<[1], [1], [0], [0], [0, 0, 1, 0], [], []>} : vector<8x8xbf16>, vector<8x8xbf16>, vector<8x8xf32> -> vector<8x8xf32>
    %cst_24 = arith.constant -9.99999984E+17 : f32
    %41 = vector.broadcast %cst_24 : f32 to vector<8x8xf32>
    %42 = arith.select %8, %41, %40 : vector<8x8xi1>, vector<8x8xf32>
    %cst_25 = arith.constant dense<0xFF800000> : vector<8xf32>
    %43 = vector.multi_reduction <maximumf>, %42, %cst_25 [1] : vector<8x8xf32> to vector<8xf32>
    %44 = vector.shape_cast %43 : vector<8xf32> to vector<8x1xf32>
    %45 = vector.broadcast %44 : vector<8x1xf32> to vector<8x8xf32>
    %46 = arith.subf %42, %45 : vector<8x8xf32>
    %47 = math.exp %46 : vector<8x8xf32>
    %cst_26 = arith.constant dense<0.000000e+00> : vector<8xf32>
    %48 = vector.multi_reduction <add>, %47, %cst_26 [1] : vector<8x8xf32> to vector<8xf32>
    %49 = vector.shape_cast %48 : vector<8xf32> to vector<8x1xf32>
    %50 = tpu.reciprocal %49 {approx = true} : vector<8x1xf32> -> vector<8x1xf32>
    %51 = vector.broadcast %50 : vector<8x1xf32> to vector<8x8xf32>
    %52 = arith.mulf %47, %51 : vector<8x8xf32>
    %53 = arith.truncf %52 : vector<8x8xf32> to vector<8x8xbf16>
    %cst_27 = arith.constant dense<0.000000e+00> : vector<8x8xf32>
    %54 = tpu.matmul %53, %39, %cst_27 {dimension_numbers = #tpu.dot_dimension_numbers<[1], [0], [0], [1], [0, 0, 1, 1], [], []>} : vector<8x8xbf16>, vector<8x8xbf16>, vector<8x8xf32> -> vector<8x8xf32>
    %55 = arith.truncf %54 : vector<8x8xf32> to vector<8x8xbf16>
    %c0_28 = arith.constant 0 : index
    %c0_29 = arith.constant 0 : index
    %c8_30 = arith.constant 8 : index
    %56 = vector.load %arg3[%c0_28, %c0_29, %c8_30] : memref<1x8x32xbf16, #tpu.memory_space<vmem>>, vector<1x8x8xbf16>
    %57 = vector.shape_cast %56 : vector<1x8x8xbf16> to vector<8x8xbf16>
    %58 = vector.shape_cast %55 : vector<8x8xbf16> to vector<1x8x8xbf16>
    tpu.vector_store %arg3[%c0_28, %c0_29, %c8_30], %58 {strides = array<i32>} : memref<1x8x32xbf16, #tpu.memory_space<vmem>>, vector<1x8x8xbf16>,
    %c0_31 = arith.constant 0 : index
    %c0_32 = arith.constant 0 : index
    %c16 = arith.constant 16 : index
    %59 = vector.load %arg1[%c0_31, %c0_32, %c16] : memref<1x8x96xbf16, #tpu.memory_space<vmem>>, vector<1x8x8xbf16>
    %60 = vector.shape_cast %59 : vector<1x8x8xbf16> to vector<8x8xbf16>
    %c0_33 = arith.constant 0 : index
    %c0_34 = arith.constant 0 : index
    %c48 = arith.constant 48 : index
    %61 = vector.load %arg1[%c0_33, %c0_34, %c48] : memref<1x8x96xbf16, #tpu.memory_space<vmem>>, vector<1x8x8xbf16>
    %62 = vector.shape_cast %61 : vector<1x8x8xbf16> to vector<8x8xbf16>
    %c0_35 = arith.constant 0 : index
    %c0_36 = arith.constant 0 : index
    %c80 = arith.constant 80 : index
    %63 = vector.load %arg1[%c0_35, %c0_36, %c80] : memref<1x8x96xbf16, #tpu.memory_space<vmem>>, vector<1x8x8xbf16>
    %64 = vector.shape_cast %63 : vector<1x8x8xbf16> to vector<8x8xbf16>
    %cst_37 = arith.constant dense<0.000000e+00> : vector<8x8xf32>
    %65 = tpu.matmul %60, %62, %cst_37 {dimension_numbers = #tpu.dot_dimension_numbers<[1], [1], [0], [0], [0, 0, 1, 0], [], []>} : vector<8x8xbf16>, vector<8x8xbf16>, vector<8x8xf32> -> vector<8x8xf32>
    %cst_38 = arith.constant -9.99999984E+17 : f32
    %66 = vector.broadcast %cst_38 : f32 to vector<8x8xf32>
    %67 = arith.select %8, %66, %65 : vector<8x8xi1>, vector<8x8xf32>
    %cst_39 = arith.constant dense<0xFF800000> : vector<8xf32>
    %68 = vector.multi_reduction <maximumf>, %67, %cst_39 [1] : vector<8x8xf32> to vector<8xf32>
    %69 = vector.shape_cast %68 : vector<8xf32> to vector<8x1xf32>
    %70 = vector.broadcast %69 : vector<8x1xf32> to vector<8x8xf32>
    %71 = arith.subf %67, %70 : vector<8x8xf32>
    %72 = math.exp %71 : vector<8x8xf32>
    %cst_40 = arith.constant dense<0.000000e+00> : vector<8xf32>
    %73 = vector.multi_reduction <add>, %72, %cst_40 [1] : vector<8x8xf32> to vector<8xf32>
    %74 = vector.shape_cast %73 : vector<8xf32> to vector<8x1xf32>
    %75 = tpu.reciprocal %74 {approx = true} : vector<8x1xf32> -> vector<8x1xf32>
    %76 = vector.broadcast %75 : vector<8x1xf32> to vector<8x8xf32>
    %77 = arith.mulf %72, %76 : vector<8x8xf32>
    %78 = arith.truncf %77 : vector<8x8xf32> to vector<8x8xbf16>
    %cst_41 = arith.constant dense<0.000000e+00> : vector<8x8xf32>
    %79 = tpu.matmul %78, %64, %cst_41 {dimension_numbers = #tpu.dot_dimension_numbers<[1], [0], [0], [1], [0, 0, 1, 1], [], []>} : vector<8x8xbf16>, vector<8x8xbf16>, vector<8x8xf32> -> vector<8x8xf32>
    %80 = arith.truncf %79 : vector<8x8xf32> to vector<8x8xbf16>
    %c0_42 = arith.constant 0 : index
    %c0_43 = arith.constant 0 : index
    %c16_44 = arith.constant 16 : index
    %81 = vector.load %arg3[%c0_42, %c0_43, %c16_44] : memref<1x8x32xbf16, #tpu.memory_space<vmem>>, vector<1x8x8xbf16>
    %82 = vector.shape_cast %81 : vector<1x8x8xbf16> to vector<8x8xbf16>
    %83 = vector.shape_cast %80 : vector<8x8xbf16> to vector<1x8x8xbf16>
    tpu.vector_store %arg3[%c0_42, %c0_43, %c16_44], %83 {strides = array<i32>} : memref<1x8x32xbf16, #tpu.memory_space<vmem>>, vector<1x8x8xbf16>,
    %c0_45 = arith.constant 0 : index
    %c0_46 = arith.constant 0 : index
    %c24 = arith.constant 24 : index
    %84 = vector.load %arg1[%c0_45, %c0_46, %c24] : memref<1x8x96xbf16, #tpu.memory_space<vmem>>, vector<1x8x8xbf16>
    %85 = vector.shape_cast %84 : vector<1x8x8xbf16> to vector<8x8xbf16>
    %c0_47 = arith.constant 0 : index
    %c0_48 = arith.constant 0 : index
    %c56 = arith.constant 56 : index
    %86 = vector.load %arg1[%c0_47, %c0_48, %c56] : memref<1x8x96xbf16, #tpu.memory_space<vmem>>, vector<1x8x8xbf16>
    %87 = vector.shape_cast %86 : vector<1x8x8xbf16> to vector<8x8xbf16>
    %c0_49 = arith.constant 0 : index
    %c0_50 = arith.constant 0 : index
    %c88 = arith.constant 88 : index
    %88 = vector.load %arg1[%c0_49, %c0_50, %c88] : memref<1x8x96xbf16, #tpu.memory_space<vmem>>, vector<1x8x8xbf16>
    %89 = vector.shape_cast %88 : vector<1x8x8xbf16> to vector<8x8xbf16>
    %cst_51 = arith.constant dense<0.000000e+00> : vector<8x8xf32>
    %90 = tpu.matmul %85, %87, %cst_51 {dimension_numbers = #tpu.dot_dimension_numbers<[1], [1], [0], [0], [0, 0, 1, 0], [], []>} : vector<8x8xbf16>, vector<8x8xbf16>, vector<8x8xf32> -> vector<8x8xf32>
    %cst_52 = arith.constant -9.99999984E+17 : f32
    %91 = vector.broadcast %cst_52 : f32 to vector<8x8xf32>
    %92 = arith.select %8, %91, %90 : vector<8x8xi1>, vector<8x8xf32>
    %cst_53 = arith.constant dense<0xFF800000> : vector<8xf32>
    %93 = vector.multi_reduction <maximumf>, %92, %cst_53 [1] : vector<8x8xf32> to vector<8xf32>
    %94 = vector.shape_cast %93 : vector<8xf32> to vector<8x1xf32>
    %95 = vector.broadcast %94 : vector<8x1xf32> to vector<8x8xf32>
    %96 = arith.subf %92, %95 : vector<8x8xf32>
    %97 = math.exp %96 : vector<8x8xf32>
    %cst_54 = arith.constant dense<0.000000e+00> : vector<8xf32>
    %98 = vector.multi_reduction <add>, %97, %cst_54 [1] : vector<8x8xf32> to vector<8xf32>
    %99 = vector.shape_cast %98 : vector<8xf32> to vector<8x1xf32>
    %100 = tpu.reciprocal %99 {approx = true} : vector<8x1xf32> -> vector<8x1xf32>
    %101 = vector.broadcast %100 : vector<8x1xf32> to vector<8x8xf32>
    %102 = arith.mulf %97, %101 : vector<8x8xf32>
    %103 = arith.truncf %102 : vector<8x8xf32> to vector<8x8xbf16>
    %cst_55 = arith.constant dense<0.000000e+00> : vector<8x8xf32>
    %104 = tpu.matmul %103, %89, %cst_55 {dimension_numbers = #tpu.dot_dimension_numbers<[1], [0], [0], [1], [0, 0, 1, 1], [], []>} : vector<8x8xbf16>, vector<8x8xbf16>, vector<8x8xf32> -> vector<8x8xf32>
    %105 = arith.truncf %104 : vector<8x8xf32> to vector<8x8xbf16>
    %c0_56 = arith.constant 0 : index
    %c0_57 = arith.constant 0 : index
    %c24_58 = arith.constant 24 : index
    %106 = vector.load %arg3[%c0_56, %c0_57, %c24_58] : memref<1x8x32xbf16, #tpu.memory_space<vmem>>, vector<1x8x8xbf16>
    %107 = vector.shape_cast %106 : vector<1x8x8xbf16> to vector<8x8xbf16>
    %108 = vector.shape_cast %105 : vector<8x8xbf16> to vector<1x8x8xbf16>
    tpu.vector_store %arg3[%c0_56, %c0_57, %c24_58], %108 {strides = array<i32>} : memref<1x8x32xbf16, #tpu.memory_space<vmem>>, vector<1x8x8xbf16>,
    return
  }
  func.func @transform_0(%arg0: i32) -> (i32, i32, i32) {
    %c0_i32 = arith.constant 0 : i32
    %c0_i32_0 = arith.constant 0 : i32
    %c0_i32_1 = arith.constant 0 : i32
    return %arg0, %c0_i32, %c0_i32_0 : i32, i32, i32
  }
  func.func @transform_1(%arg0: i32) -> (i32, i32, i32) {
    %c0_i32 = arith.constant 0 : i32
    %c0_i32_0 = arith.constant 0 : i32
    %c0_i32_1 = arith.constant 0 : i32
    return %arg0, %c0_i32, %c0_i32_0 : i32, i32, i32
  }
  func.func @transform_2(%arg0: i32) -> (i32, i32, i32) {
    %c0_i32 = arith.constant 0 : i32
    %c0_i32_0 = arith.constant 0 : i32
    %c0_i32_1 = arith.constant 0 : i32
    return %arg0, %c0_i32, %c0_i32_0 : i32, i32, i32
  }
}

module attributes {stable_mosaic.version = 11 : i64} {
  func.func @_linear_residual_kernel(%arg0: i32, %arg1: memref<8x32xbf16, #tpu.memory_space<vmem>>, %arg2: memref<8x32xf32, #tpu.memory_space<vmem>>, %arg3: memref<32x32xbf16, #tpu.memory_space<vmem>>, %arg4: memref<1x32xf32, #tpu.memory_space<vmem>>, %arg5: memref<8x32xf32, #tpu.memory_space<vmem>>) attributes {dimension_semantics = [#tpu.dimension_semantics<parallel>], iteration_bounds = array<i64: 2>, scalar_prefetch = 0 : i64, scratch_operands = 0 : i64, tpu.core_type = #tpu.core_type<tc>, window_params = [{transform_indices = @transform_0, window_bounds = array<i64: 8, 32>}, {transform_indices = @transform_1, window_bounds = array<i64: 8, 32>}, {pipeline_mode = #tpu.pipeline_mode<synchronous>, transform_indices = @transform_2, window_bounds = array<i64: 32, 32>}, {pipeline_mode = #tpu.pipeline_mode<synchronous>, transform_indices = @transform_3, window_bounds = array<i64: 1, 32>}, {transform_indices = @transform_4, window_bounds = array<i64: 8, 32>}]} {
    %c0 = arith.constant 0 : index
    %c0_0 = arith.constant 0 : index
    %0 = vector.load %arg1[%c0, %c0_0] : memref<8x32xbf16, #tpu.memory_space<vmem>>, vector<8x32xbf16>
    %c0_1 = arith.constant 0 : index
    %c0_2 = arith.constant 0 : index
    %1 = vector.load %arg3[%c0_1, %c0_2] : memref<32x32xbf16, #tpu.memory_space<vmem>>, vector<32x32xbf16>
    %cst = arith.constant dense<0.000000e+00> : vector<8x32xf32>
    %2 = tpu.matmul %0, %1, %cst {dimension_numbers = #tpu.dot_dimension_numbers<[1], [0], [0], [1], [0, 0, 1, 1], [], []>} : vector<8x32xbf16>, vector<32x32xbf16>, vector<8x32xf32> -> vector<8x32xf32>
    %c0_3 = arith.constant 0 : index
    %c0_4 = arith.constant 0 : index
    %3 = vector.load %arg4[%c0_3, %c0_4] : memref<1x32xf32, #tpu.memory_space<vmem>>, vector<1x32xf32>
    %4 = vector.broadcast %3 : vector<1x32xf32> to vector<8x32xf32>
    %5 = arith.addf %2, %4 : vector<8x32xf32>
    %c0_5 = arith.constant 0 : index
    %c0_6 = arith.constant 0 : index
    %6 = vector.load %arg2[%c0_5, %c0_6] : memref<8x32xf32, #tpu.memory_space<vmem>>, vector<8x32xf32>
    %7 = arith.addf %5, %6 : vector<8x32xf32>
    %c0_7 = arith.constant 0 : index
    %c0_8 = arith.constant 0 : index
    %8 = vector.load %arg5[%c0_7, %c0_8] : memref<8x32xf32, #tpu.memory_space<vmem>>, vector<8x32xf32>
    tpu.vector_store %arg5[%c0_7, %c0_8], %7 {strides = array<i32>} : memref<8x32xf32, #tpu.memory_space<vmem>>, vector<8x32xf32>,
    return
  }
  func.func @transform_0(%arg0: i32) -> (i32, i32) {
    %c0_i32 = arith.constant 0 : i32
    %c0_i32_0 = arith.constant 0 : i32
    return %arg0, %c0_i32 : i32, i32
  }
  func.func @transform_1(%arg0: i32) -> (i32, i32) {
    %c0_i32 = arith.constant 0 : i32
    %c0_i32_0 = arith.constant 0 : i32
    return %arg0, %c0_i32 : i32, i32
  }
  func.func @transform_2(%arg0: i32) -> (i32, i32) {
    %c0_i32 = arith.constant 0 : i32
    %c0_i32_0 = arith.constant 0 : i32
    %c0_i32_1 = arith.constant 0 : i32
    return %c0_i32, %c0_i32_0 : i32, i32
  }
  func.func @transform_3(%arg0: i32) -> (i32, i32) {
    %c0_i32 = arith.constant 0 : i32
    %c0_i32_0 = arith.constant 0 : i32
    %c0_i32_1 = arith.constant 0 : i32
    return %c0_i32, %c0_i32_0 : i32, i32
  }
  func.func @transform_4(%arg0: i32) -> (i32, i32) {
    %c0_i32 = arith.constant 0 : i32
    %c0_i32_0 = arith.constant 0 : i32
    return %arg0, %c0_i32 : i32, i32
  }
}

module attributes {stable_mosaic.version = 11 : i64} {
  func.func @_ln_linear_kernel(%arg0: i32, %arg1: memref<8x32xf32, #tpu.memory_space<vmem>>, %arg2: memref<1x32xf32, #tpu.memory_space<vmem>>, %arg3: memref<1x32xf32, #tpu.memory_space<vmem>>, %arg4: memref<32x64xbf16, #tpu.memory_space<vmem>>, %arg5: memref<1x64xf32, #tpu.memory_space<vmem>>, %arg6: memref<8x64xbf16, #tpu.memory_space<vmem>>) attributes {dimension_semantics = [#tpu.dimension_semantics<parallel>], iteration_bounds = array<i64: 2>, scalar_prefetch = 0 : i64, scratch_operands = 0 : i64, tpu.core_type = #tpu.core_type<tc>, window_params = [{transform_indices = @transform_0, window_bounds = array<i64: 8, 32>}, {pipeline_mode = #tpu.pipeline_mode<synchronous>, transform_indices = @transform_1, window_bounds = array<i64: 1, 32>}, {pipeline_mode = #tpu.pipeline_mode<synchronous>, transform_indices = @transform_2, window_bounds = array<i64: 1, 32>}, {pipeline_mode = #tpu.pipeline_mode<synchronous>, transform_indices = @transform_3, window_bounds = array<i64: 32, 64>}, {pipeline_mode = #tpu.pipeline_mode<synchronous>, transform_indices = @transform_4, window_bounds = array<i64: 1, 64>}, {transform_indices = @transform_5, window_bounds = array<i64: 8, 64>}]} {
    %c0 = arith.constant 0 : index
    %c0_0 = arith.constant 0 : index
    %0 = vector.load %arg1[%c0, %c0_0] : memref<8x32xf32, #tpu.memory_space<vmem>>, vector<8x32xf32>
    %c0_1 = arith.constant 0 : index
    %c0_2 = arith.constant 0 : index
    %1 = vector.load %arg2[%c0_1, %c0_2] : memref<1x32xf32, #tpu.memory_space<vmem>>, vector<1x32xf32>
    %c0_3 = arith.constant 0 : index
    %c0_4 = arith.constant 0 : index
    %2 = vector.load %arg3[%c0_3, %c0_4] : memref<1x32xf32, #tpu.memory_space<vmem>>, vector<1x32xf32>
    %cst = arith.constant dense<0.000000e+00> : vector<8xf32>
    %3 = vector.multi_reduction <add>, %0, %cst [1] : vector<8x32xf32> to vector<8xf32>
    %4 = vector.shape_cast %3 : vector<8xf32> to vector<8x1xf32>
    %cst_5 = arith.constant 3.200000e+01 : f32
    %5 = vector.broadcast %cst_5 : f32 to vector<8x1xf32>
    %6 = arith.divf %4, %5 : vector<8x1xf32>
    %7 = vector.broadcast %6 : vector<8x1xf32> to vector<8x32xf32>
    %8 = arith.subf %0, %7 : vector<8x32xf32>
    %9 = arith.mulf %8, %8 : vector<8x32xf32>
    %cst_6 = arith.constant dense<0.000000e+00> : vector<8xf32>
    %10 = vector.multi_reduction <add>, %9, %cst_6 [1] : vector<8x32xf32> to vector<8xf32>
    %11 = vector.shape_cast %10 : vector<8xf32> to vector<8x1xf32>
    %cst_7 = arith.constant 3.200000e+01 : f32
    %12 = vector.broadcast %cst_7 : f32 to vector<8x1xf32>
    %13 = arith.divf %11, %12 : vector<8x1xf32>
    %14 = vector.broadcast %6 : vector<8x1xf32> to vector<8x32xf32>
    %15 = arith.subf %0, %14 : vector<8x32xf32>
    %cst_8 = arith.constant 9.99999997E-7 : f32
    %16 = vector.broadcast %cst_8 : f32 to vector<8x1xf32>
    %17 = arith.addf %13, %16 : vector<8x1xf32>
    %18 = math.rsqrt %17 : vector<8x1xf32>
    %19 = vector.broadcast %18 : vector<8x1xf32> to vector<8x32xf32>
    %20 = arith.mulf %15, %19 : vector<8x32xf32>
    %21 = vector.broadcast %1 : vector<1x32xf32> to vector<8x32xf32>
    %22 = arith.mulf %20, %21 : vector<8x32xf32>
    %23 = vector.broadcast %2 : vector<1x32xf32> to vector<8x32xf32>
    %24 = arith.addf %22, %23 : vector<8x32xf32>
    %25 = arith.truncf %24 : vector<8x32xf32> to vector<8x32xbf16>
    %c0_9 = arith.constant 0 : index
    %c0_10 = arith.constant 0 : index
    %26 = vector.load %arg4[%c0_9, %c0_10] : memref<32x64xbf16, #tpu.memory_space<vmem>>, vector<32x64xbf16>
    %cst_11 = arith.constant dense<0.000000e+00> : vector<8x64xf32>
    %27 = tpu.matmul %25, %26, %cst_11 {dimension_numbers = #tpu.dot_dimension_numbers<[1], [0], [0], [1], [0, 0, 1, 1], [], []>} : vector<8x32xbf16>, vector<32x64xbf16>, vector<8x64xf32> -> vector<8x64xf32>
    %c0_12 = arith.constant 0 : index
    %c0_13 = arith.constant 0 : index
    %28 = vector.load %arg5[%c0_12, %c0_13] : memref<1x64xf32, #tpu.memory_space<vmem>>, vector<1x64xf32>
    %29 = vector.broadcast %28 : vector<1x64xf32> to vector<8x64xf32>
    %30 = arith.addf %27, %29 : vector<8x64xf32>
    %31 = arith.truncf %30 : vector<8x64xf32> to vector<8x64xbf16>
    %c0_14 = arith.constant 0 : index
    %c0_15 = arith.constant 0 : index
    %32 = vector.load %arg6[%c0_14, %c0_15] : memref<8x64xbf16, #tpu.memory_space<vmem>>, vector<8x64xbf16>
    tpu.vector_store %arg6[%c0_14, %c0_15], %31 {strides = array<i32>} : memref<8x64xbf16, #tpu.memory_space<vmem>>, vector<8x64xbf16>,
    return
  }
  func.func @transform_0(%arg0: i32) -> (i32, i32) {
    %c0_i32 = arith.constant 0 : i32
    %c0_i32_0 = arith.constant 0 : i32
    return %arg0, %c0_i32 : i32, i32
  }
  func.func @transform_1(%arg0: i32) -> (i32, i32) {
    %c0_i32 = arith.constant 0 : i32
    %c0_i32_0 = arith.constant 0 : i32
    %c0_i32_1 = arith.constant 0 : i32
    return %c0_i32, %c0_i32_0 : i32, i32
  }
  func.func @transform_2(%arg0: i32) -> (i32, i32) {
    %c0_i32 = arith.constant 0 : i32
    %c0_i32_0 = arith.constant 0 : i32
    %c0_i32_1 = arith.constant 0 : i32
    return %c0_i32, %c0_i32_0 : i32, i32
  }
  func.func @transform_3(%arg0: i32) -> (i32, i32) {
    %c0_i32 = arith.constant 0 : i32
    %c0_i32_0 = arith.constant 0 : i32
    %c0_i32_1 = arith.constant 0 : i32
    return %c0_i32, %c0_i32_0 : i32, i32
  }
  func.func @transform_4(%arg0: i32) -> (i32, i32) {
    %c0_i32 = arith.constant 0 : i32
    %c0_i32_0 = arith.constant 0 : i32
    %c0_i32_1 = arith.constant 0 : i32
    return %c0_i32, %c0_i32_0 : i32, i32
  }
  func.func @transform_5(%arg0: i32) -> (i32, i32) {
    %c0_i32 = arith.constant 0 : i32
    %c0_i32_0 = arith.constant 0 : i32
    return %arg0, %c0_i32 : i32, i32
  }
}

module attributes {stable_mosaic.version = 11 : i64} {
  func.func @_linear_kernel(%arg0: i32, %arg1: memref<8x32xbf16, #tpu.memory_space<vmem>>, %arg2: memref<32x32xbf16, #tpu.memory_space<vmem>>, %arg3: memref<1x32xf32, #tpu.memory_space<vmem>>, %arg4: memref<8x32xbf16, #tpu.memory_space<vmem>>) attributes {dimension_semantics = [#tpu.dimension_semantics<parallel>], iteration_bounds = array<i64: 1>, scalar_prefetch = 0 : i64, scratch_operands = 0 : i64, tpu.core_type = #tpu.core_type<tc>, window_params = [{transform_indices = @transform_0, window_bounds = array<i64: 8, 32>}, {pipeline_mode = #tpu.pipeline_mode<synchronous>, transform_indices = @transform_1, window_bounds = array<i64: 32, 32>}, {pipeline_mode = #tpu.pipeline_mode<synchronous>, transform_indices = @transform_2, window_bounds = array<i64: 1, 32>}, {transform_indices = @transform_3, window_bounds = array<i64: 8, 32>}]} {
    %c0 = arith.constant 0 : index
    %c0_0 = arith.constant 0 : index
    %0 = vector.load %arg1[%c0, %c0_0] : memref<8x32xbf16, #tpu.memory_space<vmem>>, vector<8x32xbf16>
    %c0_1 = arith.constant 0 : index
    %c0_2 = arith.constant 0 : index
    %1 = vector.load %arg2[%c0_1, %c0_2] : memref<32x32xbf16, #tpu.memory_space<vmem>>, vector<32x32xbf16>
    %cst = arith.constant dense<0.000000e+00> : vector<8x32xf32>
    %2 = tpu.matmul %0, %1, %cst {dimension_numbers = #tpu.dot_dimension_numbers<[1], [0], [0], [1], [0, 0, 1, 1], [], []>} : vector<8x32xbf16>, vector<32x32xbf16>, vector<8x32xf32> -> vector<8x32xf32>
    %c0_3 = arith.constant 0 : index
    %c0_4 = arith.constant 0 : index
    %3 = vector.load %arg3[%c0_3, %c0_4] : memref<1x32xf32, #tpu.memory_space<vmem>>, vector<1x32xf32>
    %4 = vector.broadcast %3 : vector<1x32xf32> to vector<8x32xf32>
    %5 = arith.addf %2, %4 : vector<8x32xf32>
    %6 = arith.truncf %5 : vector<8x32xf32> to vector<8x32xbf16>
    %c0_5 = arith.constant 0 : index
    %c0_6 = arith.constant 0 : index
    %7 = vector.load %arg4[%c0_5, %c0_6] : memref<8x32xbf16, #tpu.memory_space<vmem>>, vector<8x32xbf16>
    tpu.vector_store %arg4[%c0_5, %c0_6], %6 {strides = array<i32>} : memref<8x32xbf16, #tpu.memory_space<vmem>>, vector<8x32xbf16>,
    return
  }
  func.func @transform_0(%arg0: i32) -> (i32, i32) {
    %c0_i32 = arith.constant 0 : i32
    %c0_i32_0 = arith.constant 0 : i32
    return %arg0, %c0_i32 : i32, i32
  }
  func.func @transform_1(%arg0: i32) -> (i32, i32) {
    %c0_i32 = arith.constant 0 : i32
    %c0_i32_0 = arith.constant 0 : i32
    %c0_i32_1 = arith.constant 0 : i32
    return %c0_i32, %c0_i32_0 : i32, i32
  }
  func.func @transform_2(%arg0: i32) -> (i32, i32) {
    %c0_i32 = arith.constant 0 : i32
    %c0_i32_0 = arith.constant 0 : i32
    %c0_i32_1 = arith.constant 0 : i32
    return %c0_i32, %c0_i32_0 : i32, i32
  }
  func.func @transform_3(%arg0: i32) -> (i32, i32) {
    %c0_i32 = arith.constant 0 : i32
    %c0_i32_0 = arith.constant 0 : i32
    return %arg0, %c0_i32 : i32, i32
  }
}

module attributes {stable_mosaic.version = 11 : i64} {
  func.func @_ent_scores_kernel(%arg0: i32, %arg1: memref<1x8x64xbf16, #tpu.memory_space<vmem>>, %arg2: memref<1x4x32xbf16, #tpu.memory_space<vmem>>, %arg3: memref<1x1x4xf32, #tpu.memory_space<vmem>>, %arg4: memref<1x6x4xbf16, #tpu.memory_space<vmem>>, %arg5: memref<1x8x6xf32, #tpu.memory_space<vmem>>) attributes {dimension_semantics = [#tpu.dimension_semantics<parallel>], iteration_bounds = array<i64: 2>, scalar_prefetch = 0 : i64, scratch_operands = 0 : i64, tpu.core_type = #tpu.core_type<tc>, window_params = [{transform_indices = @transform_0, window_bounds = array<i64: 1, 8, 64>}, {transform_indices = @transform_1, window_bounds = array<i64: 1, 4, 32>}, {transform_indices = @transform_2, window_bounds = array<i64: 1, 1, 4>}, {transform_indices = @transform_3, window_bounds = array<i64: 1, 6, 4>}, {transform_indices = @transform_4, window_bounds = array<i64: 1, 8, 6>}]} {
    %c0 = arith.constant 0 : index
    %c0_0 = arith.constant 0 : index
    %c0_1 = arith.constant 0 : index
    %0 = vector.load %arg1[%c0, %c0_0, %c0_1] : memref<1x8x64xbf16, #tpu.memory_space<vmem>>, vector<1x8x32xbf16>
    %1 = vector.shape_cast %0 : vector<1x8x32xbf16> to vector<8x32xbf16>
    %c0_2 = arith.constant 0 : index
    %c0_3 = arith.constant 0 : index
    %c0_4 = arith.constant 0 : index
    %2 = vector.load %arg2[%c0_2, %c0_3, %c0_4] : memref<1x4x32xbf16, #tpu.memory_space<vmem>>, vector<1x4x32xbf16>
    %3 = vector.shape_cast %2 : vector<1x4x32xbf16> to vector<4x32xbf16>
    %c0_5 = arith.constant 0 : index
    %c0_6 = arith.constant 0 : index
    %c0_7 = arith.constant 0 : index
    %4 = vector.load %arg3[%c0_5, %c0_6, %c0_7] : memref<1x1x4xf32, #tpu.memory_space<vmem>>, vector<1x1x4xf32>
    %5 = vector.shape_cast %4 : vector<1x1x4xf32> to vector<1x4xf32>
    %cst = arith.constant dense<0.000000e+00> : vector<8x4xf32>
    %6 = tpu.matmul %1, %3, %cst {dimension_numbers = #tpu.dot_dimension_numbers<[1], [1], [0], [0], [0, 0, 1, 0], [], []>} : vector<8x32xbf16>, vector<4x32xbf16>, vector<8x4xf32> -> vector<8x4xf32>
    %cst_8 = arith.constant 5.000000e-01 : f32
    %7 = vector.broadcast %cst_8 : f32 to vector<1x4xf32>
    %8 = arith.cmpf ogt, %5, %7 : vector<1x4xf32>
    %cst_9 = arith.constant -9.99999984E+17 : f32
    %9 = vector.shape_cast %8 : vector<1x4xi1> to vector<1x4xi1>
    %10 = vector.broadcast %9 : vector<1x4xi1> to vector<8x4xi1>
    %11 = vector.broadcast %cst_9 : f32 to vector<8x4xf32>
    %12 = arith.select %10, %11, %6 : vector<8x4xi1>, vector<8x4xf32>
    %cst_10 = arith.constant dense<0xFF800000> : vector<8xf32>
    %13 = vector.multi_reduction <maximumf>, %12, %cst_10 [1] : vector<8x4xf32> to vector<8xf32>
    %14 = vector.shape_cast %13 : vector<8xf32> to vector<8x1xf32>
    %15 = vector.broadcast %14 : vector<8x1xf32> to vector<8x4xf32>
    %16 = arith.subf %12, %15 : vector<8x4xf32>
    %17 = math.exp %16 : vector<8x4xf32>
    %cst_11 = arith.constant dense<0.000000e+00> : vector<8xf32>
    %18 = vector.multi_reduction <add>, %17, %cst_11 [1] : vector<8x4xf32> to vector<8xf32>
    %19 = vector.shape_cast %18 : vector<8xf32> to vector<8x1xf32>
    %20 = tpu.reciprocal %19 {approx = true} : vector<8x1xf32> -> vector<8x1xf32>
    %21 = vector.broadcast %20 : vector<8x1xf32> to vector<8x4xf32>
    %22 = arith.mulf %17, %21 : vector<8x4xf32>
    %23 = arith.truncf %22 : vector<8x4xf32> to vector<8x4xbf16>
    %c0_12 = arith.constant 0 : index
    %c0_13 = arith.constant 0 : index
    %c0_14 = arith.constant 0 : index
    %24 = vector.load %arg4[%c0_12, %c0_13, %c0_14] : memref<1x6x4xbf16, #tpu.memory_space<vmem>>, vector<1x6x4xbf16>
    %25 = vector.shape_cast %24 : vector<1x6x4xbf16> to vector<6x4xbf16>
    %cst_15 = arith.constant dense<0.000000e+00> : vector<8x6xf32>
    %26 = tpu.matmul %23, %25, %cst_15 {dimension_numbers = #tpu.dot_dimension_numbers<[1], [1], [0], [0], [0, 0, 1, 0], [], []>} : vector<8x4xbf16>, vector<6x4xbf16>, vector<8x6xf32> -> vector<8x6xf32>
    %c0_16 = arith.constant 0 : index
    %c0_17 = arith.constant 0 : index
    %c0_18 = arith.constant 0 : index
    %27 = vector.load %arg5[%c0_16, %c0_17, %c0_18] : memref<1x8x6xf32, #tpu.memory_space<vmem>>, vector<1x8x6xf32>
    %28 = vector.shape_cast %27 : vector<1x8x6xf32> to vector<8x6xf32>
    %29 = vector.shape_cast %26 : vector<8x6xf32> to vector<1x8x6xf32>
    tpu.vector_store %arg5[%c0_16, %c0_17, %c0_18], %29 {strides = array<i32>} : memref<1x8x6xf32, #tpu.memory_space<vmem>>, vector<1x8x6xf32>,
    return
  }
  func.func @transform_0(%arg0: i32) -> (i32, i32, i32) {
    %c0_i32 = arith.constant 0 : i32
    %c0_i32_0 = arith.constant 0 : i32
    %c0_i32_1 = arith.constant 0 : i32
    return %arg0, %c0_i32, %c0_i32_0 : i32, i32, i32
  }
  func.func @transform_1(%arg0: i32) -> (i32, i32, i32) {
    %c0_i32 = arith.constant 0 : i32
    %c0_i32_0 = arith.constant 0 : i32
    %c0_i32_1 = arith.constant 0 : i32
    return %arg0, %c0_i32, %c0_i32_0 : i32, i32, i32
  }
  func.func @transform_2(%arg0: i32) -> (i32, i32, i32) {
    %c0_i32 = arith.constant 0 : i32
    %c0_i32_0 = arith.constant 0 : i32
    %c0_i32_1 = arith.constant 0 : i32
    return %arg0, %c0_i32, %c0_i32_0 : i32, i32, i32
  }
  func.func @transform_3(%arg0: i32) -> (i32, i32, i32) {
    %c0_i32 = arith.constant 0 : i32
    %c0_i32_0 = arith.constant 0 : i32
    %c0_i32_1 = arith.constant 0 : i32
    return %arg0, %c0_i32, %c0_i32_0 : i32, i32, i32
  }
  func.func @transform_4(%arg0: i32) -> (i32, i32, i32) {
    %c0_i32 = arith.constant 0 : i32
    %c0_i32_0 = arith.constant 0 : i32
    %c0_i32_1 = arith.constant 0 : i32
    return %arg0, %c0_i32, %c0_i32_0 : i32, i32, i32
  }
}

module attributes {stable_mosaic.version = 11 : i64} {
  func.func @_linear_kernel(%arg0: i32, %arg1: memref<48x32xbf16, #tpu.memory_space<vmem>>, %arg2: memref<32x64xbf16, #tpu.memory_space<vmem>>, %arg3: memref<1x64xf32, #tpu.memory_space<vmem>>, %arg4: memref<48x64xbf16, #tpu.memory_space<vmem>>) attributes {dimension_semantics = [#tpu.dimension_semantics<parallel>], iteration_bounds = array<i64: 2>, scalar_prefetch = 0 : i64, scratch_operands = 0 : i64, tpu.core_type = #tpu.core_type<tc>, window_params = [{transform_indices = @transform_0, window_bounds = array<i64: 48, 32>}, {pipeline_mode = #tpu.pipeline_mode<synchronous>, transform_indices = @transform_1, window_bounds = array<i64: 32, 64>}, {pipeline_mode = #tpu.pipeline_mode<synchronous>, transform_indices = @transform_2, window_bounds = array<i64: 1, 64>}, {transform_indices = @transform_3, window_bounds = array<i64: 48, 64>}]} {
    %c0 = arith.constant 0 : index
    %c0_0 = arith.constant 0 : index
    %0 = vector.load %arg1[%c0, %c0_0] : memref<48x32xbf16, #tpu.memory_space<vmem>>, vector<48x32xbf16>
    %c0_1 = arith.constant 0 : index
    %c0_2 = arith.constant 0 : index
    %1 = vector.load %arg2[%c0_1, %c0_2] : memref<32x64xbf16, #tpu.memory_space<vmem>>, vector<32x64xbf16>
    %cst = arith.constant dense<0.000000e+00> : vector<48x64xf32>
    %2 = tpu.matmul %0, %1, %cst {dimension_numbers = #tpu.dot_dimension_numbers<[1], [0], [0], [1], [0, 0, 1, 1], [], []>} : vector<48x32xbf16>, vector<32x64xbf16>, vector<48x64xf32> -> vector<48x64xf32>
    %c0_3 = arith.constant 0 : index
    %c0_4 = arith.constant 0 : index
    %3 = vector.load %arg3[%c0_3, %c0_4] : memref<1x64xf32, #tpu.memory_space<vmem>>, vector<1x64xf32>
    %4 = vector.broadcast %3 : vector<1x64xf32> to vector<48x64xf32>
    %5 = arith.addf %2, %4 : vector<48x64xf32>
    %6 = arith.truncf %5 : vector<48x64xf32> to vector<48x64xbf16>
    %c0_5 = arith.constant 0 : index
    %c0_6 = arith.constant 0 : index
    %7 = vector.load %arg4[%c0_5, %c0_6] : memref<48x64xbf16, #tpu.memory_space<vmem>>, vector<48x64xbf16>
    tpu.vector_store %arg4[%c0_5, %c0_6], %6 {strides = array<i32>} : memref<48x64xbf16, #tpu.memory_space<vmem>>, vector<48x64xbf16>,
    return
  }
  func.func @transform_0(%arg0: i32) -> (i32, i32) {
    %c0_i32 = arith.constant 0 : i32
    %c0_i32_0 = arith.constant 0 : i32
    return %arg0, %c0_i32 : i32, i32
  }
  func.func @transform_1(%arg0: i32) -> (i32, i32) {
    %c0_i32 = arith.constant 0 : i32
    %c0_i32_0 = arith.constant 0 : i32
    %c0_i32_1 = arith.constant 0 : i32
    return %c0_i32, %c0_i32_0 : i32, i32
  }
  func.func @transform_2(%arg0: i32) -> (i32, i32) {
    %c0_i32 = arith.constant 0 : i32
    %c0_i32_0 = arith.constant 0 : i32
    %c0_i32_1 = arith.constant 0 : i32
    return %c0_i32, %c0_i32_0 : i32, i32
  }
  func.func @transform_3(%arg0: i32) -> (i32, i32) {
    %c0_i32 = arith.constant 0 : i32
    %c0_i32_0 = arith.constant 0 : i32
    return %arg0, %c0_i32 : i32, i32
  }
}

module attributes {stable_mosaic.version = 11 : i64} {
  func.func @_ctx_attn_kernel(%arg0: i32, %arg1: memref<1x8x64xbf16, #tpu.memory_space<vmem>>, %arg2: memref<1x48x64xbf16, #tpu.memory_space<vmem>>, %arg3: memref<1x8x6xf32, #tpu.memory_space<vmem>>, %arg4: memref<1x6x48xbf16, #tpu.memory_space<vmem>>, %arg5: memref<1x8x32xbf16, #tpu.memory_space<vmem>>) attributes {dimension_semantics = [#tpu.dimension_semantics<parallel>], iteration_bounds = array<i64: 2>, scalar_prefetch = 0 : i64, scratch_operands = 0 : i64, tpu.core_type = #tpu.core_type<tc>, window_params = [{transform_indices = @transform_0, window_bounds = array<i64: 1, 8, 64>}, {transform_indices = @transform_1, window_bounds = array<i64: 1, 48, 64>}, {transform_indices = @transform_2, window_bounds = array<i64: 1, 8, 6>}, {transform_indices = @transform_3, window_bounds = array<i64: 1, 6, 48>}, {transform_indices = @transform_4, window_bounds = array<i64: 1, 8, 32>}]} {
    %c0 = arith.constant 0 : index
    %c0_0 = arith.constant 0 : index
    %c0_1 = arith.constant 0 : index
    %0 = vector.load %arg3[%c0, %c0_0, %c0_1] : memref<1x8x6xf32, #tpu.memory_space<vmem>>, vector<1x8x6xf32>
    %1 = vector.shape_cast %0 : vector<1x8x6xf32> to vector<8x6xf32>
    %2 = arith.truncf %1 : vector<8x6xf32> to vector<8x6xbf16>
    %c0_2 = arith.constant 0 : index
    %c0_3 = arith.constant 0 : index
    %c0_4 = arith.constant 0 : index
    %3 = vector.load %arg4[%c0_2, %c0_3, %c0_4] : memref<1x6x48xbf16, #tpu.memory_space<vmem>>, vector<1x6x48xbf16>
    %4 = vector.shape_cast %3 : vector<1x6x48xbf16> to vector<6x48xbf16>
    %cst = arith.constant dense<0.000000e+00> : vector<8x48xf32>
    %5 = tpu.matmul %2, %4, %cst {dimension_numbers = #tpu.dot_dimension_numbers<[1], [0], [0], [1], [0, 0, 1, 1], [], []>} : vector<8x6xbf16>, vector<6x48xbf16>, vector<8x48xf32> -> vector<8x48xf32>
    %cst_5 = arith.constant 5.000000e-01 : f32
    %6 = vector.broadcast %cst_5 : f32 to vector<8x48xf32>
    %7 = arith.cmpf olt, %5, %6 : vector<8x48xf32>
    %c0_6 = arith.constant 0 : index
    %c0_7 = arith.constant 0 : index
    %c32 = arith.constant 32 : index
    %8 = vector.load %arg1[%c0_6, %c0_7, %c32] : memref<1x8x64xbf16, #tpu.memory_space<vmem>>, vector<1x8x8xbf16>
    %9 = vector.shape_cast %8 : vector<1x8x8xbf16> to vector<8x8xbf16>
    %c0_8 = arith.constant 0 : index
    %c0_9 = arith.constant 0 : index
    %c0_10 = arith.constant 0 : index
    %10 = vector.load %arg2[%c0_8, %c0_9, %c0_10] : memref<1x48x64xbf16, #tpu.memory_space<vmem>>, vector<1x48x8xbf16>
    %11 = vector.shape_cast %10 : vector<1x48x8xbf16> to vector<48x8xbf16>
    %c0_11 = arith.constant 0 : index
    %c0_12 = arith.constant 0 : index
    %c32_13 = arith.constant 32 : index
    %12 = vector.load %arg2[%c0_11, %c0_12, %c32_13] : memref<1x48x64xbf16, #tpu.memory_space<vmem>>, vector<1x48x8xbf16>
    %13 = vector.shape_cast %12 : vector<1x48x8xbf16> to vector<48x8xbf16>
    %cst_14 = arith.constant dense<0.000000e+00> : vector<8x48xf32>
    %14 = tpu.matmul %9, %11, %cst_14 {dimension_numbers = #tpu.dot_dimension_numbers<[1], [1], [0], [0], [0, 0, 1, 0], [], []>} : vector<8x8xbf16>, vector<48x8xbf16>, vector<8x48xf32> -> vector<8x48xf32>
    %cst_15 = arith.constant -9.99999984E+17 : f32
    %15 = vector.broadcast %cst_15 : f32 to vector<8x48xf32>
    %16 = arith.select %7, %15, %14 : vector<8x48xi1>, vector<8x48xf32>
    %cst_16 = arith.constant dense<0xFF800000> : vector<8xf32>
    %17 = vector.multi_reduction <maximumf>, %16, %cst_16 [1] : vector<8x48xf32> to vector<8xf32>
    %18 = vector.shape_cast %17 : vector<8xf32> to vector<8x1xf32>
    %19 = vector.broadcast %18 : vector<8x1xf32> to vector<8x48xf32>
    %20 = arith.subf %16, %19 : vector<8x48xf32>
    %21 = math.exp %20 : vector<8x48xf32>
    %cst_17 = arith.constant dense<0.000000e+00> : vector<8xf32>
    %22 = vector.multi_reduction <add>, %21, %cst_17 [1] : vector<8x48xf32> to vector<8xf32>
    %23 = vector.shape_cast %22 : vector<8xf32> to vector<8x1xf32>
    %24 = tpu.reciprocal %23 {approx = true} : vector<8x1xf32> -> vector<8x1xf32>
    %25 = vector.broadcast %24 : vector<8x1xf32> to vector<8x48xf32>
    %26 = arith.mulf %21, %25 : vector<8x48xf32>
    %27 = arith.truncf %26 : vector<8x48xf32> to vector<8x48xbf16>
    %cst_18 = arith.constant dense<0.000000e+00> : vector<8x8xf32>
    %28 = tpu.matmul %27, %13, %cst_18 {dimension_numbers = #tpu.dot_dimension_numbers<[1], [0], [0], [1], [0, 0, 1, 1], [], []>} : vector<8x48xbf16>, vector<48x8xbf16>, vector<8x8xf32> -> vector<8x8xf32>
    %29 = arith.truncf %28 : vector<8x8xf32> to vector<8x8xbf16>
    %c0_19 = arith.constant 0 : index
    %c0_20 = arith.constant 0 : index
    %c0_21 = arith.constant 0 : index
    %30 = vector.load %arg5[%c0_19, %c0_20, %c0_21] : memref<1x8x32xbf16, #tpu.memory_space<vmem>>, vector<1x8x8xbf16>
    %31 = vector.shape_cast %30 : vector<1x8x8xbf16> to vector<8x8xbf16>
    %32 = vector.shape_cast %29 : vector<8x8xbf16> to vector<1x8x8xbf16>
    tpu.vector_store %arg5[%c0_19, %c0_20, %c0_21], %32 {strides = array<i32>} : memref<1x8x32xbf16, #tpu.memory_space<vmem>>, vector<1x8x8xbf16>,
    %c0_22 = arith.constant 0 : index
    %c0_23 = arith.constant 0 : index
    %c40 = arith.constant 40 : index
    %33 = vector.load %arg1[%c0_22, %c0_23, %c40] : memref<1x8x64xbf16, #tpu.memory_space<vmem>>, vector<1x8x8xbf16>
    %34 = vector.shape_cast %33 : vector<1x8x8xbf16> to vector<8x8xbf16>
    %c0_24 = arith.constant 0 : index
    %c0_25 = arith.constant 0 : index
    %c8 = arith.constant 8 : index
    %35 = vector.load %arg2[%c0_24, %c0_25, %c8] : memref<1x48x64xbf16, #tpu.memory_space<vmem>>, vector<1x48x8xbf16>
    %36 = vector.shape_cast %35 : vector<1x48x8xbf16> to vector<48x8xbf16>
    %c0_26 = arith.constant 0 : index
    %c0_27 = arith.constant 0 : index
    %c40_28 = arith.constant 40 : index
    %37 = vector.load %arg2[%c0_26, %c0_27, %c40_28] : memref<1x48x64xbf16, #tpu.memory_space<vmem>>, vector<1x48x8xbf16>
    %38 = vector.shape_cast %37 : vector<1x48x8xbf16> to vector<48x8xbf16>
    %cst_29 = arith.constant dense<0.000000e+00> : vector<8x48xf32>
    %39 = tpu.matmul %34, %36, %cst_29 {dimension_numbers = #tpu.dot_dimension_numbers<[1], [1], [0], [0], [0, 0, 1, 0], [], []>} : vector<8x8xbf16>, vector<48x8xbf16>, vector<8x48xf32> -> vector<8x48xf32>
    %cst_30 = arith.constant -9.99999984E+17 : f32
    %40 = vector.broadcast %cst_30 : f32 to vector<8x48xf32>
    %41 = arith.select %7, %40, %39 : vector<8x48xi1>, vector<8x48xf32>
    %cst_31 = arith.constant dense<0xFF800000> : vector<8xf32>
    %42 = vector.multi_reduction <maximumf>, %41, %cst_31 [1] : vector<8x48xf32> to vector<8xf32>
    %43 = vector.shape_cast %42 : vector<8xf32> to vector<8x1xf32>
    %44 = vector.broadcast %43 : vector<8x1xf32> to vector<8x48xf32>
    %45 = arith.subf %41, %44 : vector<8x48xf32>
    %46 = math.exp %45 : vector<8x48xf32>
    %cst_32 = arith.constant dense<0.000000e+00> : vector<8xf32>
    %47 = vector.multi_reduction <add>, %46, %cst_32 [1] : vector<8x48xf32> to vector<8xf32>
    %48 = vector.shape_cast %47 : vector<8xf32> to vector<8x1xf32>
    %49 = tpu.reciprocal %48 {approx = true} : vector<8x1xf32> -> vector<8x1xf32>
    %50 = vector.broadcast %49 : vector<8x1xf32> to vector<8x48xf32>
    %51 = arith.mulf %46, %50 : vector<8x48xf32>
    %52 = arith.truncf %51 : vector<8x48xf32> to vector<8x48xbf16>
    %cst_33 = arith.constant dense<0.000000e+00> : vector<8x8xf32>
    %53 = tpu.matmul %52, %38, %cst_33 {dimension_numbers = #tpu.dot_dimension_numbers<[1], [0], [0], [1], [0, 0, 1, 1], [], []>} : vector<8x48xbf16>, vector<48x8xbf16>, vector<8x8xf32> -> vector<8x8xf32>
    %54 = arith.truncf %53 : vector<8x8xf32> to vector<8x8xbf16>
    %c0_34 = arith.constant 0 : index
    %c0_35 = arith.constant 0 : index
    %c8_36 = arith.constant 8 : index
    %55 = vector.load %arg5[%c0_34, %c0_35, %c8_36] : memref<1x8x32xbf16, #tpu.memory_space<vmem>>, vector<1x8x8xbf16>
    %56 = vector.shape_cast %55 : vector<1x8x8xbf16> to vector<8x8xbf16>
    %57 = vector.shape_cast %54 : vector<8x8xbf16> to vector<1x8x8xbf16>
    tpu.vector_store %arg5[%c0_34, %c0_35, %c8_36], %57 {strides = array<i32>} : memref<1x8x32xbf16, #tpu.memory_space<vmem>>, vector<1x8x8xbf16>,
    %c0_37 = arith.constant 0 : index
    %c0_38 = arith.constant 0 : index
    %c48 = arith.constant 48 : index
    %58 = vector.load %arg1[%c0_37, %c0_38, %c48] : memref<1x8x64xbf16, #tpu.memory_space<vmem>>, vector<1x8x8xbf16>
    %59 = vector.shape_cast %58 : vector<1x8x8xbf16> to vector<8x8xbf16>
    %c0_39 = arith.constant 0 : index
    %c0_40 = arith.constant 0 : index
    %c16 = arith.constant 16 : index
    %60 = vector.load %arg2[%c0_39, %c0_40, %c16] : memref<1x48x64xbf16, #tpu.memory_space<vmem>>, vector<1x48x8xbf16>
    %61 = vector.shape_cast %60 : vector<1x48x8xbf16> to vector<48x8xbf16>
    %c0_41 = arith.constant 0 : index
    %c0_42 = arith.constant 0 : index
    %c48_43 = arith.constant 48 : index
    %62 = vector.load %arg2[%c0_41, %c0_42, %c48_43] : memref<1x48x64xbf16, #tpu.memory_space<vmem>>, vector<1x48x8xbf16>
    %63 = vector.shape_cast %62 : vector<1x48x8xbf16> to vector<48x8xbf16>
    %cst_44 = arith.constant dense<0.000000e+00> : vector<8x48xf32>
    %64 = tpu.matmul %59, %61, %cst_44 {dimension_numbers = #tpu.dot_dimension_numbers<[1], [1], [0], [0], [0, 0, 1, 0], [], []>} : vector<8x8xbf16>, vector<48x8xbf16>, vector<8x48xf32> -> vector<8x48xf32>
    %cst_45 = arith.constant -9.99999984E+17 : f32
    %65 = vector.broadcast %cst_45 : f32 to vector<8x48xf32>
    %66 = arith.select %7, %65, %64 : vector<8x48xi1>, vector<8x48xf32>
    %cst_46 = arith.constant dense<0xFF800000> : vector<8xf32>
    %67 = vector.multi_reduction <maximumf>, %66, %cst_46 [1] : vector<8x48xf32> to vector<8xf32>
    %68 = vector.shape_cast %67 : vector<8xf32> to vector<8x1xf32>
    %69 = vector.broadcast %68 : vector<8x1xf32> to vector<8x48xf32>
    %70 = arith.subf %66, %69 : vector<8x48xf32>
    %71 = math.exp %70 : vector<8x48xf32>
    %cst_47 = arith.constant dense<0.000000e+00> : vector<8xf32>
    %72 = vector.multi_reduction <add>, %71, %cst_47 [1] : vector<8x48xf32> to vector<8xf32>
    %73 = vector.shape_cast %72 : vector<8xf32> to vector<8x1xf32>
    %74 = tpu.reciprocal %73 {approx = true} : vector<8x1xf32> -> vector<8x1xf32>
    %75 = vector.broadcast %74 : vector<8x1xf32> to vector<8x48xf32>
    %76 = arith.mulf %71, %75 : vector<8x48xf32>
    %77 = arith.truncf %76 : vector<8x48xf32> to vector<8x48xbf16>
    %cst_48 = arith.constant dense<0.000000e+00> : vector<8x8xf32>
    %78 = tpu.matmul %77, %63, %cst_48 {dimension_numbers = #tpu.dot_dimension_numbers<[1], [0], [0], [1], [0, 0, 1, 1], [], []>} : vector<8x48xbf16>, vector<48x8xbf16>, vector<8x8xf32> -> vector<8x8xf32>
    %79 = arith.truncf %78 : vector<8x8xf32> to vector<8x8xbf16>
    %c0_49 = arith.constant 0 : index
    %c0_50 = arith.constant 0 : index
    %c16_51 = arith.constant 16 : index
    %80 = vector.load %arg5[%c0_49, %c0_50, %c16_51] : memref<1x8x32xbf16, #tpu.memory_space<vmem>>, vector<1x8x8xbf16>
    %81 = vector.shape_cast %80 : vector<1x8x8xbf16> to vector<8x8xbf16>
    %82 = vector.shape_cast %79 : vector<8x8xbf16> to vector<1x8x8xbf16>
    tpu.vector_store %arg5[%c0_49, %c0_50, %c16_51], %82 {strides = array<i32>} : memref<1x8x32xbf16, #tpu.memory_space<vmem>>, vector<1x8x8xbf16>,
    %c0_52 = arith.constant 0 : index
    %c0_53 = arith.constant 0 : index
    %c56 = arith.constant 56 : index
    %83 = vector.load %arg1[%c0_52, %c0_53, %c56] : memref<1x8x64xbf16, #tpu.memory_space<vmem>>, vector<1x8x8xbf16>
    %84 = vector.shape_cast %83 : vector<1x8x8xbf16> to vector<8x8xbf16>
    %c0_54 = arith.constant 0 : index
    %c0_55 = arith.constant 0 : index
    %c24 = arith.constant 24 : index
    %85 = vector.load %arg2[%c0_54, %c0_55, %c24] : memref<1x48x64xbf16, #tpu.memory_space<vmem>>, vector<1x48x8xbf16>
    %86 = vector.shape_cast %85 : vector<1x48x8xbf16> to vector<48x8xbf16>
    %c0_56 = arith.constant 0 : index
    %c0_57 = arith.constant 0 : index
    %c56_58 = arith.constant 56 : index
    %87 = vector.load %arg2[%c0_56, %c0_57, %c56_58] : memref<1x48x64xbf16, #tpu.memory_space<vmem>>, vector<1x48x8xbf16>
    %88 = vector.shape_cast %87 : vector<1x48x8xbf16> to vector<48x8xbf16>
    %cst_59 = arith.constant dense<0.000000e+00> : vector<8x48xf32>
    %89 = tpu.matmul %84, %86, %cst_59 {dimension_numbers = #tpu.dot_dimension_numbers<[1], [1], [0], [0], [0, 0, 1, 0], [], []>} : vector<8x8xbf16>, vector<48x8xbf16>, vector<8x48xf32> -> vector<8x48xf32>
    %cst_60 = arith.constant -9.99999984E+17 : f32
    %90 = vector.broadcast %cst_60 : f32 to vector<8x48xf32>
    %91 = arith.select %7, %90, %89 : vector<8x48xi1>, vector<8x48xf32>
    %cst_61 = arith.constant dense<0xFF800000> : vector<8xf32>
    %92 = vector.multi_reduction <maximumf>, %91, %cst_61 [1] : vector<8x48xf32> to vector<8xf32>
    %93 = vector.shape_cast %92 : vector<8xf32> to vector<8x1xf32>
    %94 = vector.broadcast %93 : vector<8x1xf32> to vector<8x48xf32>
    %95 = arith.subf %91, %94 : vector<8x48xf32>
    %96 = math.exp %95 : vector<8x48xf32>
    %cst_62 = arith.constant dense<0.000000e+00> : vector<8xf32>
    %97 = vector.multi_reduction <add>, %96, %cst_62 [1] : vector<8x48xf32> to vector<8xf32>
    %98 = vector.shape_cast %97 : vector<8xf32> to vector<8x1xf32>
    %99 = tpu.reciprocal %98 {approx = true} : vector<8x1xf32> -> vector<8x1xf32>
    %100 = vector.broadcast %99 : vector<8x1xf32> to vector<8x48xf32>
    %101 = arith.mulf %96, %100 : vector<8x48xf32>
    %102 = arith.truncf %101 : vector<8x48xf32> to vector<8x48xbf16>
    %cst_63 = arith.constant dense<0.000000e+00> : vector<8x8xf32>
    %103 = tpu.matmul %102, %88, %cst_63 {dimension_numbers = #tpu.dot_dimension_numbers<[1], [0], [0], [1], [0, 0, 1, 1], [], []>} : vector<8x48xbf16>, vector<48x8xbf16>, vector<8x8xf32> -> vector<8x8xf32>
    %104 = arith.truncf %103 : vector<8x8xf32> to vector<8x8xbf16>
    %c0_64 = arith.constant 0 : index
    %c0_65 = arith.constant 0 : index
    %c24_66 = arith.constant 24 : index
    %105 = vector.load %arg5[%c0_64, %c0_65, %c24_66] : memref<1x8x32xbf16, #tpu.memory_space<vmem>>, vector<1x8x8xbf16>
    %106 = vector.shape_cast %105 : vector<1x8x8xbf16> to vector<8x8xbf16>
    %107 = vector.shape_cast %104 : vector<8x8xbf16> to vector<1x8x8xbf16>
    tpu.vector_store %arg5[%c0_64, %c0_65, %c24_66], %107 {strides = array<i32>} : memref<1x8x32xbf16, #tpu.memory_space<vmem>>, vector<1x8x8xbf16>,
    return
  }
  func.func @transform_0(%arg0: i32) -> (i32, i32, i32) {
    %c0_i32 = arith.constant 0 : i32
    %c0_i32_0 = arith.constant 0 : i32
    %c0_i32_1 = arith.constant 0 : i32
    return %arg0, %c0_i32, %c0_i32_0 : i32, i32, i32
  }
  func.func @transform_1(%arg0: i32) -> (i32, i32, i32) {
    %c0_i32 = arith.constant 0 : i32
    %c0_i32_0 = arith.constant 0 : i32
    %c0_i32_1 = arith.constant 0 : i32
    return %arg0, %c0_i32, %c0_i32_0 : i32, i32, i32
  }
  func.func @transform_2(%arg0: i32) -> (i32, i32, i32) {
    %c0_i32 = arith.constant 0 : i32
    %c0_i32_0 = arith.constant 0 : i32
    %c0_i32_1 = arith.constant 0 : i32
    return %arg0, %c0_i32, %c0_i32_0 : i32, i32, i32
  }
  func.func @transform_3(%arg0: i32) -> (i32, i32, i32) {
    %c0_i32 = arith.constant 0 : i32
    %c0_i32_0 = arith.constant 0 : i32
    %c0_i32_1 = arith.constant 0 : i32
    return %arg0, %c0_i32, %c0_i32_0 : i32, i32, i32
  }
  func.func @transform_4(%arg0: i32) -> (i32, i32, i32) {
    %c0_i32 = arith.constant 0 : i32
    %c0_i32_0 = arith.constant 0 : i32
    %c0_i32_1 = arith.constant 0 : i32
    return %arg0, %c0_i32, %c0_i32_0 : i32, i32, i32
  }
}

module attributes {stable_mosaic.version = 11 : i64} {
  func.func @_layernorm_kernel(%arg0: i32, %arg1: memref<8x32xf32, #tpu.memory_space<vmem>>, %arg2: memref<1x32xf32, #tpu.memory_space<vmem>>, %arg3: memref<1x32xf32, #tpu.memory_space<vmem>>, %arg4: memref<8x32xf32, #tpu.memory_space<vmem>>) attributes {dimension_semantics = [#tpu.dimension_semantics<parallel>], iteration_bounds = array<i64: 2>, scalar_prefetch = 0 : i64, scratch_operands = 0 : i64, tpu.core_type = #tpu.core_type<tc>, window_params = [{transform_indices = @transform_0, window_bounds = array<i64: 8, 32>}, {pipeline_mode = #tpu.pipeline_mode<synchronous>, transform_indices = @transform_1, window_bounds = array<i64: 1, 32>}, {pipeline_mode = #tpu.pipeline_mode<synchronous>, transform_indices = @transform_2, window_bounds = array<i64: 1, 32>}, {transform_indices = @transform_3, window_bounds = array<i64: 8, 32>}]} {
    %c0 = arith.constant 0 : index
    %c0_0 = arith.constant 0 : index
    %0 = vector.load %arg1[%c0, %c0_0] : memref<8x32xf32, #tpu.memory_space<vmem>>, vector<8x32xf32>
    %c0_1 = arith.constant 0 : index
    %c0_2 = arith.constant 0 : index
    %1 = vector.load %arg2[%c0_1, %c0_2] : memref<1x32xf32, #tpu.memory_space<vmem>>, vector<1x32xf32>
    %c0_3 = arith.constant 0 : index
    %c0_4 = arith.constant 0 : index
    %2 = vector.load %arg3[%c0_3, %c0_4] : memref<1x32xf32, #tpu.memory_space<vmem>>, vector<1x32xf32>
    %cst = arith.constant dense<0.000000e+00> : vector<8xf32>
    %3 = vector.multi_reduction <add>, %0, %cst [1] : vector<8x32xf32> to vector<8xf32>
    %4 = vector.shape_cast %3 : vector<8xf32> to vector<8x1xf32>
    %cst_5 = arith.constant 3.200000e+01 : f32
    %5 = vector.broadcast %cst_5 : f32 to vector<8x1xf32>
    %6 = arith.divf %4, %5 : vector<8x1xf32>
    %7 = vector.broadcast %6 : vector<8x1xf32> to vector<8x32xf32>
    %8 = arith.subf %0, %7 : vector<8x32xf32>
    %9 = arith.mulf %8, %8 : vector<8x32xf32>
    %cst_6 = arith.constant dense<0.000000e+00> : vector<8xf32>
    %10 = vector.multi_reduction <add>, %9, %cst_6 [1] : vector<8x32xf32> to vector<8xf32>
    %11 = vector.shape_cast %10 : vector<8xf32> to vector<8x1xf32>
    %cst_7 = arith.constant 3.200000e+01 : f32
    %12 = vector.broadcast %cst_7 : f32 to vector<8x1xf32>
    %13 = arith.divf %11, %12 : vector<8x1xf32>
    %14 = vector.broadcast %6 : vector<8x1xf32> to vector<8x32xf32>
    %15 = arith.subf %0, %14 : vector<8x32xf32>
    %cst_8 = arith.constant 9.99999997E-7 : f32
    %16 = vector.broadcast %cst_8 : f32 to vector<8x1xf32>
    %17 = arith.addf %13, %16 : vector<8x1xf32>
    %18 = math.rsqrt %17 : vector<8x1xf32>
    %19 = vector.broadcast %18 : vector<8x1xf32> to vector<8x32xf32>
    %20 = arith.mulf %15, %19 : vector<8x32xf32>
    %21 = vector.broadcast %1 : vector<1x32xf32> to vector<8x32xf32>
    %22 = arith.mulf %20, %21 : vector<8x32xf32>
    %23 = vector.broadcast %2 : vector<1x32xf32> to vector<8x32xf32>
    %24 = arith.addf %22, %23 : vector<8x32xf32>
    %c0_9 = arith.constant 0 : index
    %c0_10 = arith.constant 0 : index
    %25 = vector.load %arg4[%c0_9, %c0_10] : memref<8x32xf32, #tpu.memory_space<vmem>>, vector<8x32xf32>
    tpu.vector_store %arg4[%c0_9, %c0_10], %24 {strides = array<i32>} : memref<8x32xf32, #tpu.memory_space<vmem>>, vector<8x32xf32>,
    return
  }
  func.func @transform_0(%arg0: i32) -> (i32, i32) {
    %c0_i32 = arith.constant 0 : i32
    %c0_i32_0 = arith.constant 0 : i32
    return %arg0, %c0_i32 : i32, i32
  }
  func.func @transform_1(%arg0: i32) -> (i32, i32) {
    %c0_i32 = arith.constant 0 : i32
    %c0_i32_0 = arith.constant 0 : i32
    %c0_i32_1 = arith.constant 0 : i32
    return %c0_i32, %c0_i32_0 : i32, i32
  }
  func.func @transform_2(%arg0: i32) -> (i32, i32) {
    %c0_i32 = arith.constant 0 : i32
    %c0_i32_0 = arith.constant 0 : i32
    %c0_i32_1 = arith.constant 0 : i32
    return %c0_i32, %c0_i32_0 : i32, i32
  }
  func.func @transform_3(%arg0: i32) -> (i32, i32) {
    %c0_i32 = arith.constant 0 : i32
    %c0_i32_0 = arith.constant 0 : i32
    return %arg0, %c0_i32 : i32, i32
  }
}

module attributes {stable_mosaic.version = 11 : i64} {
  func.func @_ctx_out_ffn_kernel(%arg0: i32, %arg1: memref<8x32xbf16, #tpu.memory_space<vmem>>, %arg2: memref<32x32xbf16, #tpu.memory_space<vmem>>, %arg3: memref<1x32xf32, #tpu.memory_space<vmem>>, %arg4: memref<1x32xf32, #tpu.memory_space<vmem>>, %arg5: memref<1x32xf32, #tpu.memory_space<vmem>>, %arg6: memref<32x64xbf16, #tpu.memory_space<vmem>>, %arg7: memref<1x64xf32, #tpu.memory_space<vmem>>, %arg8: memref<64x32xbf16, #tpu.memory_space<vmem>>, %arg9: memref<1x32xf32, #tpu.memory_space<vmem>>, %arg10: memref<8x32xf32, #tpu.memory_space<vmem>>) attributes {dimension_semantics = [#tpu.dimension_semantics<parallel>], iteration_bounds = array<i64: 2>, scalar_prefetch = 0 : i64, scratch_operands = 0 : i64, tpu.core_type = #tpu.core_type<tc>, window_params = [{transform_indices = @transform_0, window_bounds = array<i64: 8, 32>}, {pipeline_mode = #tpu.pipeline_mode<synchronous>, transform_indices = @transform_1, window_bounds = array<i64: 32, 32>}, {pipeline_mode = #tpu.pipeline_mode<synchronous>, transform_indices = @transform_2, window_bounds = array<i64: 1, 32>}, {pipeline_mode = #tpu.pipeline_mode<synchronous>, transform_indices = @transform_3, window_bounds = array<i64: 1, 32>}, {pipeline_mode = #tpu.pipeline_mode<synchronous>, transform_indices = @transform_4, window_bounds = array<i64: 1, 32>}, {pipeline_mode = #tpu.pipeline_mode<synchronous>, transform_indices = @transform_5, window_bounds = array<i64: 32, 64>}, {pipeline_mode = #tpu.pipeline_mode<synchronous>, transform_indices = @transform_6, window_bounds = array<i64: 1, 64>}, {pipeline_mode = #tpu.pipeline_mode<synchronous>, transform_indices = @transform_7, window_bounds = array<i64: 64, 32>}, {pipeline_mode = #tpu.pipeline_mode<synchronous>, transform_indices = @transform_8, window_bounds = array<i64: 1, 32>}, {transform_indices = @transform_9, window_bounds = array<i64: 8, 32>}]} {
    %c0 = arith.constant 0 : index
    %c0_0 = arith.constant 0 : index
    %0 = vector.load %arg1[%c0, %c0_0] : memref<8x32xbf16, #tpu.memory_space<vmem>>, vector<8x32xbf16>
    %c0_1 = arith.constant 0 : index
    %c0_2 = arith.constant 0 : index
    %1 = vector.load %arg2[%c0_1, %c0_2] : memref<32x32xbf16, #tpu.memory_space<vmem>>, vector<32x32xbf16>
    %cst = arith.constant dense<0.000000e+00> : vector<8x32xf32>
    %2 = tpu.matmul %0, %1, %cst {dimension_numbers = #tpu.dot_dimension_numbers<[1], [0], [0], [1], [0, 0, 1, 1], [], []>} : vector<8x32xbf16>, vector<32x32xbf16>, vector<8x32xf32> -> vector<8x32xf32>
    %c0_3 = arith.constant 0 : index
    %c0_4 = arith.constant 0 : index
    %3 = vector.load %arg3[%c0_3, %c0_4] : memref<1x32xf32, #tpu.memory_space<vmem>>, vector<1x32xf32>
    %4 = vector.broadcast %3 : vector<1x32xf32> to vector<8x32xf32>
    %5 = arith.addf %2, %4 : vector<8x32xf32>
    %6 = arith.addf %5, %5 : vector<8x32xf32>
    %c0_5 = arith.constant 0 : index
    %c0_6 = arith.constant 0 : index
    %7 = vector.load %arg4[%c0_5, %c0_6] : memref<1x32xf32, #tpu.memory_space<vmem>>, vector<1x32xf32>
    %c0_7 = arith.constant 0 : index
    %c0_8 = arith.constant 0 : index
    %8 = vector.load %arg5[%c0_7, %c0_8] : memref<1x32xf32, #tpu.memory_space<vmem>>, vector<1x32xf32>
    %cst_9 = arith.constant dense<0.000000e+00> : vector<8xf32>
    %9 = vector.multi_reduction <add>, %6, %cst_9 [1] : vector<8x32xf32> to vector<8xf32>
    %10 = vector.shape_cast %9 : vector<8xf32> to vector<8x1xf32>
    %cst_10 = arith.constant 3.200000e+01 : f32
    %11 = vector.broadcast %cst_10 : f32 to vector<8x1xf32>
    %12 = arith.divf %10, %11 : vector<8x1xf32>
    %13 = vector.broadcast %12 : vector<8x1xf32> to vector<8x32xf32>
    %14 = arith.subf %6, %13 : vector<8x32xf32>
    %15 = arith.mulf %14, %14 : vector<8x32xf32>
    %cst_11 = arith.constant dense<0.000000e+00> : vector<8xf32>
    %16 = vector.multi_reduction <add>, %15, %cst_11 [1] : vector<8x32xf32> to vector<8xf32>
    %17 = vector.shape_cast %16 : vector<8xf32> to vector<8x1xf32>
    %cst_12 = arith.constant 3.200000e+01 : f32
    %18 = vector.broadcast %cst_12 : f32 to vector<8x1xf32>
    %19 = arith.divf %17, %18 : vector<8x1xf32>
    %20 = vector.broadcast %12 : vector<8x1xf32> to vector<8x32xf32>
    %21 = arith.subf %6, %20 : vector<8x32xf32>
    %cst_13 = arith.constant 9.99999997E-7 : f32
    %22 = vector.broadcast %cst_13 : f32 to vector<8x1xf32>
    %23 = arith.addf %19, %22 : vector<8x1xf32>
    %24 = math.rsqrt %23 : vector<8x1xf32>
    %25 = vector.broadcast %24 : vector<8x1xf32> to vector<8x32xf32>
    %26 = arith.mulf %21, %25 : vector<8x32xf32>
    %27 = vector.broadcast %7 : vector<1x32xf32> to vector<8x32xf32>
    %28 = arith.mulf %26, %27 : vector<8x32xf32>
    %29 = vector.broadcast %8 : vector<1x32xf32> to vector<8x32xf32>
    %30 = arith.addf %28, %29 : vector<8x32xf32>
    %31 = arith.truncf %30 : vector<8x32xf32> to vector<8x32xbf16>
    %c0_14 = arith.constant 0 : index
    %c0_15 = arith.constant 0 : index
    %32 = vector.load %arg6[%c0_14, %c0_15] : memref<32x64xbf16, #tpu.memory_space<vmem>>, vector<32x64xbf16>
    %cst_16 = arith.constant dense<0.000000e+00> : vector<8x64xf32>
    %33 = tpu.matmul %31, %32, %cst_16 {dimension_numbers = #tpu.dot_dimension_numbers<[1], [0], [0], [1], [0, 0, 1, 1], [], []>} : vector<8x32xbf16>, vector<32x64xbf16>, vector<8x64xf32> -> vector<8x64xf32>
    %c0_17 = arith.constant 0 : index
    %c0_18 = arith.constant 0 : index
    %34 = vector.load %arg7[%c0_17, %c0_18] : memref<1x64xf32, #tpu.memory_space<vmem>>, vector<1x64xf32>
    %35 = vector.broadcast %34 : vector<1x64xf32> to vector<8x64xf32>
    %36 = arith.addf %33, %35 : vector<8x64xf32>
    %cst_19 = arith.constant 5.000000e-01 : f32
    %37 = vector.broadcast %cst_19 : f32 to vector<8x64xf32>
    %38 = arith.mulf %37, %36 : vector<8x64xf32>
    %cst_20 = arith.constant 4.471500e-02 : f32
    %39 = vector.broadcast %cst_20 : f32 to vector<8x64xf32>
    %40 = arith.mulf %39, %36 : vector<8x64xf32>
    %41 = arith.mulf %40, %36 : vector<8x64xf32>
    %42 = arith.mulf %41, %36 : vector<8x64xf32>
    %43 = arith.addf %36, %42 : vector<8x64xf32>
    %cst_21 = arith.constant 0.797884583 : f32
    %44 = vector.broadcast %cst_21 : f32 to vector<8x64xf32>
    %45 = arith.mulf %44, %43 : vector<8x64xf32>
    %46 = math.tanh %45 : vector<8x64xf32>
    %cst_22 = arith.constant 1.000000e+00 : f32
    %47 = vector.broadcast %cst_22 : f32 to vector<8x64xf32>
    %48 = arith.addf %47, %46 : vector<8x64xf32>
    %49 = arith.mulf %38, %48 : vector<8x64xf32>
    %50 = arith.truncf %49 : vector<8x64xf32> to vector<8x64xbf16>
    %c0_23 = arith.constant 0 : index
    %c0_24 = arith.constant 0 : index
    %51 = vector.load %arg8[%c0_23, %c0_24] : memref<64x32xbf16, #tpu.memory_space<vmem>>, vector<64x32xbf16>
    %cst_25 = arith.constant dense<0.000000e+00> : vector<8x32xf32>
    %52 = tpu.matmul %50, %51, %cst_25 {dimension_numbers = #tpu.dot_dimension_numbers<[1], [0], [0], [1], [0, 0, 1, 1], [], []>} : vector<8x64xbf16>, vector<64x32xbf16>, vector<8x32xf32> -> vector<8x32xf32>
    %c0_26 = arith.constant 0 : index
    %c0_27 = arith.constant 0 : index
    %53 = vector.load %arg9[%c0_26, %c0_27] : memref<1x32xf32, #tpu.memory_space<vmem>>, vector<1x32xf32>
    %54 = vector.broadcast %53 : vector<1x32xf32> to vector<8x32xf32>
    %55 = arith.addf %52, %54 : vector<8x32xf32>
    %56 = arith.addf %55, %6 : vector<8x32xf32>
    %c0_28 = arith.constant 0 : index
    %c0_29 = arith.constant 0 : index
    %57 = vector.load %arg10[%c0_28, %c0_29] : memref<8x32xf32, #tpu.memory_space<vmem>>, vector<8x32xf32>
    tpu.vector_store %arg10[%c0_28, %c0_29], %56 {strides = array<i32>} : memref<8x32xf32, #tpu.memory_space<vmem>>, vector<8x32xf32>,
    return
  }
  func.func @transform_0(%arg0: i32) -> (i32, i32) {
    %c0_i32 = arith.constant 0 : i32
    %c0_i32_0 = arith.constant 0 : i32
    return %arg0, %c0_i32 : i32, i32
  }
  func.func @transform_1(%arg0: i32) -> (i32, i32) {
    %c0_i32 = arith.constant 0 : i32
    %c0_i32_0 = arith.constant 0 : i32
    %c0_i32_1 = arith.constant 0 : i32
    return %c0_i32, %c0_i32_0 : i32, i32
  }
  func.func @transform_2(%arg0: i32) -> (i32, i32) {
    %c0_i32 = arith.constant 0 : i32
    %c0_i32_0 = arith.constant 0 : i32
    %c0_i32_1 = arith.constant 0 : i32
    return %c0_i32, %c0_i32_0 : i32, i32
  }
  func.func @transform_3(%arg0: i32) -> (i32, i32) {
    %c0_i32 = arith.constant 0 : i32
    %c0_i32_0 = arith.constant 0 : i32
    %c0_i32_1 = arith.constant 0 : i32
    return %c0_i32, %c0_i32_0 : i32, i32
  }
  func.func @transform_4(%arg0: i32) -> (i32, i32) {
    %c0_i32 = arith.constant 0 : i32
    %c0_i32_0 = arith.constant 0 : i32
    %c0_i32_1 = arith.constant 0 : i32
    return %c0_i32, %c0_i32_0 : i32, i32
  }
  func.func @transform_5(%arg0: i32) -> (i32, i32) {
    %c0_i32 = arith.constant 0 : i32
    %c0_i32_0 = arith.constant 0 : i32
    %c0_i32_1 = arith.constant 0 : i32
    return %c0_i32, %c0_i32_0 : i32, i32
  }
  func.func @transform_6(%arg0: i32) -> (i32, i32) {
    %c0_i32 = arith.constant 0 : i32
    %c0_i32_0 = arith.constant 0 : i32
    %c0_i32_1 = arith.constant 0 : i32
    return %c0_i32, %c0_i32_0 : i32, i32
  }
  func.func @transform_7(%arg0: i32) -> (i32, i32) {
    %c0_i32 = arith.constant 0 : i32
    %c0_i32_0 = arith.constant 0 : i32
    %c0_i32_1 = arith.constant 0 : i32
    return %c0_i32, %c0_i32_0 : i32, i32
  }
  func.func @transform_8(%arg0: i32) -> (i32, i32) {
    %c0_i32 = arith.constant 0 : i32
    %c0_i32_0 = arith.constant 0 : i32
    %c0_i32_1 = arith.constant 0 : i32
    return %c0_i32, %c0_i32_0 : i32, i32
  }
  func.func @transform_9(%arg0: i32) -> (i32, i32) {
    %c0_i32 = arith.constant 0 : i32
    %c0_i32_0 = arith.constant 0 : i32
    return %arg0, %c0_i32 : i32, i32
  }
}

</mosaic_0001>

<bundles_post_ra>
// kernel: transformer_decoder.20
= control target key start
LH: loop header
LB: loop body
LE: loop exit
PB: predicated region body
PF: predicated region fallthrough
CT: control target
= control target key end

     0   :  { %s317_s12 = smov 0   ;;  %s337_s0 = inlined_call_operand.vmem [shape: f32[16,32], index: 0, kind: input, shape index: {}]   ;;  %s338_s1 = inlined_call_operand.vmem [shape: bf16[32,32], index: 1, kind: input, shape index: {}]   ;;  %s339_s2 = inlined_call_operand.vmem [shape: f32[1,32], index: 2, kind: input, shape index: {}]   ;;  %s340_s3 = inlined_call_operand.vmem [shape: f32[16,32], index: 3, kind: output, shape index: {}]  }
   0x1 LB: > { %s260_s13 = sadd.s32 4294967295, %s295_s12   ;;  %p264_p0 = scmp.ge.s32.totalorder %s295_s12, 1  ;;  %s295_s12 = sphi %s317_s12, %s13_s12  }
   0x2   : > { %p136_p1 = scmp.lt.s32.totalorder %s295_s12, 3 }
   0x4   : > { %p137_p2 = pnand %p264_p0, %p136_p1 }
   0x5   : > { %p158_p3 = scmp.lt.s32.totalorder (!%p137_p2), %s260_s13, 1 }
   0x6   : > { %140 = sbr.rel (%p137_p2) target bundleno = 153 (0x99), region = 32 }
   0xb   : > { %v279_v0 = vld [vmem:[%s338_s1 + $0x8] sm:$0xff]  ;;  %v278_v1 = vld [vmem:[%s338_s1] sm:$0xff]  ;;  %s342_s13 = smov (!%p158_p3, %s260_s13), 1  ;;  %vm189_vm0 = vcmask 261120  }
   0xc   : > { %199 = vmatpush.bf16.msra.mxu0 %v279_v0  ;;  %s265_s18 = sshll.u32 %s342_s13, 3  ;;  %v288_v4 = vld [vmem:[%s339_s2] ss:$0 sm:$0xff] }
   0xd   : > { %s161_s21 = scalar_lea.vmem %s337_s0, %s265_s18  ;;  %s165_s26 = scalar_lea.vmem %s340_s3, %s265_s18 }
   0xe   : > { %v167_v2 = vld [vmem:[%s161_s21] sm:$0xff] }
   0xf   : > { %v168_v3 = vpack.c.bf16 %v167_v2, %v167_v2 }
  0x10   : > { %200 = vmatpush.bf16.msra.mxu0 %v278_v1 }
  0x13   : > { %275 = vmatmul.msk.bf16.vlgmr.msra.gmra.mxu0 %vm189_vm0, %v168_v3 }
  0x90   : > { %v202_v5 = vpop.f32.mrf.mxu0 }
  0x91   : > { %v203_v6 = vadd.f32 %v288_v4, %v202_v5 }
  0x93   : > { %206 = vst.msk [vmem:[%s165_s26] sm:$0xff] %vm189_vm0, %v203_v6 }
  0x98   : > { %v204_v7 = vpop.f32.mrf.mxu0 }
  0x99 PF: > { %s13_s12 = sadd.s32 1, %s295_s12  }
  0x9a   : > { %p10_p4 = scmp.ge.s32.totalorder %s13_s12, 4  }
  0x9c   :  { %12 = sbr.rel (!%p10_p4) target bundleno = 1 (0x1), region = 62 }

// kernel: transformer_decoder.21
= control target key start
LH: loop header
LB: loop body
LE: loop exit
PB: predicated region body
PF: predicated region fallthrough
CT: control target
= control target key end

     0   :  { %s430_s18 = smov 0   ;;  %s469_s0 = inlined_call_operand.vmem [shape: f32[16,32], index: 0, kind: input, shape index: {}]   ;;  %s470_s1 = inlined_call_operand.vmem [shape: f32[1,32], index: 1, kind: input, shape index: {}]   ;;  %s471_s2 = inlined_call_operand.vmem [shape: f32[1,32], index: 2, kind: input, shape index: {}]   ;;  %s472_s3 = inlined_call_operand.vmem [shape: bf16[32,96], index: 3, kind: input, shape index: {}]   ;;  %s473_s4 = inlined_call_operand.vmem [shape: f32[1,96], index: 4, kind: input, shape index: {}]   ;;  %s474_s5 = inlined_call_operand.vmem [shape: bf16[16,96], index: 5, kind: output, shape index: {}]  }
   0x1 LB: > { %s355_s19 = sadd.s32 4294967295, %s397_s18   ;;  %p359_p0 = scmp.ge.s32.totalorder %s397_s18, 1  ;;  %s397_s18 = sphi %s430_s18, %s15_s18  }
   0x2   : > { %p186_p1 = scmp.lt.s32.totalorder %s397_s18, 3 }
   0x4   : > { %p187_p2 = pnand %p359_p0, %p186_p1 }
   0x5   : > { %p212_p3 = scmp.lt.s32.totalorder (!%p187_p2), %s355_s19, 1 }
   0x6   : > { %190 = sbr.rel (%p187_p2) target bundleno = 419 (0x1a3), region = 40 }
   0xb   : > { %s476_s19 = smov (!%p212_p3, %s355_s19), 1  ;;  %vm224_vm0 = vcmask 261120   ;;  %v399_v2 = vmov 32.0   ;;  %v374_v14 = vld [vmem:[%s472_s3 + $0x8] sm:$0xff]  ;;  %v373_v15 = vld [vmem:[%s472_s3] sm:$0xff]  ;;  %vm300_vm5 = vcmask 781312  }
   0xc   : > { %s360_s20 = sshll.u32 %s476_s19, 3  ;;  %387 = vrcp.f32 %v399_v2  ;;  %292 = vmatpush.bf16.msra.mxu0 %v374_v14  ;;  %v384_v25 = vld [vmem:[%s470_s1] ss:$0 sm:$0xff]  ;;  %s361_s9 = sshll.u32 %s476_s19, 2 }
   0xd   : > { %s215_s23 = scalar_lea.vmem %s469_s0, %s360_s20  ;;  %v385_v28 = vld [vmem:[%s471_s2] ss:$0 sm:$0xff]  ;;  %s219_s12 = scalar_lea.vmem %s474_s5, %s361_s9 }
   0xe   : > { %v221_v0 = vld [vmem:[%s215_s23] sm:$0xff] }
   0xf   : > { %v225_v1 = vsel %vm224_vm0, %v221_v0, 0.0  ;;  %v386_v32 = vld [vmem:[%s473_s4] ss:$0 sm:$0xff] }
  0x10   : > { %226 = vadd.xlane.f32.xlu0 %v225_v1  ;;  %293 = vmatpush.bf16.msra.mxu0 %v373_v15 }
  0x12   : > { %v388_v3 = vpop.eup %387 }
  0x13   : > { %v229_v4 = vmul.f32 32.0, %v388_v3  ;;  %vm233_vm1 = vweird.f32 %v388_v3 }
  0x15   : > { %v230_v5 = vsub.f32 1.0, %v229_v4 }
  0x17   : > { %v231_v6 = vmul.f32 %v388_v3, %v230_v5 }
  0x19   : > { %v232_v7 = vadd.f32 %v388_v3, %v231_v6 }
  0x1b   : > { %v234_v8 = vsel %vm233_vm1, %v388_v3, %v232_v7 }
  0x83   : > { %v227_v9 = vpop.xlane.xlu0 %226 }
  0x84   : > { %v235_v10 = vmul.f32 %v234_v8, %v227_v9 }
  0x86   : > { %v236_v11 = vsub.f32 %v221_v0, %v235_v10 }
  0x88   : > { %v237_v12 = vmul.f32 %v236_v11, %v236_v11 }
  0x8a   : > { %v238_v13 = vsel %vm224_vm0, %v237_v12, 0.0 }
  0x8b   : > { %239 = vadd.xlane.f32.xlu0 %v238_v13 }
  0xfe   : > { %v240_v16 = vpop.xlane.xlu0 %239 }
  0xff   : > { %v241_v17 = vmul.f32 %v240_v16, %v234_v8 }
 0x101   : > { %v242_v18 = vadd.f32 1e-06, %v241_v17 }
 0x103   : > { %389 = vrsqrt.f32 %v242_v18  ;;  %vm249_vm3 = vweird.f32 %v242_v18 }
 0x109   : > { %v390_v19 = vpop.eup %389 }
 0x10a   : > { %v244_v20 = vmul.f32 %v390_v19, %v242_v18  ;;  %vm250_vm2 = vweird.f32 %v390_v19 }
 0x10b   : > { %vm251_vm4 = vmor %vm249_vm3, %vm250_vm2 }
 0x10c   : > { %v245_v21 = vmul.f32 %v390_v19, %v244_v20 }
 0x10e   : > { %v246_v22 = vmul.f32 0.5, %v245_v21 }
 0x110   : > { %v247_v23 = vsub.f32 1.5, %v246_v22 }
 0x112   : > { %v248_v24 = vmul.f32 %v390_v19, %v247_v23 }
 0x114   : > { %v252_v26 = vsel %vm251_vm4, %v390_v19, %v248_v24 }
 0x115   : > { %v253_v27 = vmul.f32 %v252_v26, %v236_v11 }
 0x117   : > { %v257_v29 = vmul.f32 %v384_v25, %v253_v27 }
 0x119   : > { %v261_v30 = vadd.f32 %v385_v28, %v257_v29 }
 0x11b   : > { %v262_v31 = vpack.c.bf16 %v261_v30, %v261_v30 }
 0x11d   : > { %370 = vmatmul.msk.bf16.vlgmr.msra.gmra.mxu0 %vm224_vm0, %v262_v31 }
 0x19a   : > { %v295_v33 = vpop.f32.mrf.mxu0 }
 0x19b   : > { %v296_v34 = vadd.f32 %v386_v32, %v295_v33 }
 0x19d   : > { %v299_v35 = vpack.c.bf16 %v296_v34, %v296_v34 }
 0x19f   : > { %301 = vst.msk [vmem:[%s219_s12] sm:$0xf] %vm300_vm5, %v299_v35 }
 0x1a2   : > { %v297_v36 = vpop.f32.mrf.mxu0 }
 0x1a3 PF: > { %s15_s18 = sadd.s32 1, %s397_s18  }
 0x1a4   : > { %p12_p4 = scmp.ge.s32.totalorder %s15_s18, 4  }
 0x1a6   :  { %14 = sbr.rel (!%p12_p4) target bundleno = 1 (0x1), region = 70 }

// kernel: transformer_decoder.22
= control target key start
LH: loop header
LB: loop body
LE: loop exit
PB: predicated region body
PF: predicated region fallthrough
CT: control target
= control target key end

     0   :  { %s589_s9 = smov 0   ;;  %s669_s0 = inlined_call_operand.vmem [shape: bf16[2,8,96], index: 0, kind: input, shape index: {}]   ;;  %s670_s1 = inlined_call_operand.vmem [shape: f32[2,1,8], index: 1, kind: input, shape index: {}]   ;;  %s671_s2 = inlined_call_operand.vmem [shape: bf16[2,8,32], index: 2, kind: output, shape index: {}]  }
   0x1 LB: > { %s495_s10 = sadd.s32 4294967295, %s557_s9   ;;  %p499_p0 = scmp.ge.s32.totalorder %s557_s9, 1  ;;  %s557_s9 = sphi %s589_s9, %s12_s9  }
   0x2   : > { %p119_p1 = scmp.lt.s32.totalorder %s557_s9, 3 }
   0x4   : > { %p120_p2 = pnand %p499_p0, %p119_p1 }
   0x5   : > { %p142_p3 = scmp.lt.s32.totalorder (!%p120_p2), %s495_s10, 1  ;;  %s559_s15 = smov (!%p120_p2), 96  }
   0x6   : > { %123 = sbr.rel (%p120_p2) target bundleno = 1194 (0x4aa), region = 28  ;;  %s560_s16 = smov (!%p120_p2), 88  }
   0x7   : > { %s561_s17 = smov (!%p120_p2), 120   ;;  %s562_s18 = smov (!%p120_p2), 64  }
   0x8   : > { %s563_s22 = smov (!%p120_p2), 80   ;;  %s565_s23 = smov (!%p120_p2), 72  }
   0x9   : > { %s566_s24 = smov (!%p120_p2), 112   ;;  %s567_s25 = smov (!%p120_p2), 104  }
   0xa   : > { %s568_s26 = smov (!%p120_p2), 56   ;;  %s569_s27 = smov (!%p120_p2), 40  }
   0xb   : > { %s675_s10 = smov (!%p142_p3, %s495_s10), 1  ;;  %vm171_vm0 = vcmask 64512   ;;  %v154_v18 = vlaneseq  ;;  %v564_v19 = vmov 0   ;;  %vm209_vm5 = vcmask 1043456   ;;  %s570_s3 = smov 48  }
   0xc   : > { %s500_s11 = sshll.u32 %s675_s10, 2  ;;  %s148_s21 = scalar_lea.vmem %s670_s1, %s675_s10  ;;  %vm227_vm6 = vcmask 60416   ;;  %vm295_vm7 = vcmask 126016   ;;  %vm363_vm8 = vcmask 191616   ;;  %vm431_vm9 = vcmask 257216  }
   0xd   : > { %s145_s14 = scalar_lea.vmem %s669_s0, %s500_s11  ;;  %v159_v15 = vld [vmem:[%s148_s21] sm:$0x1]  ;;  %v155_v21 = vshrl.u32 %v154_v18, 7  ;;  %v157_v22 = vand.u32 127, %v154_v18  ;;  %s647_s30 = scalar_lea.vmem %s671_s2, %s500_s11 }
   0xe   : > { %v165_v0 = vld [vmem:[%s145_s14] sm:$0xf]  ;;  %vm160_vm1 = vcmp.gt.f32.partialorder %v159_v15, 0.5  ;;  %s571_s4 = smov 8   ;;  %s572_s5 = smov 16  }
   0xf   : > { %v167_v1 = vunpack.c.l.b16 %v165_v0  ;;  %v229_v3 = vld [vmem:[%s145_s14] sm:$0xf]  ;;  %v161_v20 = vsel %vm160_vm1, 1, %v564_v19  ;;  %vm158_vm2 = vcmp.gt.s32.totalorder %v157_v22, %v155_v21  ;;  %s573_s6 = smov 24  }
  0x10   : > { %v231_v4 = vunpack.c.l.b16 %v229_v3  ;;  %v297_v8 = vld [vmem:[%s145_s14] sm:$0xf]  ;;  %v162_v23 = vperm.slane %v161_v20, 0 }
  0x11   : > { %v168_v2 = vpack.c.b16 %v167_v1, %v167_v1  ;;  %v299_v10 = vunpack.c.l.b16 %v297_v8  ;;  %v365_v12 = vld [vmem:[%s145_s14] sm:$0xf] }
  0x12   : > { %v605_v5 = vpack.c.b16 %v231_v4, %v231_v4  ;;  %v367_v14 = vunpack.c.l.b16 %v365_v12  ;;  %vm163_vm3 = vcmp.eq.s32.totalorder %v162_v23, 1 }
  0x13   : > { %169 = vrot.lane.b32.xlu0 %v168_v2, %s559_s15  ;;  %v616_v13 = vpack.c.b16 %v299_v10, %v299_v10  ;;  %vm621_vm4 = vmor %vm158_vm2, %vm163_vm3 }
  0x14   : > { %235 = vrot.lane.b32.xlu1 %v605_v5, %s560_s16  ;;  %233 = vrot.lane.b32.xlu2 %v605_v5, %s561_s17  ;;  %v368_v17 = vpack.c.b16 %v367_v14, %v367_v14 }
  0x1c   : > { %204 = vrot.lane.b32.xlu2 %v168_v2, %s562_s18 }
  0x24   : > { %303 = vrot.lane.b32.xlu2 %v616_v13, %s563_s22 }
  0x2c   : > { %371 = vrot.lane.b32.xlu2 %v368_v17, %s565_s23 }
  0x34   : > { %301 = vrot.lane.b32.xlu2 %v616_v13, %s566_s24 }
  0x3c   : > { %369 = vrot.lane.b32.xlu2 %v368_v17, %s567_s25 }
  0x6e   : > { %v234_v16 = vpop.permute.xlu2 %233 }
  0x76   : > { %v205_v29 = vpop.permute.xlu2 %204 }
  0x77   : > { %v211_v34 = vsel %vm209_vm5, %v205_v29, 0 }
  0x78   : > { %220 = vmatpush.bf16.msra.mxu1 %v211_v34 }
  0x7e   : > { %v304_v30 = vpop.permute.xlu2 %303 }
  0x7f   : > { %v309_v32 = vsel %vm171_vm0, %v304_v30, 0 }
  0x80   : > { %318 = vmatpush.bf16.xpose.msrb.mxu1 %v309_v32 }
  0x85   : > { %v170_v6 = vpop.permute.xlu0 %169 }
  0x86   : > { %v176_v7 = vsel %vm171_vm0, %v170_v6, 0  ;;  %v236_v9 = vpop.permute.xlu1 %235  ;;  %v372_v31 = vpop.permute.xlu2 %371 }
  0x87   : > { %185 = vmatpush.bf16.xpose.msra.mxu0 %v176_v7  ;;  %v241_v11 = vsel %vm171_vm0, %v236_v9, 0  ;;  %v377_v33 = vsel %vm171_vm0, %v372_v31, 0 }
  0x88   : > { %250 = vmatpush.bf16.xpose.msra.mxu2 %v241_v11 }
  0x8e   : > { %502 = vmatmul.msk.bf16.vlgmr.msra.gmra.mxu0 %vm171_vm0, %v165_v0  ;;  %v302_v35 = vpop.permute.xlu2 %301 }
  0x8f   : > { %504 = vmatmul.msk.bf16.vlgmr.msra.gmra.mxu2 %vm171_vm0, %v234_v16  ;;  %386 = vmatpush.bf16.xpose.msrb.mxu0 %v377_v33 }
  0x96   : > { %v370_v36 = vpop.permute.xlu2 %369 }
  0x9e   : > { %508 = vmatmul.msk.bf16.vlgmr.msrb.gmra.mxu0 %vm171_vm0, %v370_v36 }
 0x10b   : > { %v187_v25 = vpop.f32.mrf.mxu0 }
 0x10c   : > { %v191_v26 = vsel %vm621_vm4, -1e+18, %v187_v25 }
 0x10d   : > { %v192_v27 = vsel %vm171_vm0, %v191_v26, -inf }
 0x10e   : > { %193 = vmax.xlane.f32.xlu0 %v192_v27 }
 0x112   : > { %v252_v37 = vpop.f32.mrf.mxu2 }
 0x113   : > { %v189_v28 = vpop.f32.mrf.mxu0  ;;  %v256_v38 = vsel %vm621_vm4, -1e+18, %v252_v37 }
 0x114   : > { %v257_v40 = vsel %vm171_vm0, %v256_v38, -inf }
 0x115   : > { %258 = vmax.xlane.f32.xlu2 %v257_v40 }
 0x11a   : > { %v254_v43 = vpop.f32.mrf.mxu2 }
 0x11b   : > { %v388_v46 = vpop.f32.mrf.mxu0 }
 0x11c   : > { %v392_v47 = vsel %vm621_vm4, -1e+18, %v388_v46 }
 0x11d   : > { %v393_v48 = vsel %vm171_vm0, %v392_v47, -inf }
 0x123   : > { %v390_v50 = vpop.f32.mrf.mxu0 }
 0x181   : > { %v194_v39 = vpop.xlane.xlu0 %193 }
 0x182   : > { %v195_v41 = vsub.f32 %v191_v26, %v194_v39 }
 0x184   : > { %v196_v42 = vmul.f32 1.442695, %v195_v41 }
 0x186   : > { %535 = vpow2.f32 %v196_v42 }
 0x188   : > { %v259_v56 = vpop.xlane.xlu2 %258 }
 0x189   : > { %v260_v58 = vsub.f32 %v256_v38, %v259_v56 }
 0x18b   : > { %v261_v59 = vmul.f32 1.442695, %v260_v58 }
 0x18c   : > { %v536_v44 = vpop.eup %535 }
 0x18d   : > { %v198_v45 = vsel %vm171_vm0, %v536_v44, 0.0 }
 0x18e   : > { %199 = vadd.xlane.f32.xlu1 %v198_v45 }
 0x196   : > { %394 = vmax.xlane.f32.xlu1 %v393_v48 }
 0x1af   : > { %269 = vrot.lane.b32.xlu1 %v605_v5, %s568_s26 }
 0x1b7   : > { %405 = vrot.lane.b32.xlu1 %v368_v17, %s569_s27 }
 0x201   : > { %v200_v49 = vpop.xlane.xlu1 %199 }
 0x202   : > { %537 = vrcp.f32 %v200_v49 }
 0x203   : > { %539 = vpow2.f32 %v261_v59 }
 0x208   : > { %v538_v51 = vpop.eup %537 }
 0x209   : > { %v202_v52 = vmul.f32 %v538_v51, %v536_v44  ;;  %v395_v60 = vpop.xlane.xlu1 %394  ;;  %v540_v2 = vpop.eup %539 }
 0x20a   : > { %v396_v62 = vsub.f32 %v392_v47, %v395_v60  ;;  %v263_v4 = vsel %vm171_vm0, %v540_v2, 0.0 }
 0x20b   : > { %v203_v53 = vpack.c.bf16 %v202_v52, %v202_v52 }
 0x20c   : > { %v397_v1 = vmul.f32 1.442695, %v396_v62 }
 0x20d   : > { %503 = vmatmul.msk.bf16.vlgmr.msra.gmra.mxu1 %vm171_vm0, %v203_v53 }
 0x20e   : > { %541 = vpow2.f32 %v397_v1 }
 0x214   : > { %v542_v5 = vpop.eup %541 }
 0x215   : > { %v399_v6 = vsel %vm171_vm0, %v542_v5, 0.0 }
 0x21d   : > { %506 = vmatmul.msk.bf16.vlgmr.msrb.gmra.mxu1 %vm171_vm0, %v302_v35 }
 0x221   : > { %v270_v7 = vpop.permute.xlu1 %269 }
 0x222   : > { %v275_v8 = vsel %vm209_vm5, %v270_v7, 0 }
 0x223   : > { %284 = vmatpush.bf16.msra.mxu3 %v275_v8 }
 0x229   : > { %v406_v9 = vpop.permute.xlu1 %405 }
 0x22a   : > { %v411_v10 = vsel %vm209_vm5, %v406_v9, 0 }
 0x22b   : > { %420 = vmatpush.bf16.msrb.mxu2 %v411_v10 }
 0x28a   : > { %v222_v54 = vpop.f32.mrf.mxu1 }
 0x28b   : > { %v226_v55 = vpack.c.bf16 %v222_v54, %v222_v54 }
 0x28d   : > { %228 = vst.msk [vmem:[%s647_s30] sm:$0xf] %vm227_vm6, %v226_v55 }
 0x292   : > { %v224_v57 = vpop.f32.mrf.mxu1 }
 0x29a   : > { %v320_v61 = vpop.f32.mrf.mxu1 }
 0x29b   : > { %v324_v63 = vsel %vm621_vm4, -1e+18, %v320_v61 }
 0x29c   : > { %v325_v0 = vsel %vm171_vm0, %v324_v63, -inf }
 0x29d   : > { %326 = vmax.xlane.f32.xlu0 %v325_v0 }
 0x2a2   : > { %v322_v3 = vpop.f32.mrf.mxu1 }
 0x2a5   : > { %264 = vadd.xlane.f32.xlu0 %v263_v4 }
 0x2ad   : > { %400 = vadd.xlane.f32.xlu0 %v399_v6 }
 0x310   : > { %v327_v11 = vpop.xlane.xlu0 %326 }
 0x311   : > { %v328_v12 = vsub.f32 %v324_v63, %v327_v11 }
 0x313   : > { %v329_v14 = vmul.f32 1.442695, %v328_v12 }
 0x315   : > { %543 = vpow2.f32 %v329_v14 }
 0x318   : > { %v265_v15 = vpop.xlane.xlu0 %264 }
 0x319   : > { %545 = vrcp.f32 %v265_v15 }
 0x31b   : > { %v544_v16 = vpop.eup %543 }
 0x31c   : > { %v331_v17 = vsel %vm171_vm0, %v544_v16, 0.0 }
 0x31d   : > { %332 = vadd.xlane.f32.xlu0 %v331_v17 }
 0x31f   : > { %v546_v18 = vpop.eup %545 }
 0x320   : > { %v401_v19 = vpop.xlane.xlu0 %400  ;;  %v267_v20 = vmul.f32 %v546_v18, %v540_v2 }
 0x321   : > { %547 = vrcp.f32 %v401_v19 }
 0x322   : > { %v268_v21 = vpack.c.bf16 %v267_v20, %v267_v20 }
 0x324   : > { %505 = vmatmul.msk.bf16.vlgmr.msra.gmra.mxu3 %vm171_vm0, %v268_v21 }
 0x327   : > { %v548_v22 = vpop.eup %547 }
 0x328   : > { %v403_v23 = vmul.f32 %v548_v22, %v542_v5 }
 0x32a   : > { %v404_v24 = vpack.c.bf16 %v403_v23, %v403_v23 }
 0x32c   : > { %509 = vmatmul.msk.bf16.vlgmr.msrb.gmra.mxu2 %vm171_vm0, %v404_v24 }
 0x331   : > { %337 = vrot.lane.b32.xlu0 %v616_v13, %s570_s3 }
 0x390   : > { %v333_v25 = vpop.xlane.xlu0 %332 }
 0x391   : > { %549 = vrcp.f32 %v333_v25 }
 0x397   : > { %v550_v26 = vpop.eup %549 }
 0x398   : > { %v335_v27 = vmul.f32 %v550_v26, %v544_v16 }
 0x39a   : > { %v336_v30 = vpack.c.bf16 %v335_v27, %v335_v27 }
 0x3a3   : > { %v338_v28 = vpop.permute.xlu0 %337 }
 0x3a4   : > { %v343_v29 = vsel %vm209_vm5, %v338_v28, 0 }
 0x3a5   : > { %352 = vmatpush.bf16.msrb.mxu3 %v343_v29 }
 0x3a7   : > { %v286_v31 = vpop.f32.mrf.mxu3 }
 0x3a8   : > { %v290_v32 = vpack.c.bf16 %v286_v31, %v286_v31  ;;  %507 = vmatmul.msk.bf16.vlgmr.msrb.gmra.mxu3 %vm171_vm0, %v336_v30 }
 0x3aa   : > { %292 = vrot.lane.b32.xlu2 %v290_v32, %s571_s4 }
 0x3af   : > { %v288_v33 = vpop.f32.mrf.mxu3  ;;  %v422_v34 = vpop.f32.mrf.mxu2 }
 0x3b0   : > { %v426_v39 = vpack.c.bf16 %v422_v34, %v422_v34 }
 0x3b7   : > { %v424_v13 = vpop.f32.mrf.mxu2 }
 0x404   : > { %v293_v35 = vpop.permute.xlu2 %292 }
 0x405   : > { %296 = vst.msk [vmem:[%s647_s30] sm:$0xf] %vm295_vm7, %v293_v35 }
 0x42b   : > { %v354_v36 = vpop.f32.mrf.mxu3 }
 0x42c   : > { %v358_v37 = vpack.c.bf16 %v354_v36, %v354_v36 }
 0x42e   : > { %360 = vrot.lane.b32.xlu1 %v358_v37, %s572_s5 }
 0x433   : > { %v356_v38 = vpop.f32.mrf.mxu3 }
 0x436   : > { %428 = vrot.lane.b32.xlu1 %v426_v39, %s573_s6 }
 0x4a0   : > { %v361_v40 = vpop.permute.xlu1 %360 }
 0x4a1   : > { %364 = vst.msk [vmem:[%s647_s30] sm:$0xf] %vm363_vm8, %v361_v40 }
 0x4a8   : > { %v429_v41 = vpop.permute.xlu1 %428 }
 0x4a9   : > { %432 = vst.msk [vmem:[%s647_s30] sm:$0xf] %vm431_vm9, %v429_v41 }
 0x4aa PF: > { %s12_s9 = sadd.s32 1, %s557_s9  }
 0x4ab   : > { %p9_p4 = scmp.ge.s32.totalorder %s12_s9, 4  }
 0x4ad   :  { %11 = sbr.rel (!%p9_p4) target bundleno = 1 (0x1), region = 61 }

// kernel: transformer_decoder.23
= control target key start
LH: loop header
LB: loop body
LE: loop exit
PB: predicated region body
PF: predicated region fallthrough
CT: control target
= control target key end

     0   :  { %s380_s15 = smov 0   ;;  %s409_s0 = inlined_call_operand.vmem [shape: bf16[16,32], index: 0, kind: input, shape index: {}]   ;;  %s410_s1 = inlined_call_operand.vmem [shape: f32[16,32], index: 1, kind: input, shape index: {}]   ;;  %s411_s2 = inlined_call_operand.vmem [shape: bf16[32,32], index: 2, kind: input, shape index: {}]   ;;  %s412_s3 = inlined_call_operand.vmem [shape: f32[1,32], index: 3, kind: input, shape index: {}]   ;;  %s413_s4 = inlined_call_operand.vmem [shape: f32[16,32], index: 4, kind: output, shape index: {}]  }
   0x1 LB: > { %s317_s16 = sadd.s32 4294967295, %s353_s15   ;;  %p321_p0 = scmp.ge.s32.totalorder %s353_s15, 1  ;;  %s353_s15 = sphi %s380_s15, %s14_s15  }
   0x2   : > { %p170_p1 = scmp.lt.s32.totalorder %s353_s15, 3 }
   0x4   : > { %p171_p2 = pnand %p321_p0, %p170_p1 }
   0x5   : > { %p198_p3 = scmp.lt.s32.totalorder (!%p171_p2), %s317_s16, 1 }
   0x6   : > { %174 = sbr.rel (%p171_p2) target bundleno = 153 (0x99), region = 36 }
   0xb   : > { %v337_v0 = vld [vmem:[%s411_s2 + $0x8] sm:$0xff]  ;;  %v336_v1 = vld [vmem:[%s411_s2] sm:$0xff]  ;;  %s415_s16 = smov (!%p198_p3, %s317_s16), 1  ;;  %vm232_vm0 = vcmask 261120  }
   0xc   : > { %242 = vmatpush.bf16.msra.mxu0 %v337_v0  ;;  %s322_s21 = sshll.u32 %s415_s16, 2  ;;  %s323_s25 = sshll.u32 %s415_s16, 3  ;;  %v346_v3 = vld [vmem:[%s412_s3] ss:$0 sm:$0xff] }
   0xd   : > { %s201_s24 = scalar_lea.vmem %s409_s0, %s322_s21  ;;  %s205_s28 = scalar_lea.vmem %s410_s1, %s323_s25 }
   0xe   : > { %v211_v2 = vld [vmem:[%s201_s24] sm:$0xf]  ;;  %s209_s7 = scalar_lea.vmem %s413_s4, %s323_s25 }
   0xf   : > { %v249_v5 = vld [vmem:[%s205_s28] sm:$0xff] }
  0x10   : > { %243 = vmatpush.bf16.msra.mxu0 %v336_v1 }
  0x13   : > { %333 = vmatmul.msk.bf16.vlgmr.msra.gmra.mxu0 %vm232_vm0, %v211_v2 }
  0x90   : > { %v245_v4 = vpop.f32.mrf.mxu0 }
  0x91   : > { %v246_v6 = vadd.f32 %v346_v3, %v245_v4 }
  0x93   : > { %v250_v7 = vadd.f32 %v249_v5, %v246_v6 }
  0x95   : > { %251 = vst.msk [vmem:[%s209_s7] sm:$0xff] %vm232_vm0, %v250_v7 }
  0x98   : > { %v247_v8 = vpop.f32.mrf.mxu0 }
  0x99 PF: > { %s14_s15 = sadd.s32 1, %s353_s15  }
  0x9a   : > { %p11_p4 = scmp.ge.s32.totalorder %s14_s15, 4  }
  0x9c   :  { %13 = sbr.rel (!%p11_p4) target bundleno = 1 (0x1), region = 69 }

// kernel: transformer_decoder.25
= control target key start
LH: loop header
LB: loop body
LE: loop exit
PB: predicated region body
PF: predicated region fallthrough
CT: control target
= control target key end

     0   :  { %vm36_vm0 = vcmask 261120   ;;  %vm54_vm1 = vcmask 257024   ;;  %s107_s1 = inlined_call_operand.vmem [shape: bf16[32,32], index: 1, kind: input, shape index: {}]   ;;  %s108_s2 = inlined_call_operand.vmem [shape: f32[1,32], index: 2, kind: input, shape index: {}]   ;;  %s109_s0 = inlined_call_operand.vmem [shape: bf16[8,32], index: 0, kind: input, shape index: {}]   ;;  %s110_s3 = inlined_call_operand.vmem [shape: bf16[8,32], index: 3, kind: output, shape index: {}]  }
   0x1   :  { %v70_v0 = vld [vmem:[%s107_s1 + $0x8] sm:$0xff]  ;;  %v69_v1 = vld [vmem:[%s107_s1] sm:$0xff] }
   0x2   :  { %46 = vmatpush.bf16.msra.mxu0 %v70_v0  ;;  %v15_v2 = vld [vmem:[%s109_s0] sm:$0xf] }
   0x3   :  { %v71_v3 = vld [vmem:[%s108_s2] ss:$0 sm:$0xff] }
   0x6   :  { %47 = vmatpush.bf16.msra.mxu0 %v69_v1 }
   0x9   :  { %68 = vmatmul.msk.bf16.vlgmr.msra.gmra.mxu0 %vm36_vm0, %v15_v2 }
  0x86   :  { %v49_v4 = vpop.f32.mrf.mxu0 }
  0x87   :  { %v50_v5 = vadd.f32 %v71_v3, %v49_v4 }
  0x89   :  { %v53_v6 = vpack.c.bf16 %v50_v5, %v50_v5 }
  0x8b   :  { %55 = vst.msk [vmem:[%s110_s3] sm:$0xf] %vm54_vm1, %v53_v6 }
  0x8e   :  { %v51_v7 = vpop.f32.mrf.mxu0 }

// kernel: transformer_decoder.24
= control target key start
LH: loop header
LB: loop body
LE: loop exit
PB: predicated region body
PF: predicated region fallthrough
CT: control target
= control target key end

     0   :  { %s430_s18 = smov 0   ;;  %s469_s0 = inlined_call_operand.vmem [shape: f32[16,32], index: 0, kind: input, shape index: {}]   ;;  %s470_s1 = inlined_call_operand.vmem [shape: f32[1,32], index: 1, kind: input, shape index: {}]   ;;  %s471_s2 = inlined_call_operand.vmem [shape: f32[1,32], index: 2, kind: input, shape index: {}]   ;;  %s472_s3 = inlined_call_operand.vmem [shape: bf16[32,64], index: 3, kind: input, shape index: {}]   ;;  %s473_s4 = inlined_call_operand.vmem [shape: f32[1,64], index: 4, kind: input, shape index: {}]   ;;  %s474_s5 = inlined_call_operand.vmem [shape: bf16[16,64], index: 5, kind: output, shape index: {}]  }
   0x1 LB: > { %s355_s19 = sadd.s32 4294967295, %s397_s18   ;;  %p359_p0 = scmp.ge.s32.totalorder %s397_s18, 1  ;;  %s397_s18 = sphi %s430_s18, %s15_s18  }
   0x2   : > { %p186_p1 = scmp.lt.s32.totalorder %s397_s18, 3 }
   0x4   : > { %p187_p2 = pnand %p359_p0, %p186_p1 }
   0x5   : > { %p212_p3 = scmp.lt.s32.totalorder (!%p187_p2), %s355_s19, 1 }
   0x6   : > { %190 = sbr.rel (%p187_p2) target bundleno = 419 (0x1a3), region = 40 }
   0xb   : > { %s476_s19 = smov (!%p212_p3, %s355_s19), 1  ;;  %vm224_vm0 = vcmask 261120   ;;  %v399_v2 = vmov 32.0   ;;  %v374_v14 = vld [vmem:[%s472_s3 + $0x8] sm:$0xff]  ;;  %v373_v15 = vld [vmem:[%s472_s3] sm:$0xff]  ;;  %vm300_vm5 = vcmask 519168  }
   0xc   : > { %s360_s20 = sshll.u32 %s476_s19, 3  ;;  %387 = vrcp.f32 %v399_v2  ;;  %292 = vmatpush.bf16.msra.mxu0 %v374_v14  ;;  %v384_v25 = vld [vmem:[%s470_s1] ss:$0 sm:$0xff]  ;;  %s361_s9 = sshll.u32 %s476_s19, 2 }
   0xd   : > { %s215_s23 = scalar_lea.vmem %s469_s0, %s360_s20  ;;  %v385_v28 = vld [vmem:[%s471_s2] ss:$0 sm:$0xff]  ;;  %s219_s12 = scalar_lea.vmem %s474_s5, %s361_s9 }
   0xe   : > { %v221_v0 = vld [vmem:[%s215_s23] sm:$0xff] }
   0xf   : > { %v225_v1 = vsel %vm224_vm0, %v221_v0, 0.0  ;;  %v386_v32 = vld [vmem:[%s473_s4] ss:$0 sm:$0xff] }
  0x10   : > { %226 = vadd.xlane.f32.xlu0 %v225_v1  ;;  %293 = vmatpush.bf16.msra.mxu0 %v373_v15 }
  0x12   : > { %v388_v3 = vpop.eup %387 }
  0x13   : > { %v229_v4 = vmul.f32 32.0, %v388_v3  ;;  %vm233_vm1 = vweird.f32 %v388_v3 }
  0x15   : > { %v230_v5 = vsub.f32 1.0, %v229_v4 }
  0x17   : > { %v231_v6 = vmul.f32 %v388_v3, %v230_v5 }
  0x19   : > { %v232_v7 = vadd.f32 %v388_v3, %v231_v6 }
  0x1b   : > { %v234_v8 = vsel %vm233_vm1, %v388_v3, %v232_v7 }
  0x83   : > { %v227_v9 = vpop.xlane.xlu0 %226 }
  0x84   : > { %v235_v10 = vmul.f32 %v234_v8, %v227_v9 }
  0x86   : > { %v236_v11 = vsub.f32 %v221_v0, %v235_v10 }
  0x88   : > { %v237_v12 = vmul.f32 %v236_v11, %v236_v11 }
  0x8a   : > { %v238_v13 = vsel %vm224_vm0, %v237_v12, 0.0 }
  0x8b   : > { %239 = vadd.xlane.f32.xlu0 %v238_v13 }
  0xfe   : > { %v240_v16 = vpop.xlane.xlu0 %239 }
  0xff   : > { %v241_v17 = vmul.f32 %v240_v16, %v234_v8 }
 0x101   : > { %v242_v18 = vadd.f32 1e-06, %v241_v17 }
 0x103   : > { %389 = vrsqrt.f32 %v242_v18  ;;  %vm249_vm3 = vweird.f32 %v242_v18 }
 0x109   : > { %v390_v19 = vpop.eup %389 }
 0x10a   : > { %v244_v20 = vmul.f32 %v390_v19, %v242_v18  ;;  %vm250_vm2 = vweird.f32 %v390_v19 }
 0x10b   : > { %vm251_vm4 = vmor %vm249_vm3, %vm250_vm2 }
 0x10c   : > { %v245_v21 = vmul.f32 %v390_v19, %v244_v20 }
 0x10e   : > { %v246_v22 = vmul.f32 0.5, %v245_v21 }
 0x110   : > { %v247_v23 = vsub.f32 1.5, %v246_v22 }
 0x112   : > { %v248_v24 = vmul.f32 %v390_v19, %v247_v23 }
 0x114   : > { %v252_v26 = vsel %vm251_vm4, %v390_v19, %v248_v24 }
 0x115   : > { %v253_v27 = vmul.f32 %v252_v26, %v236_v11 }
 0x117   : > { %v257_v29 = vmul.f32 %v384_v25, %v253_v27 }
 0x119   : > { %v261_v30 = vadd.f32 %v385_v28, %v257_v29 }
 0x11b   : > { %v262_v31 = vpack.c.bf16 %v261_v30, %v261_v30 }
 0x11d   : > { %370 = vmatmul.msk.bf16.vlgmr.msra.gmra.mxu0 %vm224_vm0, %v262_v31 }
 0x19a   : > { %v295_v33 = vpop.f32.mrf.mxu0 }
 0x19b   : > { %v296_v34 = vadd.f32 %v386_v32, %v295_v33 }
 0x19d   : > { %v299_v35 = vpack.c.bf16 %v296_v34, %v296_v34 }
 0x19f   : > { %301 = vst.msk [vmem:[%s219_s12] sm:$0xf] %vm300_vm5, %v299_v35 }
 0x1a2   : > { %v297_v36 = vpop.f32.mrf.mxu0 }
 0x1a3 PF: > { %s15_s18 = sadd.s32 1, %s397_s18  }
 0x1a4   : > { %p12_p4 = scmp.ge.s32.totalorder %s15_s18, 4  }
 0x1a6   :  { %14 = sbr.rel (!%p12_p4) target bundleno = 1 (0x1), region = 70 }

// kernel: mul.48
= control target key start
LH: loop header
LB: loop body
LE: loop exit
PB: predicated region body
PF: predicated region fallthrough
CT: control target
= control target key end

     0   :  { %vm5_vm0 = vcmask 1045508   ;;  %s12_s6 = smov 48  ;;  %s34_s11 = smov 48  ;;  %vm7_vm1 = vcmask 64512   ;;  %vm18_vm2 = vcmask 392512   ;;  %vm29_vm3 = vcmask 326912   ;;  %s154_s0 = inlined_call_operand.vmem [shape: f32[6,6,8], index: 0, kind: input, shape index: {}]   ;;  %s155_s1 = inlined_call_operand.vmem [shape: f32[6,48], index: 1, kind: output, shape index: {}]  }
   0x1   :  { %v64_v0 = vld [vmem:[%s154_s0 + $0x5] ss:$8 sm:$0xf]   ;;  %v68_v3 = vld [vmem:[%s154_s0 + $0x3] ss:$8 sm:$0xf]  }
   0x2   :  { %v65_v1 = vld [vmem:[%s154_s0 + $0x5] ss:$8 sm:%s12_s6]   ;;  %v69_v4 = vld [vmem:[%s154_s0 + $0x3] ss:$8 sm:%s34_s11]   ;;  %s79_s16 = smov 40   ;;  %s23_s17 = smov 48 }
   0x3   :  { %v15_v2 = vsel %vm5_vm0, %v65_v1, %v64_v0  ;;  %v37_v5 = vsel %vm5_vm0, %v69_v4, %v68_v3  ;;  %s80_s18 = smov 24   ;;  %v66_v6 = vld [vmem:[%s154_s0 + $0x4] ss:$8 sm:$0xf]   ;;  %s45_s23 = smov 48  ;;  %vm40_vm4 = vcmask 261312  }
   0x4   :  { %16 = vrot.lane.b32.xlu0 %v15_v2, %s79_s16  ;;  %38 = vrot.lane.b32.xlu1 %v37_v5, %s80_s18  ;;  %v67_v7 = vld [vmem:[%s154_s0 + $0x4] ss:$8 sm:%s23_s17]   ;;  %s56_s30 = smov 48  ;;  %s81_s4 = smov 8   ;;  %vm51_vm5 = vcmask 195712   ;;  %vm62_vm6 = vcmask 130112  }
   0x5   :  { %v70_v8 = vld [vmem:[%s154_s0 + $0x2] ss:$8 sm:$0xf]   ;;  %v72_v9 = vld [vmem:[%s154_s0 + $0x1] ss:$8 sm:$0xf]   ;;  %v26_v12 = vsel %vm5_vm0, %v67_v7, %v66_v6 }
   0x6   :  { %v71_v10 = vld [vmem:[%s154_s0 + $0x2] ss:$8 sm:%s45_s23]   ;;  %v73_v11 = vld [vmem:[%s154_s0 + $0x1] ss:$8 sm:%s56_s30]   ;;  %s82_s5 = smov 32   ;;  %s83_s6 = smov 16  }
   0x7   :  { %v59_v13 = vsel %vm5_vm0, %v73_v11, %v72_v9  ;;  %v48_v14 = vsel %vm5_vm0, %v71_v10, %v70_v8  ;;  %s3_s7 = smov 48  ;;  %v2_v15 = vld [vmem:[%s154_s0] ss:$8 sm:$0xf]  }
   0x8   :  { %60 = vrot.lane.b32.xlu2 %v59_v13, %s81_s4  ;;  %v4_v16 = vld [vmem:[%s154_s0] ss:$8 sm:%s3_s7]  }
   0x9   :  { %v6_v17 = vsel %vm5_vm0, %v4_v16, %v2_v15 }
   0xa   :  { %8 = vst.msk [vmem:[%s155_s1] sm:$0x3f] %vm7_vm1, %v6_v17  }
   0xc   :  { %27 = vrot.lane.b32.xlu0 %v26_v12, %s82_s5  ;;  %49 = vrot.lane.b32.xlu1 %v48_v14, %s83_s6 }
  0x62   :  { %v61_v18 = vpop.permute.xlu2 %60  }
  0x76   :  { %v17_v19 = vpop.permute.xlu0 %16   ;;  %v39_v20 = vpop.permute.xlu1 %38  }
  0x77   :  { %19 = vst.msk [vmem:[%s155_s1] sm:$0x3f] %vm18_vm2, %v17_v19  }
  0x7e   :  { %v28_v21 = vpop.permute.xlu0 %27   ;;  %v50_v22 = vpop.permute.xlu1 %49  }
  0x7f   :  { %30 = vst.msk [vmem:[%s155_s1] sm:$0x3f] %vm29_vm3, %v28_v21  }
  0x80   :  { %41 = vst.msk [vmem:[%s155_s1] sm:$0x3f] %vm40_vm4, %v39_v20  }
  0x81   :  { %52 = vst.msk [vmem:[%s155_s1] sm:$0x3f] %vm51_vm5, %v50_v22  }
  0x82   :  { %63 = vst.msk [vmem:[%s155_s1] sm:$0x3f] %vm62_vm6, %v61_v18  }

// kernel: transformer_decoder.26
= control target key start
LH: loop header
LB: loop body
LE: loop exit
PB: predicated region body
PF: predicated region fallthrough
CT: control target
= control target key end

     0   :  { %s451_s15 = smov 0   ;;  %s487_s0 = inlined_call_operand.vmem [shape: bf16[2,8,64], index: 0, kind: input, shape index: {}]   ;;  %s488_s1 = inlined_call_operand.vmem [shape: bf16[2,4,32], index: 1, kind: input, shape index: {}]   ;;  %s489_s2 = inlined_call_operand.vmem [shape: f32[2,1,4], index: 2, kind: input, shape index: {}]   ;;  %s490_s3 = inlined_call_operand.vmem [shape: bf16[2,6,4], index: 3, kind: input, shape index: {}]   ;;  %s491_s4 = inlined_call_operand.vmem [shape: f32[2,8,6], index: 4, kind: output, shape index: {}]  }
   0x1 LB: > { %s391_s16 = sadd.s32 4294967295, %s423_s15   ;;  %p395_p0 = scmp.ge.s32.totalorder %s423_s15, 1  ;;  %s423_s15 = sphi %s451_s15, %s14_s15  }
   0x2   : > { %p187_p1 = scmp.lt.s32.totalorder %s423_s15, 3 }
   0x4   : > { %p188_p2 = pnand %p395_p0, %p187_p1 }
   0x5   : > { %p222_p3 = scmp.lt.s32.totalorder (!%p188_p2), %s391_s16, 1 }
   0x6   : > { %191 = sbr.rel (%p188_p2) target bundleno = 540 (0x21c), region = 36 }
   0xb   : > { %s493_s16 = smov (!%p222_p3, %s391_s16), 1  ;;  %vm245_vm0 = vcmask 261120   ;;  %v425_v4 = vmov 0   ;;  %vm270_vm3 = vcmask 31744   ;;  %vm303_vm4 = vcmask 48128  }
   0xc   : > { %s397_s17 = sshll.u32 %s493_s16, 1  ;;  %s396_s21 = sshll.u32 %s493_s16, 2 }
   0xd   : > { %s229_s20 = scalar_lea.vmem %s488_s1, %s397_s17  ;;  %s225_s24 = scalar_lea.vmem %s487_s0, %s396_s21 }
   0xe   : > { %v243_v0 = vld [vmem:[%s229_s20] sm:$0x3]  ;;  %s232_s27 = scalar_lea.vmem %s489_s2, %s493_s16  ;;  %s236_s30 = scalar_lea.vmem %s490_s3, %s396_s21 }
   0xf   : > { %v250_v1 = vsel %vm245_vm0, %v243_v0, 0  ;;  %v242_v2 = vld [vmem:[%s225_s24] sm:$0xf]  ;;  %s399_s5 = sshll.u32 %s493_s16, 3 }
  0x10   : > { %259 = vmatpush.bf16.xpose.msra.mxu0 %v250_v1  ;;  %v244_v3 = vld [vmem:[%s232_s27] sm:$0x1]  ;;  %s240_s8 = scalar_lea.vmem %s491_s4, %s399_s5 }
  0x11   : > { %vm265_vm1 = vcmp.gt.f32.partialorder %v244_v3, 0.5  ;;  %v283_v16 = vld [vmem:[%s236_s30] sm:$0x7] }
  0x12   : > { %v266_v5 = vsel %vm265_vm1, 1, %v425_v4  ;;  %v288_v17 = vsel %vm270_vm3, %v283_v16, 0 }
  0x13   : > { %v267_v6 = vperm.slane %v266_v5, 0  ;;  %297 = vmatpush.bf16.xpose.msra.mxu1 %v288_v17 }
  0x15   : > { %vm268_vm2 = vcmp.eq.s32.totalorder %v267_v6, 1 }
  0x17   : > { %400 = vmatmul.msk.bf16.vlgmr.msra.gmra.mxu0 %vm245_vm0, %v242_v2 }
  0x94   : > { %v261_v7 = vpop.f32.mrf.mxu0 }
  0x95   : > { %v269_v8 = vsel %vm268_vm2, -1e+18, %v261_v7 }
  0x96   : > { %v271_v9 = vsel %vm270_vm3, %v269_v8, -inf }
  0x97   : > { %272 = vmax.xlane.f32.xlu0 %v271_v9 }
  0x9c   : > { %v263_v10 = vpop.f32.mrf.mxu0 }
 0x10a   : > { %v273_v11 = vpop.xlane.xlu0 %272 }
 0x10b   : > { %v274_v12 = vsub.f32 %v269_v8, %v273_v11 }
 0x10d   : > { %v275_v13 = vmul.f32 1.442695, %v274_v12 }
 0x10f   : > { %413 = vpow2.f32 %v275_v13 }
 0x115   : > { %v414_v14 = vpop.eup %413 }
 0x116   : > { %v277_v15 = vsel %vm270_vm3, %v414_v14, 0.0 }
 0x117   : > { %278 = vadd.xlane.f32.xlu0 %v277_v15 }
 0x18a   : > { %v279_v18 = vpop.xlane.xlu0 %278 }
 0x18b   : > { %415 = vrcp.f32 %v279_v18 }
 0x191   : > { %v416_v19 = vpop.eup %415 }
 0x192   : > { %v281_v20 = vmul.f32 %v416_v19, %v414_v14 }
 0x194   : > { %v282_v21 = vpack.c.bf16 %v281_v20, %v281_v20 }
 0x196   : > { %401 = vmatmul.msk.bf16.vlgmr.msra.gmra.mxu1 %vm270_vm3, %v282_v21 }
 0x213   : > { %v299_v22 = vpop.f32.mrf.mxu1 }
 0x214   : > { %304 = vst.msk [vmem:[%s240_s8] sm:$0xff] %vm303_vm4, %v299_v22 }
 0x21b   : > { %v301_v23 = vpop.f32.mrf.mxu1 }
 0x21c PF: > { %s14_s15 = sadd.s32 1, %s423_s15  }
 0x21d   : > { %p11_p4 = scmp.ge.s32.totalorder %s14_s15, 4  }
 0x21f   :  { %13 = sbr.rel (!%p11_p4) target bundleno = 1 (0x1), region = 75 }

// kernel: transformer_decoder.27
= control target key start
LH: loop header
LB: loop body
LE: loop exit
PB: predicated region body
PF: predicated region fallthrough
CT: control target
= control target key end

     0   :  { %s397_s12 = smov 0   ;;  %s429_s0 = inlined_call_operand.vmem [shape: bf16[96,32], index: 0, kind: input, shape index: {}]   ;;  %s430_s1 = inlined_call_operand.vmem [shape: bf16[32,64], index: 1, kind: input, shape index: {}]   ;;  %s431_s2 = inlined_call_operand.vmem [shape: f32[1,64], index: 2, kind: input, shape index: {}]   ;;  %s432_s3 = inlined_call_operand.vmem [shape: bf16[96,64], index: 3, kind: output, shape index: {}]  }
   0x1 LB: > { %s319_s13 = sadd.s32 4294967295, %s375_s12   ;;  %p323_p0 = scmp.ge.s32.totalorder %s375_s12, 1  ;;  %s375_s12 = sphi %s397_s12, %s13_s12  }
   0x2   : > { %p138_p1 = scmp.lt.s32.totalorder %s375_s12, 3 }
   0x4   : > { %p139_p2 = pnand %p323_p0, %p138_p1 }
   0x5   : > { %s162_s16 = smul.u32 (!%p139_p2), 6, %s319_s13 }
   0x6   : > { %142 = sbr.rel (%p139_p2) target bundleno = 165 (0xa5), region = 32 }
   0x7   : > { %p163_p3 = scmp.lt.s32.totalorder (!%p139_p2), %s162_s16, 11 }
   0xb   : > { %v355_v0 = vld [vmem:[%s430_s1 + $0x8] sm:$0xff]  ;;  %v354_v1 = vld [vmem:[%s430_s1] sm:$0xff]  ;;  %s434_s16 = smov (!%p163_p3, %s162_s16), 11  ;;  %vm216_vm0 = vcmask 261120   ;;  %vm256_vm1 = vcmask 519168  }
   0xc   : > { %232 = vmatpush.bf16.msra.mxu0 %v355_v0  ;;  %356 = vmatpush.bf16.msra.mxu1 %v355_v0  ;;  %s324_s19 = sshll.u32 %s434_s16, 2  ;;  %v368_v5 = vld [vmem:[%s431_s2] ss:$0 sm:$0xff] }
   0xd   : > { %357 = vmatpush.bf16.msra.mxu2 %v355_v0  ;;  %s166_s22 = scalar_lea.vmem %s429_s0, %s324_s19  ;;  %s172_s27 = scalar_lea.vmem %s432_s3, %s324_s19 }
   0xe   : > { %v351_v2 = vld [vmem:[%s166_s22] sm:$0xff]  ;;  %v352_v3 = vld [vmem:[%s166_s22 + $0x8] sm:$0xff]  ;;  %v353_v4 = vld [vmem:[%s166_s22 + $0x10] sm:$0xff] }
  0x10   : > { %233 = vmatpush.bf16.msra.mxu0 %v354_v1  ;;  %358 = vmatpush.bf16.msra.mxu1 %v354_v1 }
  0x11   : > { %359 = vmatpush.bf16.msra.mxu2 %v354_v1 }
  0x13   : > { %346 = vmatmul.msk.bf16.vlgmr.msra.gmra.mxu0 %vm216_vm0, %v351_v2  ;;  %347 = vmatmul.msk.bf16.vlgmr.msra.gmra.mxu1 %vm216_vm0, %v352_v3 }
  0x14   : > { %348 = vmatmul.msk.bf16.vlgmr.msra.gmra.mxu2 %vm216_vm0, %v353_v4 }
  0x90   : > { %v235_v6 = vpop.f32.mrf.mxu0  ;;  %v240_v7 = vpop.f32.mrf.mxu1 }
  0x91   : > { %v236_v8 = vadd.f32 %v368_v5, %v235_v6  ;;  %v241_v9 = vadd.f32 %v368_v5, %v240_v7 }
  0x93   : > { %v250_v10 = vpack.c.bf16 %v236_v8, %v236_v8  ;;  %v252_v11 = vpack.c.bf16 %v241_v9, %v241_v9 }
  0x95   : > { %257 = vst.msk [vmem:[%s172_s27] sm:$0xf] %vm256_vm1, %v250_v10 }
  0x96   : > { %259 = vst.msk [vmem:[%s172_s27 + $0x8] sm:$0xf] %vm256_vm1, %v252_v11 }
  0x97   : > { %v245_v12 = vpop.f32.mrf.mxu2 }
  0x98   : > { %v246_v13 = vadd.f32 %v368_v5, %v245_v12  ;;  %v237_v14 = vpop.f32.mrf.mxu0  ;;  %v242_v15 = vpop.f32.mrf.mxu1 }
  0x99   : > { %v238_v16 = vadd.f32 %v368_v5, %v237_v14  ;;  %v243_v17 = vadd.f32 %v368_v5, %v242_v15 }
  0x9a   : > { %v254_v18 = vpack.c.bf16 %v246_v13, %v246_v13 }
  0x9b   : > { %v251_v19 = vpack.c.bf16 %v238_v16, %v238_v16  ;;  %v253_v20 = vpack.c.bf16 %v243_v17, %v243_v17 }
  0x9c   : > { %261 = vst.msk [vmem:[%s172_s27 + $0x10] sm:$0xf] %vm256_vm1, %v254_v18 }
  0x9d   : > { %258 = vst.msk [vmem:[%s172_s27 + $0x4] sm:$0xf] %vm256_vm1, %v251_v19 }
  0x9e   : > { %260 = vst.msk [vmem:[%s172_s27 + $0xc] sm:$0xf] %vm256_vm1, %v253_v20 }
  0x9f   : > { %v247_v21 = vpop.f32.mrf.mxu2 }
  0xa0   : > { %v248_v22 = vadd.f32 %v368_v5, %v247_v21 }
  0xa2   : > { %v255_v23 = vpack.c.bf16 %v248_v22, %v248_v22 }
  0xa4   : > { %262 = vst.msk [vmem:[%s172_s27 + $0x14] sm:$0xf] %vm256_vm1, %v255_v23 }
  0xa5 PF: > { %s13_s12 = sadd.s32 1, %s375_s12  }
  0xa6   : > { %p10_p4 = scmp.ge.s32.totalorder %s13_s12, 4  }
  0xa8   :  { %12 = sbr.rel (!%p10_p4) target bundleno = 1 (0x1), region = 62 }

// kernel: transformer_decoder.39
= control target key start
LH: loop header
LB: loop body
LE: loop exit
PB: predicated region body
PF: predicated region fallthrough
CT: control target
= control target key end

     0   :  { %s314_s12 = smov 0   ;;  %s347_s0 = inlined_call_operand.vmem [shape: f32[16,32], index: 0, kind: input, shape index: {}]   ;;  %s348_s1 = inlined_call_operand.vmem [shape: f32[1,32], index: 1, kind: input, shape index: {}]   ;;  %s349_s2 = inlined_call_operand.vmem [shape: f32[1,32], index: 2, kind: input, shape index: {}]   ;;  %s350_s3 = inlined_call_operand.vmem [shape: f32[16,32], index: 3, kind: output, shape index: {}]  }
   0x1 LB: > { %s261_s13 = sadd.s32 4294967295, %s291_s12   ;;  %p265_p0 = scmp.ge.s32.totalorder %s291_s12, 1  ;;  %s291_s12 = sphi %s314_s12, %s13_s12  }
   0x2   : > { %p136_p1 = scmp.lt.s32.totalorder %s291_s12, 3 }
   0x4   : > { %p137_p2 = pnand %p265_p0, %p136_p1 }
   0x5   : > { %p158_p3 = scmp.lt.s32.totalorder (!%p137_p2), %s261_s13, 1 }
   0x6   : > { %140 = sbr.rel (%p137_p2) target bundleno = 284 (0x11c), region = 32 }
   0xb   : > { %s352_s13 = smov (!%p158_p3, %s261_s13), 1  ;;  %vm169_vm0 = vcmask 261120   ;;  %v293_v2 = vmov 32.0   ;;  %v279_v23 = vld [vmem:[%s348_s1] ss:$0 sm:$0xff] }
   0xc   : > { %s266_s14 = sshll.u32 %s352_s13, 3  ;;  %281 = vrcp.f32 %v293_v2  ;;  %v280_v25 = vld [vmem:[%s349_s2] ss:$0 sm:$0xff] }
   0xd   : > { %s161_s17 = scalar_lea.vmem %s347_s0, %s266_s14  ;;  %s165_s24 = scalar_lea.vmem %s350_s3, %s266_s14 }
   0xe   : > { %v166_v0 = vld [vmem:[%s161_s17] sm:$0xff] }
   0xf   : > { %v170_v1 = vsel %vm169_vm0, %v166_v0, 0.0 }
  0x10   : > { %171 = vadd.xlane.f32.xlu0 %v170_v1 }
  0x12   : > { %v282_v3 = vpop.eup %281 }
  0x13   : > { %v174_v4 = vmul.f32 32.0, %v282_v3  ;;  %vm178_vm1 = vweird.f32 %v282_v3 }
  0x15   : > { %v175_v5 = vsub.f32 1.0, %v174_v4 }
  0x17   : > { %v176_v6 = vmul.f32 %v282_v3, %v175_v5 }
  0x19   : > { %v177_v7 = vadd.f32 %v282_v3, %v176_v6 }
  0x1b   : > { %v179_v8 = vsel %vm178_vm1, %v282_v3, %v177_v7 }
  0x83   : > { %v172_v9 = vpop.xlane.xlu0 %171 }
  0x84   : > { %v180_v10 = vmul.f32 %v179_v8, %v172_v9 }
  0x86   : > { %v181_v11 = vsub.f32 %v166_v0, %v180_v10 }
  0x88   : > { %v182_v12 = vmul.f32 %v181_v11, %v181_v11 }
  0x8a   : > { %v183_v13 = vsel %vm169_vm0, %v182_v12, 0.0 }
  0x8b   : > { %184 = vadd.xlane.f32.xlu0 %v183_v13 }
  0xfe   : > { %v185_v14 = vpop.xlane.xlu0 %184 }
  0xff   : > { %v186_v15 = vmul.f32 %v185_v14, %v179_v8 }
 0x101   : > { %v187_v16 = vadd.f32 1e-06, %v186_v15 }
 0x103   : > { %283 = vrsqrt.f32 %v187_v16  ;;  %vm194_vm3 = vweird.f32 %v187_v16 }
 0x109   : > { %v284_v17 = vpop.eup %283 }
 0x10a   : > { %v189_v18 = vmul.f32 %v284_v17, %v187_v16  ;;  %vm195_vm2 = vweird.f32 %v284_v17 }
 0x10b   : > { %vm196_vm4 = vmor %vm194_vm3, %vm195_vm2 }
 0x10c   : > { %v190_v19 = vmul.f32 %v284_v17, %v189_v18 }
 0x10e   : > { %v191_v20 = vmul.f32 0.5, %v190_v19 }
 0x110   : > { %v192_v21 = vsub.f32 1.5, %v191_v20 }
 0x112   : > { %v193_v22 = vmul.f32 %v284_v17, %v192_v21 }
 0x114   : > { %v197_v24 = vsel %vm196_vm4, %v284_v17, %v193_v22 }
 0x115   : > { %v198_v26 = vmul.f32 %v197_v24, %v181_v11 }
 0x117   : > { %v202_v27 = vmul.f32 %v279_v23, %v198_v26 }
 0x119   : > { %v206_v28 = vadd.f32 %v280_v25, %v202_v27 }
 0x11b   : > { %207 = vst.msk [vmem:[%s165_s24] sm:$0xff] %vm169_vm0, %v206_v28 }
 0x11c PF: > { %s13_s12 = sadd.s32 1, %s291_s12  }
 0x11d   : > { %p10_p4 = scmp.ge.s32.totalorder %s13_s12, 4  }
 0x11f   :  { %12 = sbr.rel (!%p10_p4) target bundleno = 1 (0x1), region = 62 }

// kernel: transformer_decoder.28
= control target key start
LH: loop header
LB: loop body
LE: loop exit
PB: predicated region body
PF: predicated region fallthrough
CT: control target
= control target key end

     0   :  { %s925_s15 = smov 0   ;;  %s1080_s0 = inlined_call_operand.vmem [shape: bf16[2,8,64], index: 0, kind: input, shape index: {}]   ;;  %s1081_s1 = inlined_call_operand.vmem [shape: bf16[2,48,64], index: 1, kind: input, shape index: {}]   ;;  %s1082_s2 = inlined_call_operand.vmem [shape: f32[2,8,6], index: 2, kind: input, shape index: {}]   ;;  %s1083_s3 = inlined_call_operand.vmem [shape: bf16[2,6,48], index: 3, kind: input, shape index: {}]   ;;  %s1084_s4 = inlined_call_operand.vmem [shape: bf16[2,8,32], index: 4, kind: output, shape index: {}]  }
   0x1 LB: > { %s766_s16 = sadd.s32 4294967295, %s888_s15   ;;  %p770_p0 = scmp.ge.s32.totalorder %s888_s15, 1  ;;  %s888_s15 = sphi %s925_s15, %s14_s15  }
   0x2   : > { %p189_p1 = scmp.lt.s32.totalorder %s888_s15, 3 }
   0x4   : > { %p190_p2 = pnand %p770_p0, %p189_p1 }
   0x5   : > { %p226_p3 = scmp.lt.s32.totalorder (!%p190_p2), %s766_s16, 1  ;;  %s890_s25 = smov (!%p190_p2), 120  }
   0x6   : > { %193 = sbr.rel (%p190_p2) target bundleno = 1167 (0x48f), region = 36  ;;  %s891_s26 = smov (!%p190_p2), 96  }
   0x7   : > { %s892_s27 = smov (!%p190_p2), 104   ;;  %s893_s28 = smov (!%p190_p2), 88  }
   0x8   : > { %s894_s29 = smov (!%p190_p2), 112   ;;  %s895_s11 = smov (!%p190_p2), 72  }
   0x9   : > { %s896_s12 = smov (!%p190_p2), 80   ;;  %s899_s19 = smov (!%p190_p2), 16  }
   0xb   : > { %s1086_s16 = smov (!%p226_p3, %s766_s16), 1  ;;  %vm300_vm0 = vcmask 64512   ;;  %vm255_vm1 = vcmask 1042432   ;;  %vm251_vm2 = vcmask 48128   ;;  %vm327_vm4 = vcmask 392192  }
   0xc   : > { %s847_s17 = smul.u32 24, %s1086_s16  ;;  %s937_s18 = sshll.u32 %s1086_s16, 2  ;;  %vm366_vm5 = vcmask 60416   ;;  %vm469_vm6 = vcmask 126016   ;;  %vm572_vm7 = vcmask 191616   ;;  %vm675_vm8 = vcmask 257216  }
   0xd   : > { %s943_s21 = scalar_lea.vmem %s1080_s0, %s937_s18  ;;  %s773_s30 = sshll.u32 %s1086_s16, 3 }
   0xe   : > { %s948_s24 = scalar_lea.vmem %s1081_s1, %s847_s17  ;;  %v273_v0 = vld [vmem:[%s943_s21] sm:$0xf]  ;;  %s242_s7 = scalar_lea.vmem %s1083_s3, %s937_s18 }
   0xf   : > { %v952_v1 = vld [vmem:[%s948_s24 + $0x10] sm:$0xff]  ;;  %v281_v2 = vunpack.c.l.b16 %v273_v0  ;;  %v959_v5 = vld [vmem:[%s948_s24 + $0x8] sm:$0xff]  ;;  %v368_v7 = vld [vmem:[%s943_s21] sm:$0xf]  ;;  %s238_s10 = scalar_lea.vmem %s1082_s2, %s773_s30  ;;  %s1062_s16 = scalar_lea.vmem %s1084_s4, %s937_s18 }
  0x10   : > { %v837_v3 = vld [vmem:[%s948_s24 + $0x10] sm:$0xff]  ;;  %399 = vrot.lane.b32.xlu1 %v952_v1, %s890_s25  ;;  %v969_v8 = vld [vmem:[%s948_s24] sm:$0xff]  ;;  %v376_v9 = vunpack.c.l.b16 %v368_v7  ;;  %v836_v12 = vld [vmem:[%s948_s24 + $0x8] sm:$0xff]  ;;  %s897_s17 = smov 8   ;;  %s898_s18 = smov 24  }
  0x11   : > { %v282_v4 = vpack.c.b16 %v281_v2, %v281_v2  ;;  %344 = vrot.lane.b32.xlu2 %v837_v3, %s891_s26  ;;  %v962_v6 = vld [vmem:[%s948_s24 + $0x10] sm:$0xff]  ;;  %v989_v13 = vld [vmem:[%s948_s24 + $0x8] sm:$0xff]  ;;  %v250_v14 = vld [vmem:[%s242_s7] sm:$0x7]  ;;  %v311_v16 = vsel %vm300_vm0, %v837_v3, 0  ;;  %v308_v20 = vsel %vm300_vm0, %v836_v12, 0 }
  0x12   : > { %v377_v10 = vpack.c.b16 %v376_v9, %v376_v9  ;;  %v974_v11 = vld [vmem:[%s948_s24 + $0x10] sm:$0xff]  ;;  %v248_v15 = vld [vmem:[%s238_s10] sm:$0xff]  ;;  %v257_v17 = vsel %vm255_vm1, %v250_v14, 0  ;;  %318 = vmatpush.bf16.xpose.msra.mxu1 %v311_v16  ;;  %v998_v21 = vld [vmem:[%s948_s24 + $0x8] sm:$0xff] }
  0x13   : > { %283 = vrot.lane.b32.xlu0 %v282_v4, %s891_s26  ;;  %v249_v18 = vpack.c.bf16 %v248_v15, %v248_v15  ;;  %266 = vmatpush.bf16.msra.mxu0 %v257_v17  ;;  %v835_v19 = vld [vmem:[%s948_s24] sm:$0xff] }
  0x14   : > { %v305_v22 = vsel %vm300_vm0, %v835_v19, 0  ;;  %v1004_v23 = vld [vmem:[%s948_s24] sm:$0xff] }
  0x15   : > { %v574_v24 = vld [vmem:[%s943_s21] sm:$0xf] }
  0x16   : > { %776 = vmatmul.msk.bf16.vlgmr.msra.gmra.mxu0 %vm251_vm2, %v249_v18  ;;  %v582_v25 = vunpack.c.l.b16 %v574_v24  ;;  %v841_v53 = vld [vmem:[%s948_s24] sm:$0xff] }
  0x17   : > { %v471_v2 = vld [vmem:[%s943_s21] sm:$0xf] }
  0x18   : > { %397 = vrot.lane.b32.xlu1 %v959_v5, %s890_s25  ;;  %v583_v26 = vpack.c.b16 %v582_v25, %v582_v25  ;;  %v479_v3 = vunpack.c.l.b16 %v471_v2 }
  0x19   : > { %605 = vrot.lane.b32.xlu2 %v962_v6, %s892_s27 }
  0x1a   : > { %319 = vmatpush.bf16.xpose.msra.mxu1 %v308_v20  ;;  %v480_v4 = vpack.c.b16 %v479_v3, %v479_v3 }
  0x20   : > { %395 = vrot.lane.b32.xlu1 %v969_v8, %s890_s25 }
  0x21   : > { %378 = vrot.lane.b32.xlu2 %v377_v10, %s893_s28 }
  0x22   : > { %320 = vmatpush.bf16.xpose.msra.mxu1 %v305_v22 }
  0x28   : > { %502 = vrot.lane.b32.xlu1 %v974_v11, %s894_s29 }
  0x29   : > { %603 = vrot.lane.b32.xlu2 %v989_v13, %s892_s27 }
  0x30   : > { %342 = vrot.lane.b32.xlu1 %v836_v12, %s891_s26 }
  0x38   : > { %340 = vrot.lane.b32.xlu1 %v835_v19, %s891_s26 }
  0x40   : > { %500 = vrot.lane.b32.xlu1 %v998_v21, %s894_s29 }
  0x48   : > { %601 = vrot.lane.b32.xlu1 %v1004_v23, %s892_s27 }
  0x50   : > { %584 = vrot.lane.b32.xlu1 %v583_v26, %s895_s11 }
  0x6b   : > { %v345_v27 = vpop.permute.xlu2 %344 }
  0x6c   : > { %357 = vmatpush.bf16.msra.mxu2 %v345_v27 }
  0x73   : > { %v606_v28 = vpop.permute.xlu2 %605 }
  0x74   : > { %v617_v34 = vsel %vm300_vm0, %v606_v28, 0 }
  0x75   : > { %624 = vmatpush.bf16.xpose.msrb.mxu1 %v617_v34 }
  0x7b   : > { %v379_v33 = vpop.permute.xlu2 %378 }
  0x82   : > { %v400_v29 = vpop.permute.xlu1 %399 }
  0x83   : > { %v411_v30 = vsel %vm300_vm0, %v400_v29, 0  ;;  %v604_v37 = vpop.permute.xlu2 %603 }
  0x84   : > { %418 = vmatpush.bf16.xpose.msra.mxu3 %v411_v30  ;;  %v614_v39 = vsel %vm300_vm0, %v604_v37, 0 }
  0x85   : > { %v284_v31 = vpop.permute.xlu0 %283  ;;  %625 = vmatpush.bf16.xpose.msrb.mxu1 %v614_v39 }
  0x86   : > { %789 = vmatmul.msk.bf16.vlgmr.msra.gmra.mxu1 %vm300_vm0, %v284_v31 }
  0x8a   : > { %v398_v32 = vpop.permute.xlu1 %397 }
  0x8b   : > { %v408_v35 = vsel %vm300_vm0, %v398_v32, 0 }
  0x8c   : > { %419 = vmatpush.bf16.xpose.msra.mxu3 %v408_v35 }
  0x92   : > { %v396_v36 = vpop.permute.xlu1 %395 }
  0x93   : > { %v405_v38 = vsel %vm300_vm0, %v396_v36, 0  ;;  %v1017_v44 = vpop.f32.mrf.mxu0 }
  0x94   : > { %420 = vmatpush.bf16.xpose.msra.mxu3 %v405_v38  ;;  %vm272_vm3 = vcmp.lt.f32.partialorder %v1017_v44, 0.5 }
  0x9a   : > { %v503_v40 = vpop.permute.xlu1 %502 }
  0x9b   : > { %803 = vmatmul.msk.bf16.vlgmr.msra.gmra.mxu3 %vm300_vm0, %v379_v33  ;;  %v270_v47 = vpop.f32.mrf.mxu0  ;;  %v514_v7 = vsel %vm300_vm0, %v503_v40, 0 }
  0xa2   : > { %v343_v41 = vpop.permute.xlu1 %342 }
  0xa3   : > { %358 = vmatpush.bf16.msra.mxu2 %v343_v41 }
  0xaa   : > { %v341_v42 = vpop.permute.xlu1 %340 }
  0xab   : > { %359 = vmatpush.bf16.msra.mxu2 %v341_v42 }
  0xaf   : > { %521 = vmatpush.bf16.xpose.msrb.mxu2 %v514_v7 }
  0xb2   : > { %v501_v43 = vpop.permute.xlu1 %500 }
  0xb3   : > { %v511_v18 = vsel %vm300_vm0, %v501_v43, 0 }
  0xb7   : > { %522 = vmatpush.bf16.xpose.msrb.mxu2 %v511_v18 }
  0xba   : > { %v602_v45 = vpop.permute.xlu1 %601 }
  0xbb   : > { %v611_v46 = vsel %vm300_vm0, %v602_v45, 0 }
  0xbc   : > { %626 = vmatpush.bf16.xpose.msrb.mxu1 %v611_v46 }
  0xc2   : > { %v585_v48 = vpop.permute.xlu1 %584 }
  0xc3   : > { %831 = vmatmul.msk.bf16.vlgmr.msrb.gmra.mxu1 %vm300_vm0, %v585_v48 }
 0x103   : > { %v322_v49 = vpop.f32.mrf.mxu1 }
 0x104   : > { %v326_v50 = vsel %vm272_vm3, -1e+18, %v322_v49 }
 0x105   : > { %v328_v51 = vsel %vm327_vm4, %v326_v50, -inf }
 0x106   : > { %329 = vmax.xlane.f32.xlu0 %v328_v51 }
 0x10b   : > { %v324_v52 = vpop.f32.mrf.mxu1 }
 0x11a   : > { %498 = vrot.lane.b32.xlu0 %v841_v53, %s894_s29 }
 0x11e   : > { %v422_v54 = vpop.f32.mrf.mxu3 }
 0x11f   : > { %v426_v15 = vsel %vm272_vm3, -1e+18, %v422_v54 }
 0x120   : > { %v427_v17 = vsel %vm327_vm4, %v426_v15, -inf }
 0x126   : > { %v424_v55 = vpop.f32.mrf.mxu3 }
 0x140   : > { %v628_v56 = vpop.f32.mrf.mxu1 }
 0x141   : > { %v632_v57 = vsel %vm272_vm3, -1e+18, %v628_v56 }
 0x142   : > { %v633_v58 = vsel %vm327_vm4, %v632_v57, -inf }
 0x144   : > { %634 = vmax.xlane.f32.xlu0 %v633_v58 }
 0x148   : > { %v630_v59 = vpop.f32.mrf.mxu1 }
 0x158   : > { %443 = vrot.lane.b32.xlu0 %v952_v1, %s893_s28 }
 0x179   : > { %v330_v60 = vpop.xlane.xlu0 %329 }
 0x17a   : > { %v331_v61 = vsub.f32 %v326_v50, %v330_v60 }
 0x17c   : > { %v332_v62 = vmul.f32 1.442695, %v331_v61 }
 0x17e   : > { %866 = vpow2.f32 %v332_v62 }
 0x184   : > { %v867_v63 = vpop.eup %866 }
 0x185   : > { %v334_v0 = vsel %vm327_vm4, %v867_v63, 0.0 }
 0x186   : > { %335 = vadd.xlane.f32.xlu2 %v334_v0 }
 0x18c   : > { %v499_v9 = vpop.permute.xlu0 %498 }
 0x18d   : > { %v508_v19 = vsel %vm300_vm0, %v499_v9, 0 }
 0x18e   : > { %523 = vmatpush.bf16.xpose.msrb.mxu2 %v508_v19 }
 0x19e   : > { %481 = vrot.lane.b32.xlu2 %v480_v4, %s896_s12 }
 0x1b7   : > { %v635_v10 = vpop.xlane.xlu0 %634 }
 0x1b8   : > { %v636_v1 = vsub.f32 %v632_v57, %v635_v10 }
 0x1ba   : > { %v637_v12 = vmul.f32 1.442695, %v636_v1 }
 0x1bc   : > { %868 = vpow2.f32 %v637_v12 }
 0x1c2   : > { %v869_v14 = vpop.eup %868 }
 0x1c3   : > { %v639_v16 = vsel %vm327_vm4, %v869_v14, 0.0 }
 0x1c4   : > { %640 = vadd.xlane.f32.xlu0 %v639_v16 }
 0x1c7   : > { %428 = vmax.xlane.f32.xlu2 %v427_v17 }
 0x1ca   : > { %v444_v20 = vpop.permute.xlu0 %443 }
 0x1cb   : > { %456 = vmatpush.bf16.msrb.mxu0 %v444_v20 }
 0x1d8   : > { %542 = vrot.lane.b32.xlu0 %v841_v53, %s896_s12 }
 0x1df   : > { %441 = vrot.lane.b32.xlu2 %v959_v5, %s893_s28 }
 0x1f9   : > { %v336_v22 = vpop.xlane.xlu2 %335 }
 0x1fa   : > { %870 = vrcp.f32 %v336_v22 }
 0x200   : > { %v871_v24 = vpop.eup %870 }
 0x201   : > { %v338_v25 = vmul.f32 %v871_v24, %v867_v63  ;;  %v482_v27 = vpop.permute.xlu2 %481 }
 0x203   : > { %v339_v26 = vpack.c.bf16 %v338_v25, %v338_v25 }
 0x205   : > { %790 = vmatmul.msk.bf16.vlgmr.msra.gmra.mxu2 %vm327_vm4, %v339_v26 }
 0x215   : > { %817 = vmatmul.msk.bf16.vlgmr.msrb.gmra.mxu2 %vm300_vm0, %v482_v27 }
 0x237   : > { %v641_v38 = vpop.xlane.xlu0 %640 }
 0x23a   : > { %v429_v28 = vpop.xlane.xlu2 %428 }
 0x23b   : > { %v430_v29 = vsub.f32 %v426_v15, %v429_v28 }
 0x23d   : > { %v431_v30 = vmul.f32 1.442695, %v430_v29 }
 0x23f   : > { %872 = vpow2.f32 %v431_v30 }
 0x240   : > { %874 = vrcp.f32 %v641_v38 }
 0x242   : > { %v442_v32 = vpop.permute.xlu2 %441 }
 0x243   : > { %457 = vmatpush.bf16.msrb.mxu0 %v442_v32 }
 0x245   : > { %v873_v5 = vpop.eup %872 }
 0x246   : > { %v433_v31 = vsel %vm327_vm4, %v873_v5, 0.0  ;;  %v875_v40 = vpop.eup %874 }
 0x247   : > { %434 = vadd.xlane.f32.xlu2 %v433_v31  ;;  %v643_v41 = vmul.f32 %v875_v40, %v869_v14 }
 0x249   : > { %v644_v43 = vpack.c.bf16 %v643_v41, %v643_v41 }
 0x24a   : > { %v543_v55 = vpop.permute.xlu0 %542 }
 0x25f   : > { %649 = vrot.lane.b32.xlu2 %v962_v6, %s895_s11 }
 0x267   : > { %647 = vrot.lane.b32.xlu2 %v989_v13, %s895_s11 }
 0x26f   : > { %546 = vrot.lane.b32.xlu2 %v974_v11, %s896_s12 }
 0x277   : > { %645 = vrot.lane.b32.xlu2 %v1004_v23, %s895_s11 }
 0x27f   : > { %544 = vrot.lane.b32.xlu2 %v998_v21, %s896_s12 }
 0x288   : > { %v361_v6 = vpop.f32.mrf.mxu2 }
 0x289   : > { %v365_v13 = vpack.c.bf16 %v361_v6, %v361_v6 }
 0x28b   : > { %367 = vst.msk [vmem:[%s1062_s16] sm:$0xf] %vm366_vm5, %v365_v13 }
 0x290   : > { %v363_v33 = vpop.f32.mrf.mxu2 }
 0x298   : > { %v525_v11 = vpop.f32.mrf.mxu2 }
 0x299   : > { %v529_v23 = vsel %vm272_vm3, -1e+18, %v525_v11 }
 0x29a   : > { %v530_v34 = vsel %vm327_vm4, %v529_v23, -inf }
 0x29b   : > { %531 = vmax.xlane.f32.xlu1 %v530_v34 }
 0x2a0   : > { %v527_v21 = vpop.f32.mrf.mxu2 }
 0x2b4   : > { %439 = vrot.lane.b32.xlu1 %v969_v8, %s893_s28 }
 0x2ba   : > { %v435_v35 = vpop.xlane.xlu2 %434 }
 0x2c2   : > { %v650_v36 = vpop.permute.xlu2 %649 }
 0x2c3   : > { %662 = vmatpush.bf16.msrb.mxu3 %v650_v36 }
 0x2ca   : > { %v648_v37 = vpop.permute.xlu2 %647 }
 0x2cb   : > { %663 = vmatpush.bf16.msrb.mxu3 %v648_v37 }
 0x2d2   : > { %v547_v39 = vpop.permute.xlu2 %546 }
 0x2da   : > { %v646_v42 = vpop.permute.xlu2 %645 }
 0x2db   : > { %664 = vmatpush.bf16.msrb.mxu3 %v646_v42 }
 0x2de   : > { %832 = vmatmul.msk.bf16.vlgmr.msrb.gmra.mxu3 %vm327_vm4, %v644_v43 }
 0x2e2   : > { %v545_v54 = vpop.permute.xlu2 %544 }
 0x30e   : > { %v532_v44 = vpop.xlane.xlu1 %531 }
 0x30f   : > { %v533_v45 = vsub.f32 %v529_v23, %v532_v44 }
 0x311   : > { %v534_v46 = vmul.f32 1.442695, %v533_v45 }
 0x313   : > { %876 = vpow2.f32 %v534_v46 }
 0x314   : > { %878 = vrcp.f32 %v435_v35 }
 0x319   : > { %v877_v8 = vpop.eup %876 }
 0x31a   : > { %v536_v47 = vsel %vm327_vm4, %v877_v8, 0.0  ;;  %v879_v48 = vpop.eup %878 }
 0x31b   : > { %537 = vadd.xlane.f32.xlu1 %v536_v47  ;;  %v437_v49 = vmul.f32 %v879_v48, %v873_v5 }
 0x31d   : > { %v438_v51 = vpack.c.bf16 %v437_v49, %v437_v49 }
 0x326   : > { %v440_v50 = vpop.permute.xlu1 %439 }
 0x327   : > { %458 = vmatpush.bf16.msrb.mxu0 %v440_v50 }
 0x32a   : > { %804 = vmatmul.msk.bf16.vlgmr.msrb.gmra.mxu0 %vm327_vm4, %v438_v51 }
 0x32b   : > { %559 = vmatpush.bf16.msra.mxu0 %v547_v39 }
 0x32f   : > { %560 = vmatpush.bf16.msra.mxu0 %v545_v54 }
 0x333   : > { %561 = vmatpush.bf16.msra.mxu0 %v543_v55 }
 0x361   : > { %v666_v52 = vpop.f32.mrf.mxu3 }
 0x362   : > { %v670_v63 = vpack.c.bf16 %v666_v52, %v666_v52 }
 0x369   : > { %v668_v53 = vpop.f32.mrf.mxu3 }
 0x38e   : > { %v538_v56 = vpop.xlane.xlu1 %537 }
 0x38f   : > { %880 = vrcp.f32 %v538_v56 }
 0x395   : > { %v881_v57 = vpop.eup %880 }
 0x396   : > { %v540_v58 = vmul.f32 %v881_v57, %v877_v8 }
 0x398   : > { %v541_v59 = vpack.c.bf16 %v540_v58, %v540_v58 }
 0x39a   : > { %818 = vmatmul.msk.bf16.vlgmr.msra.gmra.mxu0 %vm327_vm4, %v541_v59 }
 0x3a7   : > { %v460_v60 = vpop.f32.mrf.mxu0 }
 0x3a8   : > { %v464_v61 = vpack.c.bf16 %v460_v60, %v460_v60 }
 0x3aa   : > { %466 = vrot.lane.b32.xlu2 %v464_v61, %s897_s17 }
 0x3af   : > { %v462_v62 = vpop.f32.mrf.mxu0 }
 0x3b2   : > { %672 = vrot.lane.b32.xlu2 %v670_v63, %s898_s18 }
 0x404   : > { %v467_v0 = vpop.permute.xlu2 %466 }
 0x405   : > { %470 = vst.msk [vmem:[%s1062_s16] sm:$0xf] %vm469_vm6, %v467_v0 }
 0x40c   : > { %v673_v9 = vpop.permute.xlu2 %672 }
 0x417   : > { %v563_v2 = vpop.f32.mrf.mxu0 }
 0x418   : > { %v567_v3 = vpack.c.bf16 %v563_v2, %v563_v2 }
 0x41a   : > { %569 = vrot.lane.b32.xlu1 %v567_v3, %s899_s19 }
 0x41f   : > { %v565_v4 = vpop.f32.mrf.mxu0 }
 0x48c   : > { %v570_v7 = vpop.permute.xlu1 %569 }
 0x48d   : > { %573 = vst.msk [vmem:[%s1062_s16] sm:$0xf] %vm572_vm7, %v570_v7 }
 0x48e   : > { %676 = vst.msk [vmem:[%s1062_s16] sm:$0xf] %vm675_vm8, %v673_v9 }
 0x48f PF: > { %s14_s15 = sadd.s32 1, %s888_s15  }
 0x490   : > { %p11_p4 = scmp.ge.s32.totalorder %s14_s15, 4  }
 0x492   :  { %13 = sbr.rel (!%p11_p4) target bundleno = 1 (0x1), region = 75 }

// kernel: transformer_decoder.29
= control target key start
LH: loop header
LB: loop body
LE: loop exit
PB: predicated region body
PF: predicated region fallthrough
CT: control target
= control target key end

     0   :  { %s693_s30 = smov 0   ;;  %s763_s0 = inlined_call_operand.vmem [shape: bf16[16,32], index: 0, kind: input, shape index: {}]   ;;  %s764_s1 = inlined_call_operand.vmem [shape: bf16[32,32], index: 1, kind: input, shape index: {}]   ;;  %s765_s2 = inlined_call_operand.vmem [shape: f32[1,32], index: 2, kind: input, shape index: {}]   ;;  %s766_s3 = inlined_call_operand.vmem [shape: f32[1,32], index: 3, kind: input, shape index: {}]   ;;  %s767_s4 = inlined_call_operand.vmem [shape: f32[1,32], index: 4, kind: input, shape index: {}]   ;;  %s768_s5 = inlined_call_operand.vmem [shape: bf16[32,64], index: 5, kind: input, shape index: {}]   ;;  %s769_s6 = inlined_call_operand.vmem [shape: f32[1,64], index: 6, kind: input, shape index: {}]   ;;  %s770_s7 = inlined_call_operand.vmem [shape: bf16[64,32], index: 7, kind: input, shape index: {}]   ;;  %s771_s8 = inlined_call_operand.vmem [shape: f32[1,32], index: 8, kind: input, shape index: {}]   ;;  %s772_s9 = inlined_call_operand.vmem [shape: f32[16,32], index: 9, kind: output, shape index: {}]  }
   0x1 LB: > { %s562_s10 = sadd.s32 4294967295, %s640_s30   ;;  %p566_p0 = scmp.ge.s32.totalorder %s640_s30, 1  ;;  %s640_s30 = sphi %s693_s30, %s19_s30  }
   0x2   : > { %p286_p1 = scmp.lt.s32.totalorder %s640_s30, 3 }
   0x4   : > { %p287_p2 = pnand %p566_p0, %p286_p1 }
   0x5   : > { %p320_p3 = scmp.lt.s32.totalorder (!%p287_p2), %s562_s10, 1 }
   0x6   : > { %290 = sbr.rel (%p287_p2) target bundleno = 710 (0x2c6), region = 56 }
   0xb   : > { %v607_v0 = vld [vmem:[%s764_s1 + $0x8] sm:$0xff]  ;;  %v606_v1 = vld [vmem:[%s764_s1] sm:$0xff]  ;;  %s774_s10 = smov (!%p320_p3, %s562_s10), 1  ;;  %vm350_vm0 = vcmask 261120   ;;  %v642_v9 = vmov 32.0   ;;  %v613_v39 = vld [vmem:[%s770_s7 + $0x18] sm:$0xff] }
   0xc   : > { %360 = vmatpush.bf16.msra.mxu0 %v607_v0  ;;  %s567_s15 = sshll.u32 %s774_s10, 2  ;;  %v623_v3 = vld [vmem:[%s765_s2] ss:$0 sm:$0xff]  ;;  %628 = vrcp.f32 %v642_v9  ;;  %v609_v21 = vld [vmem:[%s768_s5 + $0x8] sm:$0xff]  ;;  %498 = vmatpush.bf16.msra.mxu2 %v613_v39  ;;  %v612_v40 = vld [vmem:[%s770_s7 + $0x10] sm:$0xff]  ;;  %vm490_vm5 = vcmask 523264  }
   0xd   : > { %s323_s18 = scalar_lea.vmem %s763_s0, %s567_s15  ;;  %437 = vmatpush.bf16.msra.mxu1 %v609_v21  ;;  %v608_v22 = vld [vmem:[%s768_s5] sm:$0xff]  ;;  %v611_v41 = vld [vmem:[%s770_s7 + $0x8] sm:$0xff]  ;;  %s568_s22 = sshll.u32 %s774_s10, 3 }
   0xe   : > { %v329_v2 = vld [vmem:[%s323_s18] sm:$0xf]  ;;  %s327_s25 = scalar_lea.vmem %s772_s9, %s568_s22 }
   0xf   : > { %v624_v32 = vld [vmem:[%s766_s3] ss:$0 sm:$0xff] }
  0x10   : > { %361 = vmatpush.bf16.msra.mxu0 %v606_v1  ;;  %v625_v35 = vld [vmem:[%s767_s4] ss:$0 sm:$0xff]  ;;  %499 = vmatpush.bf16.msra.mxu2 %v612_v40 }
  0x11   : > { %438 = vmatpush.bf16.msra.mxu1 %v608_v22  ;;  %v610_v42 = vld [vmem:[%s770_s7] sm:$0xff] }
  0x12   : > { %v629_v10 = vpop.eup %628  ;;  %v626_v43 = vld [vmem:[%s769_s6] ss:$0 sm:$0xff] }
  0x13   : > { %577 = vmatmul.msk.bf16.vlgmr.msra.gmra.mxu0 %vm350_vm0, %v329_v2  ;;  %v374_v11 = vmul.f32 32.0, %v629_v10  ;;  %vm378_vm1 = vweird.f32 %v629_v10  ;;  %v627_v57 = vld [vmem:[%s771_s8] ss:$0 sm:$0xff] }
  0x14   : > { %500 = vmatpush.bf16.msra.mxu2 %v611_v41 }
  0x15   : > { %v375_v12 = vsub.f32 1.0, %v374_v11 }
  0x17   : > { %v376_v13 = vmul.f32 %v629_v10, %v375_v12 }
  0x18   : > { %501 = vmatpush.bf16.msra.mxu2 %v610_v42 }
  0x19   : > { %v377_v14 = vadd.f32 %v629_v10, %v376_v13 }
  0x1b   : > { %v379_v15 = vsel %vm378_vm1, %v629_v10, %v377_v14 }
  0x90   : > { %v363_v4 = vpop.f32.mrf.mxu0 }
  0x91   : > { %v364_v5 = vadd.f32 %v623_v3, %v363_v4 }
  0x93   : > { %v717_v6 = vadd.f32 %v364_v5, %v364_v5 }
  0x95   : > { %v370_v7 = vsel %vm350_vm0, %v717_v6, 0.0 }
  0x96   : > { %371 = vadd.xlane.f32.xlu0 %v370_v7 }
  0x98   : > { %v365_v8 = vpop.f32.mrf.mxu0 }
 0x109   : > { %v372_v16 = vpop.xlane.xlu0 %371 }
 0x10a   : > { %v380_v17 = vmul.f32 %v379_v15, %v372_v16 }
 0x10c   : > { %v381_v18 = vsub.f32 %v717_v6, %v380_v17 }
 0x10e   : > { %v382_v19 = vmul.f32 %v381_v18, %v381_v18 }
 0x110   : > { %v383_v20 = vsel %vm350_vm0, %v382_v19, 0.0 }
 0x111   : > { %384 = vadd.xlane.f32.xlu0 %v383_v20 }
 0x184   : > { %v385_v23 = vpop.xlane.xlu0 %384 }
 0x185   : > { %v386_v24 = vmul.f32 %v385_v23, %v379_v15 }
 0x187   : > { %v387_v25 = vadd.f32 1e-06, %v386_v24 }
 0x189   : > { %630 = vrsqrt.f32 %v387_v25  ;;  %vm394_vm3 = vweird.f32 %v387_v25 }
 0x18f   : > { %v631_v26 = vpop.eup %630 }
 0x190   : > { %v389_v27 = vmul.f32 %v631_v26, %v387_v25  ;;  %vm395_vm2 = vweird.f32 %v631_v26 }
 0x191   : > { %vm396_vm4 = vmor %vm394_vm3, %vm395_vm2 }
 0x192   : > { %v390_v28 = vmul.f32 %v631_v26, %v389_v27 }
 0x194   : > { %v391_v29 = vmul.f32 0.5, %v390_v28 }
 0x196   : > { %v392_v30 = vsub.f32 1.5, %v391_v29 }
 0x198   : > { %v393_v31 = vmul.f32 %v631_v26, %v392_v30 }
 0x19a   : > { %v397_v33 = vsel %vm396_vm4, %v631_v26, %v393_v31 }
 0x19b   : > { %v398_v34 = vmul.f32 %v397_v33, %v381_v18 }
 0x19d   : > { %v402_v36 = vmul.f32 %v624_v32, %v398_v34 }
 0x19f   : > { %v406_v37 = vadd.f32 %v625_v35, %v402_v36 }
 0x1a1   : > { %v407_v38 = vpack.c.bf16 %v406_v37, %v406_v37 }
 0x1a3   : > { %586 = vmatmul.msk.bf16.vlgmr.msra.gmra.mxu1 %vm350_vm0, %v407_v38 }
 0x220   : > { %v440_v44 = vpop.f32.mrf.mxu1 }
 0x221   : > { %v441_v45 = vadd.f32 %v626_v43, %v440_v44 }
 0x223   : > { %v445_v46 = vmul.f32 0.044715, %v441_v45  ;;  %v444_v53 = vmul.f32 0.5, %v441_v45 }
 0x225   : > { %v446_v47 = vmul.f32 %v445_v46, %v441_v45 }
 0x227   : > { %v447_v48 = vmul.f32 %v446_v47, %v441_v45 }
 0x228   : > { %v442_v49 = vpop.f32.mrf.mxu1 }
 0x229   : > { %v448_v50 = vadd.f32 %v447_v48, %v441_v45 }
 0x22b   : > { %v449_v51 = vmul.f32 0.7978846, %v448_v50 }
 0x22d   : > { %632 = vtanh.f32 %v449_v51 }
 0x233   : > { %v633_v52 = vpop.eup %632 }
 0x234   : > { %v451_v54 = vadd.f32 1.0, %v633_v52 }
 0x236   : > { %v452_v55 = vmul.f32 %v451_v54, %v444_v53 }
 0x238   : > { %v453_v56 = vpack.c.bf16 %v452_v55, %v452_v55 }
 0x23a   : > { %603 = vmatmul.msk.bf16.vlgmr.msra.gmra.mxu2 %vm490_vm5, %v453_v56 }
 0x2bd   : > { %v503_v58 = vpop.f32.mrf.mxu2 }
 0x2be   : > { %v504_v59 = vadd.f32 %v627_v57, %v503_v58 }
 0x2c0   : > { %v507_v60 = vadd.f32 %v504_v59, %v717_v6 }
 0x2c2   : > { %508 = vst.msk [vmem:[%s327_s25] sm:$0xff] %vm350_vm0, %v507_v60 }
 0x2c5   : > { %v505_v61 = vpop.f32.mrf.mxu2 }
 0x2c6 PF: > { %s19_s30 = sadd.s32 1, %s640_s30  }
 0x2c7   : > { %p16_p4 = scmp.ge.s32.totalorder %s19_s30, 4  }
 0x2c9   :  { %18 = sbr.rel (!%p16_p4) target bundleno = 1 (0x1), region = 86 }

</bundles_post_ra>
